<compile_context>
chip_gen: v7x
topology: tpu7x:2x2x1
jax: 0.10.0
libtpu: 0.0.40
codegen_flags: <defaults>
</compile_context>

<pallas_src>
import jax
import jax.numpy as jnp
from jax.experimental import pallas as pl
from jax.experimental.pallas import tpu as pltpu

INPUT_SIZE = 10
HIDDEN_SIZE = 10
NUM_LAYERS = 3
GATE_SLOT = 128            # one full vreg lane-width per gate (r | z | n)
GATES_W = 3 * GATE_SLOT    # 384


def _gru_kernel(x_ref, wih_ref, whh_ref, bg_ref, bhn_ref, out_ref):
    """3-layer GRU forward (eval mode), all state vreg-resident.

    x_ref   : (B, T, D)      input sequence, native batch-first layout
    wih_ref : (L, D, 3*128)  input->gate weights, gate g lives in lanes [g*128, g*128+H)
    whh_ref : (L, H, 3*128)  hidden->gate weights, same lane packing
    bg_ref  : (L, 1, 3*128)  [b_ir+b_hr | b_iz+b_hz | b_in], one 128-lane slot per gate
    bhn_ref : (L, 1, H)      b_hn (stays inside r * (...))
    out_ref : (B, H)         hidden state of the last layer at the last timestep
    """
    B, T, D = x_ref.shape
    H = HIDDEN_SIZE
    S = GATE_SLOT

    # Per-timestep inputs of the current layer.  For layer 0 these are strided
    # per-t loads of x (off the recurrence chain); afterwards they are the
    # previous layer's hidden states (already vreg-resident values).
    inputs = [x_ref[:, t, :].astype(jnp.float32) for t in range(T)]   # T x (B, D)

    h = None
    for layer in range(NUM_LAYERS):                      # static, tiny
        w_ih = wih_ref[layer]                            # (D, 384)
        w_hh = whh_ref[layer]                            # (H, 384)
        b_g = bg_ref[layer]                              # (1, 384)
        b_hn = bhn_ref[layer]                            # (1, H)

        h = jnp.zeros((B, H), jnp.float32)
        h_seq = []
        for t in range(T):                               # static python loop
            # Input projection: independent of h -> scheduler overlaps it with
            # the previous step's matmul / EUP latency.
            g = jnp.dot(inputs[t], w_ih,
                        preferred_element_type=jnp.float32) + b_g      # (B, 384)
            # Recurrence matmul: the only op that must wait for h_{t-1}.
            hg = jnp.dot(h, w_hh, preferred_element_type=jnp.float32)  # (B, 384)
            # All gate slices below start at lane offsets 0 / 128 / 256: vreg
            # aligned, no XLU rotates.
            rz = jax.nn.sigmoid(g[:, :2 * S] + hg[:, :2 * S])          # (B, 256)
            r = rz[:, :H]
            z = rz[:, S:S + H]
            n = jnp.tanh(g[:, 2 * S:2 * S + H]
                         + r * (hg[:, 2 * S:2 * S + H] + b_hn))
            h = (1.0 - z) * n + z * h
            h_seq.append(h)
        inputs = h_seq                                   # feed the next layer

    out_ref[...] = h.astype(out_ref.dtype)


@jax.jit
def action_model_bbox_forward(x, w_ih, w_hh, b_g, b_hn):
    """x: (B, T, 10) batch_first. Returns (B, 10) == GRU(x)[0][:, -1, :] (eval mode)."""
    B, T, D = x.shape
    H = HIDDEN_SIZE
    cost = pl.CostEstimate(
        flops=NUM_LAYERS * T * (2 * B * D * 3 * H + 2 * B * H * 3 * H + 12 * B * H),
        transcendentals=NUM_LAYERS * T * B * 3 * H,
        bytes_accessed=4 * (B * T * D + B * H)
        + 4 * NUM_LAYERS * (2 * D * GATES_W + GATES_W + H),
    )
    return pl.pallas_call(
        _gru_kernel,
        out_shape=jax.ShapeDtypeStruct((B, H), x.dtype),
        in_specs=[pl.BlockSpec(memory_space=pltpu.MemorySpace.VMEM)] * 5,
        out_specs=pl.BlockSpec(memory_space=pltpu.MemorySpace.VMEM),
        cost_estimate=cost,
    )(x, w_ih, w_hh, b_g, b_hn)


def init_gru_params(key):
    """PyTorch-layout GRU params: per layer (w_ih (3H,Din), w_hh (3H,H), b_ih (3H,), b_hh (3H,)).

    Gate row order follows PyTorch: (r, z, n). Uniform(-1/sqrt(H), 1/sqrt(H)).
    """
    H, D, L = HIDDEN_SIZE, INPUT_SIZE, NUM_LAYERS
    bound = 1.0 / (H ** 0.5)
    ks = jax.random.split(key, 4 * L)
    raw = []
    for l in range(L):
        k0, k1, k2, k3 = ks[4 * l: 4 * l + 4]
        din = D if l == 0 else H
        wi = jax.random.uniform(k0, (3 * H, din), jnp.float32, -bound, bound)
        wh = jax.random.uniform(k1, (3 * H, H), jnp.float32, -bound, bound)
        bi = jax.random.uniform(k2, (3 * H,), jnp.float32, -bound, bound)
        bh = jax.random.uniform(k3, (3 * H,), jnp.float32, -bound, bound)
        raw.append((wi, wh, bi, bh))
    return raw


def _pad_gate_cols(m):
    """(rows, H) block for one gate -> (rows, 128) with real data in lanes [0, H)."""
    return jnp.pad(m, ((0, 0), (0, GATE_SLOT - m.shape[1])))


def pack_params(raw):
    """Repack PyTorch-layout params into the lane-aligned kernel layout.

    Returns:
      w_ih_packed: (L, D, 3*128)   gate g in lanes [g*128, g*128+H)
      w_hh_packed: (L, H, 3*128)
      b_g_packed : (L, 1, 3*128)   [b_ir+b_hr | b_iz+b_hz | b_in]
      b_hn       : (L, 1, H)
    """
    H = HIDDEN_SIZE
    assert INPUT_SIZE == HIDDEN_SIZE, "stacked per-layer packing requires D == H"
    w_ih_p, w_hh_p, b_g_p, b_hn_p = [], [], [], []
    for (wi, wh, bi, bh) in raw:
        w_ih_p.append(jnp.concatenate(
            [_pad_gate_cols(wi[g * H:(g + 1) * H, :].T) for g in range(3)], axis=1))
        w_hh_p.append(jnp.concatenate(
            [_pad_gate_cols(wh[g * H:(g + 1) * H, :].T) for g in range(3)], axis=1))
        fused = [bi[:H] + bh[:H], bi[H:2 * H] + bh[H:2 * H], bi[2 * H:]]
        b_g_p.append(jnp.concatenate(
            [_pad_gate_cols(b.reshape(1, H)) for b in fused], axis=1))
        b_hn_p.append(bh[2 * H:].reshape(1, H))
    return (jnp.stack(w_ih_p), jnp.stack(w_hh_p),
            jnp.stack(b_g_p), jnp.stack(b_hn_p))


def gru_reference(x, raw):
    """Pure-JAX reference of the same 3-layer GRU (eval mode), PyTorch weight layout."""
    B, T, _ = x.shape
    H = HIDDEN_SIZE
    seq = x.astype(jnp.float32)
    for (wi, wh, bi, bh) in raw:
        w_ir, w_iz, w_in = wi[:H], wi[H:2 * H], wi[2 * H:]
        w_hr, w_hz, w_hn = wh[:H], wh[H:2 * H], wh[2 * H:]
        b_ir, b_iz, b_in = bi[:H], bi[H:2 * H], bi[2 * H:]
        b_hr, b_hz, b_hn = bh[:H], bh[H:2 * H], bh[2 * H:]
        h = jnp.zeros((B, H), jnp.float32)
        outs = []
        for t in range(T):
            x_t = seq[:, t, :]
            r = jax.nn.sigmoid(x_t @ w_ir.T + b_ir + h @ w_hr.T + b_hr)
            z = jax.nn.sigmoid(x_t @ w_iz.T + b_iz + h @ w_hz.T + b_hz)
            n = jnp.tanh(x_t @ w_in.T + b_in + r * (h @ w_hn.T + b_hn))
            h = (1.0 - z) * n + z * h
            outs.append(h)
        seq = jnp.stack(outs, axis=1)
    return seq[:, -1, :]


if __name__ == "__main__":
    key = jax.random.PRNGKey(0)
    k_x, k_p = jax.random.split(key)

    B, T = 2, 8
    x = jax.random.normal(k_x, (B, T, INPUT_SIZE), dtype=jnp.float32)

    raw = init_gru_params(k_p)
    packed = pack_params(raw)

    out = jax.block_until_ready(action_model_bbox_forward(x, *packed))

    ref = gru_reference(x, raw)
    assert out.shape == (B, HIDDEN_SIZE)
    assert jnp.max(jnp.abs(out - ref)) < 1e-4, "Pallas GRU mismatch vs reference"

    print("KERNEL_OK")
</pallas_src>

<mosaic_0001>
module attributes {stable_mosaic.version = 11 : i64} {
  func.func @_gru_kernel(%arg0: memref<2x8x10xf32, #tpu.memory_space<vmem>>, %arg1: memref<3x10x384xf32, #tpu.memory_space<vmem>>, %arg2: memref<3x10x384xf32, #tpu.memory_space<vmem>>, %arg3: memref<3x1x384xf32, #tpu.memory_space<vmem>>, %arg4: memref<3x1x10xf32, #tpu.memory_space<vmem>>, %arg5: memref<2x10xf32, #tpu.memory_space<vmem>>) attributes {dimension_semantics = [], scalar_prefetch = 0 : i64, scratch_operands = 0 : i64, tpu.core_type = #tpu.core_type<tc>} {
    %c0 = arith.constant 0 : index
    %c0_0 = arith.constant 0 : index
    %c0_1 = arith.constant 0 : index
    %0 = vector.load %arg0[%c0, %c0_0, %c0_1] : memref<2x8x10xf32, #tpu.memory_space<vmem>>, vector<2x1x10xf32>
    %1 = vector.shape_cast %0 : vector<2x1x10xf32> to vector<2x10xf32>
    %c0_2 = arith.constant 0 : index
    %c1 = arith.constant 1 : index
    %c0_3 = arith.constant 0 : index
    %2 = vector.load %arg0[%c0_2, %c1, %c0_3] : memref<2x8x10xf32, #tpu.memory_space<vmem>>, vector<2x1x10xf32>
    %3 = vector.shape_cast %2 : vector<2x1x10xf32> to vector<2x10xf32>
    %c0_4 = arith.constant 0 : index
    %c2 = arith.constant 2 : index
    %c0_5 = arith.constant 0 : index
    %4 = vector.load %arg0[%c0_4, %c2, %c0_5] : memref<2x8x10xf32, #tpu.memory_space<vmem>>, vector<2x1x10xf32>
    %5 = vector.shape_cast %4 : vector<2x1x10xf32> to vector<2x10xf32>
    %c0_6 = arith.constant 0 : index
    %c3 = arith.constant 3 : index
    %c0_7 = arith.constant 0 : index
    %6 = vector.load %arg0[%c0_6, %c3, %c0_7] : memref<2x8x10xf32, #tpu.memory_space<vmem>>, vector<2x1x10xf32>
    %7 = vector.shape_cast %6 : vector<2x1x10xf32> to vector<2x10xf32>
    %c0_8 = arith.constant 0 : index
    %c4 = arith.constant 4 : index
    %c0_9 = arith.constant 0 : index
    %8 = vector.load %arg0[%c0_8, %c4, %c0_9] : memref<2x8x10xf32, #tpu.memory_space<vmem>>, vector<2x1x10xf32>
    %9 = vector.shape_cast %8 : vector<2x1x10xf32> to vector<2x10xf32>
    %c0_10 = arith.constant 0 : index
    %c5 = arith.constant 5 : index
    %c0_11 = arith.constant 0 : index
    %10 = vector.load %arg0[%c0_10, %c5, %c0_11] : memref<2x8x10xf32, #tpu.memory_space<vmem>>, vector<2x1x10xf32>
    %11 = vector.shape_cast %10 : vector<2x1x10xf32> to vector<2x10xf32>
    %c0_12 = arith.constant 0 : index
    %c6 = arith.constant 6 : index
    %c0_13 = arith.constant 0 : index
    %12 = vector.load %arg0[%c0_12, %c6, %c0_13] : memref<2x8x10xf32, #tpu.memory_space<vmem>>, vector<2x1x10xf32>
    %13 = vector.shape_cast %12 : vector<2x1x10xf32> to vector<2x10xf32>
    %c0_14 = arith.constant 0 : index
    %c7 = arith.constant 7 : index
    %c0_15 = arith.constant 0 : index
    %14 = vector.load %arg0[%c0_14, %c7, %c0_15] : memref<2x8x10xf32, #tpu.memory_space<vmem>>, vector<2x1x10xf32>
    %15 = vector.shape_cast %14 : vector<2x1x10xf32> to vector<2x10xf32>
    %c0_16 = arith.constant 0 : index
    %c0_17 = arith.constant 0 : index
    %c0_18 = arith.constant 0 : index
    %16 = vector.load %arg1[%c0_16, %c0_17, %c0_18] : memref<3x10x384xf32, #tpu.memory_space<vmem>>, vector<1x10x384xf32>
    %17 = vector.shape_cast %16 : vector<1x10x384xf32> to vector<10x384xf32>
    %c0_19 = arith.constant 0 : index
    %c0_20 = arith.constant 0 : index
    %c0_21 = arith.constant 0 : index
    %18 = vector.load %arg2[%c0_19, %c0_20, %c0_21] : memref<3x10x384xf32, #tpu.memory_space<vmem>>, vector<1x10x384xf32>
    %19 = vector.shape_cast %18 : vector<1x10x384xf32> to vector<10x384xf32>
    %c0_22 = arith.constant 0 : index
    %c0_23 = arith.constant 0 : index
    %c0_24 = arith.constant 0 : index
    %20 = vector.load %arg3[%c0_22, %c0_23, %c0_24] : memref<3x1x384xf32, #tpu.memory_space<vmem>>, vector<1x1x384xf32>
    %21 = vector.shape_cast %20 : vector<1x1x384xf32> to vector<1x384xf32>
    %c0_25 = arith.constant 0 : index
    %c0_26 = arith.constant 0 : index
    %c0_27 = arith.constant 0 : index
    %22 = vector.load %arg4[%c0_25, %c0_26, %c0_27] : memref<3x1x10xf32, #tpu.memory_space<vmem>>, vector<1x1x10xf32>
    %23 = vector.shape_cast %22 : vector<1x1x10xf32> to vector<1x10xf32>
    %cst = arith.constant 0.000000e+00 : f32
    %24 = vector.broadcast %cst : f32 to vector<2x10xf32>
    %cst_28 = arith.constant dense<0.000000e+00> : vector<2x384xf32>
    %25 = tpu.matmul %1, %17, %cst_28 {dimension_numbers = #tpu.dot_dimension_numbers<[1], [0], [0], [1], [0, 0, 1, 1], [], []>} : vector<2x10xf32>, vector<10x384xf32>, vector<2x384xf32> -> vector<2x384xf32>
    %26 = vector.broadcast %21 : vector<1x384xf32> to vector<2x384xf32>
    %27 = arith.addf %25, %26 : vector<2x384xf32>
    %cst_29 = arith.constant dense<0.000000e+00> : vector<2x384xf32>
    %28 = tpu.matmul %24, %19, %cst_29 {dimension_numbers = #tpu.dot_dimension_numbers<[1], [0], [0], [1], [0, 0, 1, 1], [], []>} : vector<2x10xf32>, vector<10x384xf32>, vector<2x384xf32> -> vector<2x384xf32>
    %29 = vector.extract_strided_slice %27 {offsets = [0, 0], sizes = [2, 256], strides = [1, 1]} : vector<2x384xf32> to vector<2x256xf32>
    %30 = vector.extract_strided_slice %28 {offsets = [0, 0], sizes = [2, 256], strides = [1, 1]} : vector<2x384xf32> to vector<2x256xf32>
    %31 = arith.addf %29, %30 : vector<2x256xf32>
    %32 = arith.negf %31 : vector<2x256xf32>
    %33 = math.exp %32 : vector<2x256xf32>
    %cst_30 = arith.constant 1.000000e+00 : f32
    %34 = vector.broadcast %cst_30 : f32 to vector<2x256xf32>
    %35 = arith.addf %34, %33 : vector<2x256xf32>
    %36 = arith.divf %34, %35 : vector<2x256xf32>
    %37 = vector.extract_strided_slice %36 {offsets = [0, 0], sizes = [2, 10], strides = [1, 1]} : vector<2x256xf32> to vector<2x10xf32>
    %38 = vector.extract_strided_slice %36 {offsets = [0, 128], sizes = [2, 10], strides = [1, 1]} : vector<2x256xf32> to vector<2x10xf32>
    %39 = vector.extract_strided_slice %27 {offsets = [0, 256], sizes = [2, 10], strides = [1, 1]} : vector<2x384xf32> to vector<2x10xf32>
    %40 = vector.extract_strided_slice %28 {offsets = [0, 256], sizes = [2, 10], strides = [1, 1]} : vector<2x384xf32> to vector<2x10xf32>
    %41 = vector.broadcast %23 : vector<1x10xf32> to vector<2x10xf32>
    %42 = arith.addf %40, %41 : vector<2x10xf32>
    %43 = arith.mulf %37, %42 : vector<2x10xf32>
    %44 = arith.addf %39, %43 : vector<2x10xf32>
    %45 = math.tanh %44 : vector<2x10xf32>
    %cst_31 = arith.constant 1.000000e+00 : f32
    %46 = vector.broadcast %cst_31 : f32 to vector<2x10xf32>
    %47 = arith.subf %46, %38 : vector<2x10xf32>
    %48 = arith.mulf %47, %45 : vector<2x10xf32>
    %49 = arith.mulf %38, %24 : vector<2x10xf32>
    %50 = arith.addf %48, %49 : vector<2x10xf32>
    %cst_32 = arith.constant dense<0.000000e+00> : vector<2x384xf32>
    %51 = tpu.matmul %3, %17, %cst_32 {dimension_numbers = #tpu.dot_dimension_numbers<[1], [0], [0], [1], [0, 0, 1, 1], [], []>} : vector<2x10xf32>, vector<10x384xf32>, vector<2x384xf32> -> vector<2x384xf32>
    %52 = vector.broadcast %21 : vector<1x384xf32> to vector<2x384xf32>
    %53 = arith.addf %51, %52 : vector<2x384xf32>
    %cst_33 = arith.constant dense<0.000000e+00> : vector<2x384xf32>
    %54 = tpu.matmul %50, %19, %cst_33 {dimension_numbers = #tpu.dot_dimension_numbers<[1], [0], [0], [1], [0, 0, 1, 1], [], []>} : vector<2x10xf32>, vector<10x384xf32>, vector<2x384xf32> -> vector<2x384xf32>
    %55 = vector.extract_strided_slice %53 {offsets = [0, 0], sizes = [2, 256], strides = [1, 1]} : vector<2x384xf32> to vector<2x256xf32>
    %56 = vector.extract_strided_slice %54 {offsets = [0, 0], sizes = [2, 256], strides = [1, 1]} : vector<2x384xf32> to vector<2x256xf32>
    %57 = arith.addf %55, %56 : vector<2x256xf32>
    %58 = arith.negf %57 : vector<2x256xf32>
    %59 = math.exp %58 : vector<2x256xf32>
    %cst_34 = arith.constant 1.000000e+00 : f32
    %60 = vector.broadcast %cst_34 : f32 to vector<2x256xf32>
    %61 = arith.addf %60, %59 : vector<2x256xf32>
    %62 = arith.divf %60, %61 : vector<2x256xf32>
    %63 = vector.extract_strided_slice %62 {offsets = [0, 0], sizes = [2, 10], strides = [1, 1]} : vector<2x256xf32> to vector<2x10xf32>
    %64 = vector.extract_strided_slice %62 {offsets = [0, 128], sizes = [2, 10], strides = [1, 1]} : vector<2x256xf32> to vector<2x10xf32>
    %65 = vector.extract_strided_slice %53 {offsets = [0, 256], sizes = [2, 10], strides = [1, 1]} : vector<2x384xf32> to vector<2x10xf32>
    %66 = vector.extract_strided_slice %54 {offsets = [0, 256], sizes = [2, 10], strides = [1, 1]} : vector<2x384xf32> to vector<2x10xf32>
    %67 = vector.broadcast %23 : vector<1x10xf32> to vector<2x10xf32>
    %68 = arith.addf %66, %67 : vector<2x10xf32>
    %69 = arith.mulf %63, %68 : vector<2x10xf32>
    %70 = arith.addf %65, %69 : vector<2x10xf32>
    %71 = math.tanh %70 : vector<2x10xf32>
    %cst_35 = arith.constant 1.000000e+00 : f32
    %72 = vector.broadcast %cst_35 : f32 to vector<2x10xf32>
    %73 = arith.subf %72, %64 : vector<2x10xf32>
    %74 = arith.mulf %73, %71 : vector<2x10xf32>
    %75 = arith.mulf %64, %50 : vector<2x10xf32>
    %76 = arith.addf %74, %75 : vector<2x10xf32>
    %cst_36 = arith.constant dense<0.000000e+00> : vector<2x384xf32>
    %77 = tpu.matmul %5, %17, %cst_36 {dimension_numbers = #tpu.dot_dimension_numbers<[1], [0], [0], [1], [0, 0, 1, 1], [], []>} : vector<2x10xf32>, vector<10x384xf32>, vector<2x384xf32> -> vector<2x384xf32>
    %78 = vector.broadcast %21 : vector<1x384xf32> to vector<2x384xf32>
    %79 = arith.addf %77, %78 : vector<2x384xf32>
    %cst_37 = arith.constant dense<0.000000e+00> : vector<2x384xf32>
    %80 = tpu.matmul %76, %19, %cst_37 {dimension_numbers = #tpu.dot_dimension_numbers<[1], [0], [0], [1], [0, 0, 1, 1], [], []>} : vector<2x10xf32>, vector<10x384xf32>, vector<2x384xf32> -> vector<2x384xf32>
    %81 = vector.extract_strided_slice %79 {offsets = [0, 0], sizes = [2, 256], strides = [1, 1]} : vector<2x384xf32> to vector<2x256xf32>
    %82 = vector.extract_strided_slice %80 {offsets = [0, 0], sizes = [2, 256], strides = [1, 1]} : vector<2x384xf32> to vector<2x256xf32>
    %83 = arith.addf %81, %82 : vector<2x256xf32>
    %84 = arith.negf %83 : vector<2x256xf32>
    %85 = math.exp %84 : vector<2x256xf32>
    %cst_38 = arith.constant 1.000000e+00 : f32
    %86 = vector.broadcast %cst_38 : f32 to vector<2x256xf32>
    %87 = arith.addf %86, %85 : vector<2x256xf32>
    %88 = arith.divf %86, %87 : vector<2x256xf32>
    %89 = vector.extract_strided_slice %88 {offsets = [0, 0], sizes = [2, 10], strides = [1, 1]} : vector<2x256xf32> to vector<2x10xf32>
    %90 = vector.extract_strided_slice %88 {offsets = [0, 128], sizes = [2, 10], strides = [1, 1]} : vector<2x256xf32> to vector<2x10xf32>
    %91 = vector.extract_strided_slice %79 {offsets = [0, 256], sizes = [2, 10], strides = [1, 1]} : vector<2x384xf32> to vector<2x10xf32>
    %92 = vector.extract_strided_slice %80 {offsets = [0, 256], sizes = [2, 10], strides = [1, 1]} : vector<2x384xf32> to vector<2x10xf32>
    %93 = vector.broadcast %23 : vector<1x10xf32> to vector<2x10xf32>
    %94 = arith.addf %92, %93 : vector<2x10xf32>
    %95 = arith.mulf %89, %94 : vector<2x10xf32>
    %96 = arith.addf %91, %95 : vector<2x10xf32>
    %97 = math.tanh %96 : vector<2x10xf32>
    %cst_39 = arith.constant 1.000000e+00 : f32
    %98 = vector.broadcast %cst_39 : f32 to vector<2x10xf32>
    %99 = arith.subf %98, %90 : vector<2x10xf32>
    %100 = arith.mulf %99, %97 : vector<2x10xf32>
    %101 = arith.mulf %90, %76 : vector<2x10xf32>
    %102 = arith.addf %100, %101 : vector<2x10xf32>
    %cst_40 = arith.constant dense<0.000000e+00> : vector<2x384xf32>
    %103 = tpu.matmul %7, %17, %cst_40 {dimension_numbers = #tpu.dot_dimension_numbers<[1], [0], [0], [1], [0, 0, 1, 1], [], []>} : vector<2x10xf32>, vector<10x384xf32>, vector<2x384xf32> -> vector<2x384xf32>
    %104 = vector.broadcast %21 : vector<1x384xf32> to vector<2x384xf32>
    %105 = arith.addf %103, %104 : vector<2x384xf32>
    %cst_41 = arith.constant dense<0.000000e+00> : vector<2x384xf32>
    %106 = tpu.matmul %102, %19, %cst_41 {dimension_numbers = #tpu.dot_dimension_numbers<[1], [0], [0], [1], [0, 0, 1, 1], [], []>} : vector<2x10xf32>, vector<10x384xf32>, vector<2x384xf32> -> vector<2x384xf32>
    %107 = vector.extract_strided_slice %105 {offsets = [0, 0], sizes = [2, 256], strides = [1, 1]} : vector<2x384xf32> to vector<2x256xf32>
    %108 = vector.extract_strided_slice %106 {offsets = [0, 0], sizes = [2, 256], strides = [1, 1]} : vector<2x384xf32> to vector<2x256xf32>
    %109 = arith.addf %107, %108 : vector<2x256xf32>
    %110 = arith.negf %109 : vector<2x256xf32>
    %111 = math.exp %110 : vector<2x256xf32>
    %cst_42 = arith.constant 1.000000e+00 : f32
    %112 = vector.broadcast %cst_42 : f32 to vector<2x256xf32>
    %113 = arith.addf %112, %111 : vector<2x256xf32>
    %114 = arith.divf %112, %113 : vector<2x256xf32>
    %115 = vector.extract_strided_slice %114 {offsets = [0, 0], sizes = [2, 10], strides = [1, 1]} : vector<2x256xf32> to vector<2x10xf32>
    %116 = vector.extract_strided_slice %114 {offsets = [0, 128], sizes = [2, 10], strides = [1, 1]} : vector<2x256xf32> to vector<2x10xf32>
    %117 = vector.extract_strided_slice %105 {offsets = [0, 256], sizes = [2, 10], strides = [1, 1]} : vector<2x384xf32> to vector<2x10xf32>
    %118 = vector.extract_strided_slice %106 {offsets = [0, 256], sizes = [2, 10], strides = [1, 1]} : vector<2x384xf32> to vector<2x10xf32>
    %119 = vector.broadcast %23 : vector<1x10xf32> to vector<2x10xf32>
    %120 = arith.addf %118, %119 : vector<2x10xf32>
    %121 = arith.mulf %115, %120 : vector<2x10xf32>
    %122 = arith.addf %117, %121 : vector<2x10xf32>
    %123 = math.tanh %122 : vector<2x10xf32>
    %cst_43 = arith.constant 1.000000e+00 : f32
    %124 = vector.broadcast %cst_43 : f32 to vector<2x10xf32>
    %125 = arith.subf %124, %116 : vector<2x10xf32>
    %126 = arith.mulf %125, %123 : vector<2x10xf32>
    %127 = arith.mulf %116, %102 : vector<2x10xf32>
    %128 = arith.addf %126, %127 : vector<2x10xf32>
    %cst_44 = arith.constant dense<0.000000e+00> : vector<2x384xf32>
    %129 = tpu.matmul %9, %17, %cst_44 {dimension_numbers = #tpu.dot_dimension_numbers<[1], [0], [0], [1], [0, 0, 1, 1], [], []>} : vector<2x10xf32>, vector<10x384xf32>, vector<2x384xf32> -> vector<2x384xf32>
    %130 = vector.broadcast %21 : vector<1x384xf32> to vector<2x384xf32>
    %131 = arith.addf %129, %130 : vector<2x384xf32>
    %cst_45 = arith.constant dense<0.000000e+00> : vector<2x384xf32>
    %132 = tpu.matmul %128, %19, %cst_45 {dimension_numbers = #tpu.dot_dimension_numbers<[1], [0], [0], [1], [0, 0, 1, 1], [], []>} : vector<2x10xf32>, vector<10x384xf32>, vector<2x384xf32> -> vector<2x384xf32>
    %133 = vector.extract_strided_slice %131 {offsets = [0, 0], sizes = [2, 256], strides = [1, 1]} : vector<2x384xf32> to vector<2x256xf32>
    %134 = vector.extract_strided_slice %132 {offsets = [0, 0], sizes = [2, 256], strides = [1, 1]} : vector<2x384xf32> to vector<2x256xf32>
    %135 = arith.addf %133, %134 : vector<2x256xf32>
    %136 = arith.negf %135 : vector<2x256xf32>
    %137 = math.exp %136 : vector<2x256xf32>
    %cst_46 = arith.constant 1.000000e+00 : f32
    %138 = vector.broadcast %cst_46 : f32 to vector<2x256xf32>
    %139 = arith.addf %138, %137 : vector<2x256xf32>
    %140 = arith.divf %138, %139 : vector<2x256xf32>
    %141 = vector.extract_strided_slice %140 {offsets = [0, 0], sizes = [2, 10], strides = [1, 1]} : vector<2x256xf32> to vector<2x10xf32>
    %142 = vector.extract_strided_slice %140 {offsets = [0, 128], sizes = [2, 10], strides = [1, 1]} : vector<2x256xf32> to vector<2x10xf32>
    %143 = vector.extract_strided_slice %131 {offsets = [0, 256], sizes = [2, 10], strides = [1, 1]} : vector<2x384xf32> to vector<2x10xf32>
    %144 = vector.extract_strided_slice %132 {offsets = [0, 256], sizes = [2, 10], strides = [1, 1]} : vector<2x384xf32> to vector<2x10xf32>
    %145 = vector.broadcast %23 : vector<1x10xf32> to vector<2x10xf32>
    %146 = arith.addf %144, %145 : vector<2x10xf32>
    %147 = arith.mulf %141, %146 : vector<2x10xf32>
    %148 = arith.addf %143, %147 : vector<2x10xf32>
    %149 = math.tanh %148 : vector<2x10xf32>
    %cst_47 = arith.constant 1.000000e+00 : f32
    %150 = vector.broadcast %cst_47 : f32 to vector<2x10xf32>
    %151 = arith.subf %150, %142 : vector<2x10xf32>
    %152 = arith.mulf %151, %149 : vector<2x10xf32>
    %153 = arith.mulf %142, %128 : vector<2x10xf32>
    %154 = arith.addf %152, %153 : vector<2x10xf32>
    %cst_48 = arith.constant dense<0.000000e+00> : vector<2x384xf32>
    %155 = tpu.matmul %11, %17, %cst_48 {dimension_numbers = #tpu.dot_dimension_numbers<[1], [0], [0], [1], [0, 0, 1, 1], [], []>} : vector<2x10xf32>, vector<10x384xf32>, vector<2x384xf32> -> vector<2x384xf32>
    %156 = vector.broadcast %21 : vector<1x384xf32> to vector<2x384xf32>
    %157 = arith.addf %155, %156 : vector<2x384xf32>
    %cst_49 = arith.constant dense<0.000000e+00> : vector<2x384xf32>
    %158 = tpu.matmul %154, %19, %cst_49 {dimension_numbers = #tpu.dot_dimension_numbers<[1], [0], [0], [1], [0, 0, 1, 1], [], []>} : vector<2x10xf32>, vector<10x384xf32>, vector<2x384xf32> -> vector<2x384xf32>
    %159 = vector.extract_strided_slice %157 {offsets = [0, 0], sizes = [2, 256], strides = [1, 1]} : vector<2x384xf32> to vector<2x256xf32>
    %160 = vector.extract_strided_slice %158 {offsets = [0, 0], sizes = [2, 256], strides = [1, 1]} : vector<2x384xf32> to vector<2x256xf32>
    %161 = arith.addf %159, %160 : vector<2x256xf32>
    %162 = arith.negf %161 : vector<2x256xf32>
    %163 = math.exp %162 : vector<2x256xf32>
    %cst_50 = arith.constant 1.000000e+00 : f32
    %164 = vector.broadcast %cst_50 : f32 to vector<2x256xf32>
    %165 = arith.addf %164, %163 : vector<2x256xf32>
    %166 = arith.divf %164, %165 : vector<2x256xf32>
    %167 = vector.extract_strided_slice %166 {offsets = [0, 0], sizes = [2, 10], strides = [1, 1]} : vector<2x256xf32> to vector<2x10xf32>
    %168 = vector.extract_strided_slice %166 {offsets = [0, 128], sizes = [2, 10], strides = [1, 1]} : vector<2x256xf32> to vector<2x10xf32>
    %169 = vector.extract_strided_slice %157 {offsets = [0, 256], sizes = [2, 10], strides = [1, 1]} : vector<2x384xf32> to vector<2x10xf32>
    %170 = vector.extract_strided_slice %158 {offsets = [0, 256], sizes = [2, 10], strides = [1, 1]} : vector<2x384xf32> to vector<2x10xf32>
    %171 = vector.broadcast %23 : vector<1x10xf32> to vector<2x10xf32>
    %172 = arith.addf %170, %171 : vector<2x10xf32>
    %173 = arith.mulf %167, %172 : vector<2x10xf32>
    %174 = arith.addf %169, %173 : vector<2x10xf32>
    %175 = math.tanh %174 : vector<2x10xf32>
    %cst_51 = arith.constant 1.000000e+00 : f32
    %176 = vector.broadcast %cst_51 : f32 to vector<2x10xf32>
    %177 = arith.subf %176, %168 : vector<2x10xf32>
    %178 = arith.mulf %177, %175 : vector<2x10xf32>
    %179 = arith.mulf %168, %154 : vector<2x10xf32>
    %180 = arith.addf %178, %179 : vector<2x10xf32>
    %cst_52 = arith.constant dense<0.000000e+00> : vector<2x384xf32>
    %181 = tpu.matmul %13, %17, %cst_52 {dimension_numbers = #tpu.dot_dimension_numbers<[1], [0], [0], [1], [0, 0, 1, 1], [], []>} : vector<2x10xf32>, vector<10x384xf32>, vector<2x384xf32> -> vector<2x384xf32>
    %182 = vector.broadcast %21 : vector<1x384xf32> to vector<2x384xf32>
    %183 = arith.addf %181, %182 : vector<2x384xf32>
    %cst_53 = arith.constant dense<0.000000e+00> : vector<2x384xf32>
    %184 = tpu.matmul %180, %19, %cst_53 {dimension_numbers = #tpu.dot_dimension_numbers<[1], [0], [0], [1], [0, 0, 1, 1], [], []>} : vector<2x10xf32>, vector<10x384xf32>, vector<2x384xf32> -> vector<2x384xf32>
    %185 = vector.extract_strided_slice %183 {offsets = [0, 0], sizes = [2, 256], strides = [1, 1]} : vector<2x384xf32> to vector<2x256xf32>
    %186 = vector.extract_strided_slice %184 {offsets = [0, 0], sizes = [2, 256], strides = [1, 1]} : vector<2x384xf32> to vector<2x256xf32>
    %187 = arith.addf %185, %186 : vector<2x256xf32>
    %188 = arith.negf %187 : vector<2x256xf32>
    %189 = math.exp %188 : vector<2x256xf32>
    %cst_54 = arith.constant 1.000000e+00 : f32
    %190 = vector.broadcast %cst_54 : f32 to vector<2x256xf32>
    %191 = arith.addf %190, %189 : vector<2x256xf32>
    %192 = arith.divf %190, %191 : vector<2x256xf32>
    %193 = vector.extract_strided_slice %192 {offsets = [0, 0], sizes = [2, 10], strides = [1, 1]} : vector<2x256xf32> to vector<2x10xf32>
    %194 = vector.extract_strided_slice %192 {offsets = [0, 128], sizes = [2, 10], strides = [1, 1]} : vector<2x256xf32> to vector<2x10xf32>
    %195 = vector.extract_strided_slice %183 {offsets = [0, 256], sizes = [2, 10], strides = [1, 1]} : vector<2x384xf32> to vector<2x10xf32>
    %196 = vector.extract_strided_slice %184 {offsets = [0, 256], sizes = [2, 10], strides = [1, 1]} : vector<2x384xf32> to vector<2x10xf32>
    %197 = vector.broadcast %23 : vector<1x10xf32> to vector<2x10xf32>
    %198 = arith.addf %196, %197 : vector<2x10xf32>
    %199 = arith.mulf %193, %198 : vector<2x10xf32>
    %200 = arith.addf %195, %199 : vector<2x10xf32>
    %201 = math.tanh %200 : vector<2x10xf32>
    %cst_55 = arith.constant 1.000000e+00 : f32
    %202 = vector.broadcast %cst_55 : f32 to vector<2x10xf32>
    %203 = arith.subf %202, %194 : vector<2x10xf32>
    %204 = arith.mulf %203, %201 : vector<2x10xf32>
    %205 = arith.mulf %194, %180 : vector<2x10xf32>
    %206 = arith.addf %204, %205 : vector<2x10xf32>
    %cst_56 = arith.constant dense<0.000000e+00> : vector<2x384xf32>
    %207 = tpu.matmul %15, %17, %cst_56 {dimension_numbers = #tpu.dot_dimension_numbers<[1], [0], [0], [1], [0, 0, 1, 1], [], []>} : vector<2x10xf32>, vector<10x384xf32>, vector<2x384xf32> -> vector<2x384xf32>
    %208 = vector.broadcast %21 : vector<1x384xf32> to vector<2x384xf32>
    %209 = arith.addf %207, %208 : vector<2x384xf32>
    %cst_57 = arith.constant dense<0.000000e+00> : vector<2x384xf32>
    %210 = tpu.matmul %206, %19, %cst_57 {dimension_numbers = #tpu.dot_dimension_numbers<[1], [0], [0], [1], [0, 0, 1, 1], [], []>} : vector<2x10xf32>, vector<10x384xf32>, vector<2x384xf32> -> vector<2x384xf32>
    %211 = vector.extract_strided_slice %209 {offsets = [0, 0], sizes = [2, 256], strides = [1, 1]} : vector<2x384xf32> to vector<2x256xf32>
    %212 = vector.extract_strided_slice %210 {offsets = [0, 0], sizes = [2, 256], strides = [1, 1]} : vector<2x384xf32> to vector<2x256xf32>
    %213 = arith.addf %211, %212 : vector<2x256xf32>
    %214 = arith.negf %213 : vector<2x256xf32>
    %215 = math.exp %214 : vector<2x256xf32>
    %cst_58 = arith.constant 1.000000e+00 : f32
    %216 = vector.broadcast %cst_58 : f32 to vector<2x256xf32>
    %217 = arith.addf %216, %215 : vector<2x256xf32>
    %218 = arith.divf %216, %217 : vector<2x256xf32>
    %219 = vector.extract_strided_slice %218 {offsets = [0, 0], sizes = [2, 10], strides = [1, 1]} : vector<2x256xf32> to vector<2x10xf32>
    %220 = vector.extract_strided_slice %218 {offsets = [0, 128], sizes = [2, 10], strides = [1, 1]} : vector<2x256xf32> to vector<2x10xf32>
    %221 = vector.extract_strided_slice %209 {offsets = [0, 256], sizes = [2, 10], strides = [1, 1]} : vector<2x384xf32> to vector<2x10xf32>
    %222 = vector.extract_strided_slice %210 {offsets = [0, 256], sizes = [2, 10], strides = [1, 1]} : vector<2x384xf32> to vector<2x10xf32>
    %223 = vector.broadcast %23 : vector<1x10xf32> to vector<2x10xf32>
    %224 = arith.addf %222, %223 : vector<2x10xf32>
    %225 = arith.mulf %219, %224 : vector<2x10xf32>
    %226 = arith.addf %221, %225 : vector<2x10xf32>
    %227 = math.tanh %226 : vector<2x10xf32>
    %cst_59 = arith.constant 1.000000e+00 : f32
    %228 = vector.broadcast %cst_59 : f32 to vector<2x10xf32>
    %229 = arith.subf %228, %220 : vector<2x10xf32>
    %230 = arith.mulf %229, %227 : vector<2x10xf32>
    %231 = arith.mulf %220, %206 : vector<2x10xf32>
    %232 = arith.addf %230, %231 : vector<2x10xf32>
    %c1_60 = arith.constant 1 : index
    %c0_61 = arith.constant 0 : index
    %c0_62 = arith.constant 0 : index
    %233 = vector.load %arg1[%c1_60, %c0_61, %c0_62] : memref<3x10x384xf32, #tpu.memory_space<vmem>>, vector<1x10x384xf32>
    %234 = vector.shape_cast %233 : vector<1x10x384xf32> to vector<10x384xf32>
    %c1_63 = arith.constant 1 : index
    %c0_64 = arith.constant 0 : index
    %c0_65 = arith.constant 0 : index
    %235 = vector.load %arg2[%c1_63, %c0_64, %c0_65] : memref<3x10x384xf32, #tpu.memory_space<vmem>>, vector<1x10x384xf32>
    %236 = vector.shape_cast %235 : vector<1x10x384xf32> to vector<10x384xf32>
    %c1_66 = arith.constant 1 : index
    %c0_67 = arith.constant 0 : index
    %c0_68 = arith.constant 0 : index
    %237 = vector.load %arg3[%c1_66, %c0_67, %c0_68] : memref<3x1x384xf32, #tpu.memory_space<vmem>>, vector<1x1x384xf32>
    %238 = vector.shape_cast %237 : vector<1x1x384xf32> to vector<1x384xf32>
    %c1_69 = arith.constant 1 : index
    %c0_70 = arith.constant 0 : index
    %c0_71 = arith.constant 0 : index
    %239 = vector.load %arg4[%c1_69, %c0_70, %c0_71] : memref<3x1x10xf32, #tpu.memory_space<vmem>>, vector<1x1x10xf32>
    %240 = vector.shape_cast %239 : vector<1x1x10xf32> to vector<1x10xf32>
    %cst_72 = arith.constant 0.000000e+00 : f32
    %241 = vector.broadcast %cst_72 : f32 to vector<2x10xf32>
    %cst_73 = arith.constant dense<0.000000e+00> : vector<2x384xf32>
    %242 = tpu.matmul %50, %234, %cst_73 {dimension_numbers = #tpu.dot_dimension_numbers<[1], [0], [0], [1], [0, 0, 1, 1], [], []>} : vector<2x10xf32>, vector<10x384xf32>, vector<2x384xf32> -> vector<2x384xf32>
    %243 = vector.broadcast %238 : vector<1x384xf32> to vector<2x384xf32>
    %244 = arith.addf %242, %243 : vector<2x384xf32>
    %cst_74 = arith.constant dense<0.000000e+00> : vector<2x384xf32>
    %245 = tpu.matmul %241, %236, %cst_74 {dimension_numbers = #tpu.dot_dimension_numbers<[1], [0], [0], [1], [0, 0, 1, 1], [], []>} : vector<2x10xf32>, vector<10x384xf32>, vector<2x384xf32> -> vector<2x384xf32>
    %246 = vector.extract_strided_slice %244 {offsets = [0, 0], sizes = [2, 256], strides = [1, 1]} : vector<2x384xf32> to vector<2x256xf32>
    %247 = vector.extract_strided_slice %245 {offsets = [0, 0], sizes = [2, 256], strides = [1, 1]} : vector<2x384xf32> to vector<2x256xf32>
    %248 = arith.addf %246, %247 : vector<2x256xf32>
    %249 = arith.negf %248 : vector<2x256xf32>
    %250 = math.exp %249 : vector<2x256xf32>
    %cst_75 = arith.constant 1.000000e+00 : f32
    %251 = vector.broadcast %cst_75 : f32 to vector<2x256xf32>
    %252 = arith.addf %251, %250 : vector<2x256xf32>
    %253 = arith.divf %251, %252 : vector<2x256xf32>
    %254 = vector.extract_strided_slice %253 {offsets = [0, 0], sizes = [2, 10], strides = [1, 1]} : vector<2x256xf32> to vector<2x10xf32>
    %255 = vector.extract_strided_slice %253 {offsets = [0, 128], sizes = [2, 10], strides = [1, 1]} : vector<2x256xf32> to vector<2x10xf32>
    %256 = vector.extract_strided_slice %244 {offsets = [0, 256], sizes = [2, 10], strides = [1, 1]} : vector<2x384xf32> to vector<2x10xf32>
    %257 = vector.extract_strided_slice %245 {offsets = [0, 256], sizes = [2, 10], strides = [1, 1]} : vector<2x384xf32> to vector<2x10xf32>
    %258 = vector.broadcast %240 : vector<1x10xf32> to vector<2x10xf32>
    %259 = arith.addf %257, %258 : vector<2x10xf32>
    %260 = arith.mulf %254, %259 : vector<2x10xf32>
    %261 = arith.addf %256, %260 : vector<2x10xf32>
    %262 = math.tanh %261 : vector<2x10xf32>
    %cst_76 = arith.constant 1.000000e+00 : f32
    %263 = vector.broadcast %cst_76 : f32 to vector<2x10xf32>
    %264 = arith.subf %263, %255 : vector<2x10xf32>
    %265 = arith.mulf %264, %262 : vector<2x10xf32>
    %266 = arith.mulf %255, %241 : vector<2x10xf32>
    %267 = arith.addf %265, %266 : vector<2x10xf32>
    %cst_77 = arith.constant dense<0.000000e+00> : vector<2x384xf32>
    %268 = tpu.matmul %76, %234, %cst_77 {dimension_numbers = #tpu.dot_dimension_numbers<[1], [0], [0], [1], [0, 0, 1, 1], [], []>} : vector<2x10xf32>, vector<10x384xf32>, vector<2x384xf32> -> vector<2x384xf32>
    %269 = vector.broadcast %238 : vector<1x384xf32> to vector<2x384xf32>
    %270 = arith.addf %268, %269 : vector<2x384xf32>
    %cst_78 = arith.constant dense<0.000000e+00> : vector<2x384xf32>
    %271 = tpu.matmul %267, %236, %cst_78 {dimension_numbers = #tpu.dot_dimension_numbers<[1], [0], [0], [1], [0, 0, 1, 1], [], []>} : vector<2x10xf32>, vector<10x384xf32>, vector<2x384xf32> -> vector<2x384xf32>
    %272 = vector.extract_strided_slice %270 {offsets = [0, 0], sizes = [2, 256], strides = [1, 1]} : vector<2x384xf32> to vector<2x256xf32>
    %273 = vector.extract_strided_slice %271 {offsets = [0, 0], sizes = [2, 256], strides = [1, 1]} : vector<2x384xf32> to vector<2x256xf32>
    %274 = arith.addf %272, %273 : vector<2x256xf32>
    %275 = arith.negf %274 : vector<2x256xf32>
    %276 = math.exp %275 : vector<2x256xf32>
    %cst_79 = arith.constant 1.000000e+00 : f32
    %277 = vector.broadcast %cst_79 : f32 to vector<2x256xf32>
    %278 = arith.addf %277, %276 : vector<2x256xf32>
    %279 = arith.divf %277, %278 : vector<2x256xf32>
    %280 = vector.extract_strided_slice %279 {offsets = [0, 0], sizes = [2, 10], strides = [1, 1]} : vector<2x256xf32> to vector<2x10xf32>
    %281 = vector.extract_strided_slice %279 {offsets = [0, 128], sizes = [2, 10], strides = [1, 1]} : vector<2x256xf32> to vector<2x10xf32>
    %282 = vector.extract_strided_slice %270 {offsets = [0, 256], sizes = [2, 10], strides = [1, 1]} : vector<2x384xf32> to vector<2x10xf32>
    %283 = vector.extract_strided_slice %271 {offsets = [0, 256], sizes = [2, 10], strides = [1, 1]} : vector<2x384xf32> to vector<2x10xf32>
    %284 = vector.broadcast %240 : vector<1x10xf32> to vector<2x10xf32>
    %285 = arith.addf %283, %284 : vector<2x10xf32>
    %286 = arith.mulf %280, %285 : vector<2x10xf32>
    %287 = arith.addf %282, %286 : vector<2x10xf32>
    %288 = math.tanh %287 : vector<2x10xf32>
    %cst_80 = arith.constant 1.000000e+00 : f32
    %289 = vector.broadcast %cst_80 : f32 to vector<2x10xf32>
    %290 = arith.subf %289, %281 : vector<2x10xf32>
    %291 = arith.mulf %290, %288 : vector<2x10xf32>
    %292 = arith.mulf %281, %267 : vector<2x10xf32>
    %293 = arith.addf %291, %292 : vector<2x10xf32>
    %cst_81 = arith.constant dense<0.000000e+00> : vector<2x384xf32>
    %294 = tpu.matmul %102, %234, %cst_81 {dimension_numbers = #tpu.dot_dimension_numbers<[1], [0], [0], [1], [0, 0, 1, 1], [], []>} : vector<2x10xf32>, vector<10x384xf32>, vector<2x384xf32> -> vector<2x384xf32>
    %295 = vector.broadcast %238 : vector<1x384xf32> to vector<2x384xf32>
    %296 = arith.addf %294, %295 : vector<2x384xf32>
    %cst_82 = arith.constant dense<0.000000e+00> : vector<2x384xf32>
    %297 = tpu.matmul %293, %236, %cst_82 {dimension_numbers = #tpu.dot_dimension_numbers<[1], [0], [0], [1], [0, 0, 1, 1], [], []>} : vector<2x10xf32>, vector<10x384xf32>, vector<2x384xf32> -> vector<2x384xf32>
    %298 = vector.extract_strided_slice %296 {offsets = [0, 0], sizes = [2, 256], strides = [1, 1]} : vector<2x384xf32> to vector<2x256xf32>
    %299 = vector.extract_strided_slice %297 {offsets = [0, 0], sizes = [2, 256], strides = [1, 1]} : vector<2x384xf32> to vector<2x256xf32>
    %300 = arith.addf %298, %299 : vector<2x256xf32>
    %301 = arith.negf %300 : vector<2x256xf32>
    %302 = math.exp %301 : vector<2x256xf32>
    %cst_83 = arith.constant 1.000000e+00 : f32
    %303 = vector.broadcast %cst_83 : f32 to vector<2x256xf32>
    %304 = arith.addf %303, %302 : vector<2x256xf32>
    %305 = arith.divf %303, %304 : vector<2x256xf32>
    %306 = vector.extract_strided_slice %305 {offsets = [0, 0], sizes = [2, 10], strides = [1, 1]} : vector<2x256xf32> to vector<2x10xf32>
    %307 = vector.extract_strided_slice %305 {offsets = [0, 128], sizes = [2, 10], strides = [1, 1]} : vector<2x256xf32> to vector<2x10xf32>
    %308 = vector.extract_strided_slice %296 {offsets = [0, 256], sizes = [2, 10], strides = [1, 1]} : vector<2x384xf32> to vector<2x10xf32>
    %309 = vector.extract_strided_slice %297 {offsets = [0, 256], sizes = [2, 10], strides = [1, 1]} : vector<2x384xf32> to vector<2x10xf32>
    %310 = vector.broadcast %240 : vector<1x10xf32> to vector<2x10xf32>
    %311 = arith.addf %309, %310 : vector<2x10xf32>
    %312 = arith.mulf %306, %311 : vector<2x10xf32>
    %313 = arith.addf %308, %312 : vector<2x10xf32>
    %314 = math.tanh %313 : vector<2x10xf32>
    %cst_84 = arith.constant 1.000000e+00 : f32
    %315 = vector.broadcast %cst_84 : f32 to vector<2x10xf32>
    %316 = arith.subf %315, %307 : vector<2x10xf32>
    %317 = arith.mulf %316, %314 : vector<2x10xf32>
    %318 = arith.mulf %307, %293 : vector<2x10xf32>
    %319 = arith.addf %317, %318 : vector<2x10xf32>
    %cst_85 = arith.constant dense<0.000000e+00> : vector<2x384xf32>
    %320 = tpu.matmul %128, %234, %cst_85 {dimension_numbers = #tpu.dot_dimension_numbers<[1], [0], [0], [1], [0, 0, 1, 1], [], []>} : vector<2x10xf32>, vector<10x384xf32>, vector<2x384xf32> -> vector<2x384xf32>
    %321 = vector.broadcast %238 : vector<1x384xf32> to vector<2x384xf32>
    %322 = arith.addf %320, %321 : vector<2x384xf32>
    %cst_86 = arith.constant dense<0.000000e+00> : vector<2x384xf32>
    %323 = tpu.matmul %319, %236, %cst_86 {dimension_numbers = #tpu.dot_dimension_numbers<[1], [0], [0], [1], [0, 0, 1, 1], [], []>} : vector<2x10xf32>, vector<10x384xf32>, vector<2x384xf32> -> vector<2x384xf32>
    %324 = vector.extract_strided_slice %322 {offsets = [0, 0], sizes = [2, 256], strides = [1, 1]} : vector<2x384xf32> to vector<2x256xf32>
    %325 = vector.extract_strided_slice %323 {offsets = [0, 0], sizes = [2, 256], strides = [1, 1]} : vector<2x384xf32> to vector<2x256xf32>
    %326 = arith.addf %324, %325 : vector<2x256xf32>
    %327 = arith.negf %326 : vector<2x256xf32>
    %328 = math.exp %327 : vector<2x256xf32>
    %cst_87 = arith.constant 1.000000e+00 : f32
    %329 = vector.broadcast %cst_87 : f32 to vector<2x256xf32>
    %330 = arith.addf %329, %328 : vector<2x256xf32>
    %331 = arith.divf %329, %330 : vector<2x256xf32>
    %332 = vector.extract_strided_slice %331 {offsets = [0, 0], sizes = [2, 10], strides = [1, 1]} : vector<2x256xf32> to vector<2x10xf32>
    %333 = vector.extract_strided_slice %331 {offsets = [0, 128], sizes = [2, 10], strides = [1, 1]} : vector<2x256xf32> to vector<2x10xf32>
    %334 = vector.extract_strided_slice %322 {offsets = [0, 256], sizes = [2, 10], strides = [1, 1]} : vector<2x384xf32> to vector<2x10xf32>
    %335 = vector.extract_strided_slice %323 {offsets = [0, 256], sizes = [2, 10], strides = [1, 1]} : vector<2x384xf32> to vector<2x10xf32>
    %336 = vector.broadcast %240 : vector<1x10xf32> to vector<2x10xf32>
    %337 = arith.addf %335, %336 : vector<2x10xf32>
    %338 = arith.mulf %332, %337 : vector<2x10xf32>
    %339 = arith.addf %334, %338 : vector<2x10xf32>
    %340 = math.tanh %339 : vector<2x10xf32>
    %cst_88 = arith.constant 1.000000e+00 : f32
    %341 = vector.broadcast %cst_88 : f32 to vector<2x10xf32>
    %342 = arith.subf %341, %333 : vector<2x10xf32>
    %343 = arith.mulf %342, %340 : vector<2x10xf32>
    %344 = arith.mulf %333, %319 : vector<2x10xf32>
    %345 = arith.addf %343, %344 : vector<2x10xf32>
    %cst_89 = arith.constant dense<0.000000e+00> : vector<2x384xf32>
    %346 = tpu.matmul %154, %234, %cst_89 {dimension_numbers = #tpu.dot_dimension_numbers<[1], [0], [0], [1], [0, 0, 1, 1], [], []>} : vector<2x10xf32>, vector<10x384xf32>, vector<2x384xf32> -> vector<2x384xf32>
    %347 = vector.broadcast %238 : vector<1x384xf32> to vector<2x384xf32>
    %348 = arith.addf %346, %347 : vector<2x384xf32>
    %cst_90 = arith.constant dense<0.000000e+00> : vector<2x384xf32>
    %349 = tpu.matmul %345, %236, %cst_90 {dimension_numbers = #tpu.dot_dimension_numbers<[1], [0], [0], [1], [0, 0, 1, 1], [], []>} : vector<2x10xf32>, vector<10x384xf32>, vector<2x384xf32> -> vector<2x384xf32>
    %350 = vector.extract_strided_slice %348 {offsets = [0, 0], sizes = [2, 256], strides = [1, 1]} : vector<2x384xf32> to vector<2x256xf32>
    %351 = vector.extract_strided_slice %349 {offsets = [0, 0], sizes = [2, 256], strides = [1, 1]} : vector<2x384xf32> to vector<2x256xf32>
    %352 = arith.addf %350, %351 : vector<2x256xf32>
    %353 = arith.negf %352 : vector<2x256xf32>
    %354 = math.exp %353 : vector<2x256xf32>
    %cst_91 = arith.constant 1.000000e+00 : f32
    %355 = vector.broadcast %cst_91 : f32 to vector<2x256xf32>
    %356 = arith.addf %355, %354 : vector<2x256xf32>
    %357 = arith.divf %355, %356 : vector<2x256xf32>
    %358 = vector.extract_strided_slice %357 {offsets = [0, 0], sizes = [2, 10], strides = [1, 1]} : vector<2x256xf32> to vector<2x10xf32>
    %359 = vector.extract_strided_slice %357 {offsets = [0, 128], sizes = [2, 10], strides = [1, 1]} : vector<2x256xf32> to vector<2x10xf32>
    %360 = vector.extract_strided_slice %348 {offsets = [0, 256], sizes = [2, 10], strides = [1, 1]} : vector<2x384xf32> to vector<2x10xf32>
    %361 = vector.extract_strided_slice %349 {offsets = [0, 256], sizes = [2, 10], strides = [1, 1]} : vector<2x384xf32> to vector<2x10xf32>
    %362 = vector.broadcast %240 : vector<1x10xf32> to vector<2x10xf32>
    %363 = arith.addf %361, %362 : vector<2x10xf32>
    %364 = arith.mulf %358, %363 : vector<2x10xf32>
    %365 = arith.addf %360, %364 : vector<2x10xf32>
    %366 = math.tanh %365 : vector<2x10xf32>
    %cst_92 = arith.constant 1.000000e+00 : f32
    %367 = vector.broadcast %cst_92 : f32 to vector<2x10xf32>
    %368 = arith.subf %367, %359 : vector<2x10xf32>
    %369 = arith.mulf %368, %366 : vector<2x10xf32>
    %370 = arith.mulf %359, %345 : vector<2x10xf32>
    %371 = arith.addf %369, %370 : vector<2x10xf32>
    %cst_93 = arith.constant dense<0.000000e+00> : vector<2x384xf32>
    %372 = tpu.matmul %180, %234, %cst_93 {dimension_numbers = #tpu.dot_dimension_numbers<[1], [0], [0], [1], [0, 0, 1, 1], [], []>} : vector<2x10xf32>, vector<10x384xf32>, vector<2x384xf32> -> vector<2x384xf32>
    %373 = vector.broadcast %238 : vector<1x384xf32> to vector<2x384xf32>
    %374 = arith.addf %372, %373 : vector<2x384xf32>
    %cst_94 = arith.constant dense<0.000000e+00> : vector<2x384xf32>
    %375 = tpu.matmul %371, %236, %cst_94 {dimension_numbers = #tpu.dot_dimension_numbers<[1], [0], [0], [1], [0, 0, 1, 1], [], []>} : vector<2x10xf32>, vector<10x384xf32>, vector<2x384xf32> -> vector<2x384xf32>
    %376 = vector.extract_strided_slice %374 {offsets = [0, 0], sizes = [2, 256], strides = [1, 1]} : vector<2x384xf32> to vector<2x256xf32>
    %377 = vector.extract_strided_slice %375 {offsets = [0, 0], sizes = [2, 256], strides = [1, 1]} : vector<2x384xf32> to vector<2x256xf32>
    %378 = arith.addf %376, %377 : vector<2x256xf32>
    %379 = arith.negf %378 : vector<2x256xf32>
    %380 = math.exp %379 : vector<2x256xf32>
    %cst_95 = arith.constant 1.000000e+00 : f32
    %381 = vector.broadcast %cst_95 : f32 to vector<2x256xf32>
    %382 = arith.addf %381, %380 : vector<2x256xf32>
    %383 = arith.divf %381, %382 : vector<2x256xf32>
    %384 = vector.extract_strided_slice %383 {offsets = [0, 0], sizes = [2, 10], strides = [1, 1]} : vector<2x256xf32> to vector<2x10xf32>
    %385 = vector.extract_strided_slice %383 {offsets = [0, 128], sizes = [2, 10], strides = [1, 1]} : vector<2x256xf32> to vector<2x10xf32>
    %386 = vector.extract_strided_slice %374 {offsets = [0, 256], sizes = [2, 10], strides = [1, 1]} : vector<2x384xf32> to vector<2x10xf32>
    %387 = vector.extract_strided_slice %375 {offsets = [0, 256], sizes = [2, 10], strides = [1, 1]} : vector<2x384xf32> to vector<2x10xf32>
    %388 = vector.broadcast %240 : vector<1x10xf32> to vector<2x10xf32>
    %389 = arith.addf %387, %388 : vector<2x10xf32>
    %390 = arith.mulf %384, %389 : vector<2x10xf32>
    %391 = arith.addf %386, %390 : vector<2x10xf32>
    %392 = math.tanh %391 : vector<2x10xf32>
    %cst_96 = arith.constant 1.000000e+00 : f32
    %393 = vector.broadcast %cst_96 : f32 to vector<2x10xf32>
    %394 = arith.subf %393, %385 : vector<2x10xf32>
    %395 = arith.mulf %394, %392 : vector<2x10xf32>
    %396 = arith.mulf %385, %371 : vector<2x10xf32>
    %397 = arith.addf %395, %396 : vector<2x10xf32>
    %cst_97 = arith.constant dense<0.000000e+00> : vector<2x384xf32>
    %398 = tpu.matmul %206, %234, %cst_97 {dimension_numbers = #tpu.dot_dimension_numbers<[1], [0], [0], [1], [0, 0, 1, 1], [], []>} : vector<2x10xf32>, vector<10x384xf32>, vector<2x384xf32> -> vector<2x384xf32>
    %399 = vector.broadcast %238 : vector<1x384xf32> to vector<2x384xf32>
    %400 = arith.addf %398, %399 : vector<2x384xf32>
    %cst_98 = arith.constant dense<0.000000e+00> : vector<2x384xf32>
    %401 = tpu.matmul %397, %236, %cst_98 {dimension_numbers = #tpu.dot_dimension_numbers<[1], [0], [0], [1], [0, 0, 1, 1], [], []>} : vector<2x10xf32>, vector<10x384xf32>, vector<2x384xf32> -> vector<2x384xf32>
    %402 = vector.extract_strided_slice %400 {offsets = [0, 0], sizes = [2, 256], strides = [1, 1]} : vector<2x384xf32> to vector<2x256xf32>
    %403 = vector.extract_strided_slice %401 {offsets = [0, 0], sizes = [2, 256], strides = [1, 1]} : vector<2x384xf32> to vector<2x256xf32>
    %404 = arith.addf %402, %403 : vector<2x256xf32>
    %405 = arith.negf %404 : vector<2x256xf32>
    %406 = math.exp %405 : vector<2x256xf32>
    %cst_99 = arith.constant 1.000000e+00 : f32
    %407 = vector.broadcast %cst_99 : f32 to vector<2x256xf32>
    %408 = arith.addf %407, %406 : vector<2x256xf32>
    %409 = arith.divf %407, %408 : vector<2x256xf32>
    %410 = vector.extract_strided_slice %409 {offsets = [0, 0], sizes = [2, 10], strides = [1, 1]} : vector<2x256xf32> to vector<2x10xf32>
    %411 = vector.extract_strided_slice %409 {offsets = [0, 128], sizes = [2, 10], strides = [1, 1]} : vector<2x256xf32> to vector<2x10xf32>
    %412 = vector.extract_strided_slice %400 {offsets = [0, 256], sizes = [2, 10], strides = [1, 1]} : vector<2x384xf32> to vector<2x10xf32>
    %413 = vector.extract_strided_slice %401 {offsets = [0, 256], sizes = [2, 10], strides = [1, 1]} : vector<2x384xf32> to vector<2x10xf32>
    %414 = vector.broadcast %240 : vector<1x10xf32> to vector<2x10xf32>
    %415 = arith.addf %413, %414 : vector<2x10xf32>
    %416 = arith.mulf %410, %415 : vector<2x10xf32>
    %417 = arith.addf %412, %416 : vector<2x10xf32>
    %418 = math.tanh %417 : vector<2x10xf32>
    %cst_100 = arith.constant 1.000000e+00 : f32
    %419 = vector.broadcast %cst_100 : f32 to vector<2x10xf32>
    %420 = arith.subf %419, %411 : vector<2x10xf32>
    %421 = arith.mulf %420, %418 : vector<2x10xf32>
    %422 = arith.mulf %411, %397 : vector<2x10xf32>
    %423 = arith.addf %421, %422 : vector<2x10xf32>
    %cst_101 = arith.constant dense<0.000000e+00> : vector<2x384xf32>
    %424 = tpu.matmul %232, %234, %cst_101 {dimension_numbers = #tpu.dot_dimension_numbers<[1], [0], [0], [1], [0, 0, 1, 1], [], []>} : vector<2x10xf32>, vector<10x384xf32>, vector<2x384xf32> -> vector<2x384xf32>
    %425 = vector.broadcast %238 : vector<1x384xf32> to vector<2x384xf32>
    %426 = arith.addf %424, %425 : vector<2x384xf32>
    %cst_102 = arith.constant dense<0.000000e+00> : vector<2x384xf32>
    %427 = tpu.matmul %423, %236, %cst_102 {dimension_numbers = #tpu.dot_dimension_numbers<[1], [0], [0], [1], [0, 0, 1, 1], [], []>} : vector<2x10xf32>, vector<10x384xf32>, vector<2x384xf32> -> vector<2x384xf32>
    %428 = vector.extract_strided_slice %426 {offsets = [0, 0], sizes = [2, 256], strides = [1, 1]} : vector<2x384xf32> to vector<2x256xf32>
    %429 = vector.extract_strided_slice %427 {offsets = [0, 0], sizes = [2, 256], strides = [1, 1]} : vector<2x384xf32> to vector<2x256xf32>
    %430 = arith.addf %428, %429 : vector<2x256xf32>
    %431 = arith.negf %430 : vector<2x256xf32>
    %432 = math.exp %431 : vector<2x256xf32>
    %cst_103 = arith.constant 1.000000e+00 : f32
    %433 = vector.broadcast %cst_103 : f32 to vector<2x256xf32>
    %434 = arith.addf %433, %432 : vector<2x256xf32>
    %435 = arith.divf %433, %434 : vector<2x256xf32>
    %436 = vector.extract_strided_slice %435 {offsets = [0, 0], sizes = [2, 10], strides = [1, 1]} : vector<2x256xf32> to vector<2x10xf32>
    %437 = vector.extract_strided_slice %435 {offsets = [0, 128], sizes = [2, 10], strides = [1, 1]} : vector<2x256xf32> to vector<2x10xf32>
    %438 = vector.extract_strided_slice %426 {offsets = [0, 256], sizes = [2, 10], strides = [1, 1]} : vector<2x384xf32> to vector<2x10xf32>
    %439 = vector.extract_strided_slice %427 {offsets = [0, 256], sizes = [2, 10], strides = [1, 1]} : vector<2x384xf32> to vector<2x10xf32>
    %440 = vector.broadcast %240 : vector<1x10xf32> to vector<2x10xf32>
    %441 = arith.addf %439, %440 : vector<2x10xf32>
    %442 = arith.mulf %436, %441 : vector<2x10xf32>
    %443 = arith.addf %438, %442 : vector<2x10xf32>
    %444 = math.tanh %443 : vector<2x10xf32>
    %cst_104 = arith.constant 1.000000e+00 : f32
    %445 = vector.broadcast %cst_104 : f32 to vector<2x10xf32>
    %446 = arith.subf %445, %437 : vector<2x10xf32>
    %447 = arith.mulf %446, %444 : vector<2x10xf32>
    %448 = arith.mulf %437, %423 : vector<2x10xf32>
    %449 = arith.addf %447, %448 : vector<2x10xf32>
    %c2_105 = arith.constant 2 : index
    %c0_106 = arith.constant 0 : index
    %c0_107 = arith.constant 0 : index
    %450 = vector.load %arg1[%c2_105, %c0_106, %c0_107] : memref<3x10x384xf32, #tpu.memory_space<vmem>>, vector<1x10x384xf32>
    %451 = vector.shape_cast %450 : vector<1x10x384xf32> to vector<10x384xf32>
    %c2_108 = arith.constant 2 : index
    %c0_109 = arith.constant 0 : index
    %c0_110 = arith.constant 0 : index
    %452 = vector.load %arg2[%c2_108, %c0_109, %c0_110] : memref<3x10x384xf32, #tpu.memory_space<vmem>>, vector<1x10x384xf32>
    %453 = vector.shape_cast %452 : vector<1x10x384xf32> to vector<10x384xf32>
    %c2_111 = arith.constant 2 : index
    %c0_112 = arith.constant 0 : index
    %c0_113 = arith.constant 0 : index
    %454 = vector.load %arg3[%c2_111, %c0_112, %c0_113] : memref<3x1x384xf32, #tpu.memory_space<vmem>>, vector<1x1x384xf32>
    %455 = vector.shape_cast %454 : vector<1x1x384xf32> to vector<1x384xf32>
    %c2_114 = arith.constant 2 : index
    %c0_115 = arith.constant 0 : index
    %c0_116 = arith.constant 0 : index
    %456 = vector.load %arg4[%c2_114, %c0_115, %c0_116] : memref<3x1x10xf32, #tpu.memory_space<vmem>>, vector<1x1x10xf32>
    %457 = vector.shape_cast %456 : vector<1x1x10xf32> to vector<1x10xf32>
    %cst_117 = arith.constant 0.000000e+00 : f32
    %458 = vector.broadcast %cst_117 : f32 to vector<2x10xf32>
    %cst_118 = arith.constant dense<0.000000e+00> : vector<2x384xf32>
    %459 = tpu.matmul %267, %451, %cst_118 {dimension_numbers = #tpu.dot_dimension_numbers<[1], [0], [0], [1], [0, 0, 1, 1], [], []>} : vector<2x10xf32>, vector<10x384xf32>, vector<2x384xf32> -> vector<2x384xf32>
    %460 = vector.broadcast %455 : vector<1x384xf32> to vector<2x384xf32>
    %461 = arith.addf %459, %460 : vector<2x384xf32>
    %cst_119 = arith.constant dense<0.000000e+00> : vector<2x384xf32>
    %462 = tpu.matmul %458, %453, %cst_119 {dimension_numbers = #tpu.dot_dimension_numbers<[1], [0], [0], [1], [0, 0, 1, 1], [], []>} : vector<2x10xf32>, vector<10x384xf32>, vector<2x384xf32> -> vector<2x384xf32>
    %463 = vector.extract_strided_slice %461 {offsets = [0, 0], sizes = [2, 256], strides = [1, 1]} : vector<2x384xf32> to vector<2x256xf32>
    %464 = vector.extract_strided_slice %462 {offsets = [0, 0], sizes = [2, 256], strides = [1, 1]} : vector<2x384xf32> to vector<2x256xf32>
    %465 = arith.addf %463, %464 : vector<2x256xf32>
    %466 = arith.negf %465 : vector<2x256xf32>
    %467 = math.exp %466 : vector<2x256xf32>
    %cst_120 = arith.constant 1.000000e+00 : f32
    %468 = vector.broadcast %cst_120 : f32 to vector<2x256xf32>
    %469 = arith.addf %468, %467 : vector<2x256xf32>
    %470 = arith.divf %468, %469 : vector<2x256xf32>
    %471 = vector.extract_strided_slice %470 {offsets = [0, 0], sizes = [2, 10], strides = [1, 1]} : vector<2x256xf32> to vector<2x10xf32>
    %472 = vector.extract_strided_slice %470 {offsets = [0, 128], sizes = [2, 10], strides = [1, 1]} : vector<2x256xf32> to vector<2x10xf32>
    %473 = vector.extract_strided_slice %461 {offsets = [0, 256], sizes = [2, 10], strides = [1, 1]} : vector<2x384xf32> to vector<2x10xf32>
    %474 = vector.extract_strided_slice %462 {offsets = [0, 256], sizes = [2, 10], strides = [1, 1]} : vector<2x384xf32> to vector<2x10xf32>
    %475 = vector.broadcast %457 : vector<1x10xf32> to vector<2x10xf32>
    %476 = arith.addf %474, %475 : vector<2x10xf32>
    %477 = arith.mulf %471, %476 : vector<2x10xf32>
    %478 = arith.addf %473, %477 : vector<2x10xf32>
    %479 = math.tanh %478 : vector<2x10xf32>
    %cst_121 = arith.constant 1.000000e+00 : f32
    %480 = vector.broadcast %cst_121 : f32 to vector<2x10xf32>
    %481 = arith.subf %480, %472 : vector<2x10xf32>
    %482 = arith.mulf %481, %479 : vector<2x10xf32>
    %483 = arith.mulf %472, %458 : vector<2x10xf32>
    %484 = arith.addf %482, %483 : vector<2x10xf32>
    %cst_122 = arith.constant dense<0.000000e+00> : vector<2x384xf32>
    %485 = tpu.matmul %293, %451, %cst_122 {dimension_numbers = #tpu.dot_dimension_numbers<[1], [0], [0], [1], [0, 0, 1, 1], [], []>} : vector<2x10xf32>, vector<10x384xf32>, vector<2x384xf32> -> vector<2x384xf32>
    %486 = vector.broadcast %455 : vector<1x384xf32> to vector<2x384xf32>
    %487 = arith.addf %485, %486 : vector<2x384xf32>
    %cst_123 = arith.constant dense<0.000000e+00> : vector<2x384xf32>
    %488 = tpu.matmul %484, %453, %cst_123 {dimension_numbers = #tpu.dot_dimension_numbers<[1], [0], [0], [1], [0, 0, 1, 1], [], []>} : vector<2x10xf32>, vector<10x384xf32>, vector<2x384xf32> -> vector<2x384xf32>
    %489 = vector.extract_strided_slice %487 {offsets = [0, 0], sizes = [2, 256], strides = [1, 1]} : vector<2x384xf32> to vector<2x256xf32>
    %490 = vector.extract_strided_slice %488 {offsets = [0, 0], sizes = [2, 256], strides = [1, 1]} : vector<2x384xf32> to vector<2x256xf32>
    %491 = arith.addf %489, %490 : vector<2x256xf32>
    %492 = arith.negf %491 : vector<2x256xf32>
    %493 = math.exp %492 : vector<2x256xf32>
    %cst_124 = arith.constant 1.000000e+00 : f32
    %494 = vector.broadcast %cst_124 : f32 to vector<2x256xf32>
    %495 = arith.addf %494, %493 : vector<2x256xf32>
    %496 = arith.divf %494, %495 : vector<2x256xf32>
    %497 = vector.extract_strided_slice %496 {offsets = [0, 0], sizes = [2, 10], strides = [1, 1]} : vector<2x256xf32> to vector<2x10xf32>
    %498 = vector.extract_strided_slice %496 {offsets = [0, 128], sizes = [2, 10], strides = [1, 1]} : vector<2x256xf32> to vector<2x10xf32>
    %499 = vector.extract_strided_slice %487 {offsets = [0, 256], sizes = [2, 10], strides = [1, 1]} : vector<2x384xf32> to vector<2x10xf32>
    %500 = vector.extract_strided_slice %488 {offsets = [0, 256], sizes = [2, 10], strides = [1, 1]} : vector<2x384xf32> to vector<2x10xf32>
    %501 = vector.broadcast %457 : vector<1x10xf32> to vector<2x10xf32>
    %502 = arith.addf %500, %501 : vector<2x10xf32>
    %503 = arith.mulf %497, %502 : vector<2x10xf32>
    %504 = arith.addf %499, %503 : vector<2x10xf32>
    %505 = math.tanh %504 : vector<2x10xf32>
    %cst_125 = arith.constant 1.000000e+00 : f32
    %506 = vector.broadcast %cst_125 : f32 to vector<2x10xf32>
    %507 = arith.subf %506, %498 : vector<2x10xf32>
    %508 = arith.mulf %507, %505 : vector<2x10xf32>
    %509 = arith.mulf %498, %484 : vector<2x10xf32>
    %510 = arith.addf %508, %509 : vector<2x10xf32>
    %cst_126 = arith.constant dense<0.000000e+00> : vector<2x384xf32>
    %511 = tpu.matmul %319, %451, %cst_126 {dimension_numbers = #tpu.dot_dimension_numbers<[1], [0], [0], [1], [0, 0, 1, 1], [], []>} : vector<2x10xf32>, vector<10x384xf32>, vector<2x384xf32> -> vector<2x384xf32>
    %512 = vector.broadcast %455 : vector<1x384xf32> to vector<2x384xf32>
    %513 = arith.addf %511, %512 : vector<2x384xf32>
    %cst_127 = arith.constant dense<0.000000e+00> : vector<2x384xf32>
    %514 = tpu.matmul %510, %453, %cst_127 {dimension_numbers = #tpu.dot_dimension_numbers<[1], [0], [0], [1], [0, 0, 1, 1], [], []>} : vector<2x10xf32>, vector<10x384xf32>, vector<2x384xf32> -> vector<2x384xf32>
    %515 = vector.extract_strided_slice %513 {offsets = [0, 0], sizes = [2, 256], strides = [1, 1]} : vector<2x384xf32> to vector<2x256xf32>
    %516 = vector.extract_strided_slice %514 {offsets = [0, 0], sizes = [2, 256], strides = [1, 1]} : vector<2x384xf32> to vector<2x256xf32>
    %517 = arith.addf %515, %516 : vector<2x256xf32>
    %518 = arith.negf %517 : vector<2x256xf32>
    %519 = math.exp %518 : vector<2x256xf32>
    %cst_128 = arith.constant 1.000000e+00 : f32
    %520 = vector.broadcast %cst_128 : f32 to vector<2x256xf32>
    %521 = arith.addf %520, %519 : vector<2x256xf32>
    %522 = arith.divf %520, %521 : vector<2x256xf32>
    %523 = vector.extract_strided_slice %522 {offsets = [0, 0], sizes = [2, 10], strides = [1, 1]} : vector<2x256xf32> to vector<2x10xf32>
    %524 = vector.extract_strided_slice %522 {offsets = [0, 128], sizes = [2, 10], strides = [1, 1]} : vector<2x256xf32> to vector<2x10xf32>
    %525 = vector.extract_strided_slice %513 {offsets = [0, 256], sizes = [2, 10], strides = [1, 1]} : vector<2x384xf32> to vector<2x10xf32>
    %526 = vector.extract_strided_slice %514 {offsets = [0, 256], sizes = [2, 10], strides = [1, 1]} : vector<2x384xf32> to vector<2x10xf32>
    %527 = vector.broadcast %457 : vector<1x10xf32> to vector<2x10xf32>
    %528 = arith.addf %526, %527 : vector<2x10xf32>
    %529 = arith.mulf %523, %528 : vector<2x10xf32>
    %530 = arith.addf %525, %529 : vector<2x10xf32>
    %531 = math.tanh %530 : vector<2x10xf32>
    %cst_129 = arith.constant 1.000000e+00 : f32
    %532 = vector.broadcast %cst_129 : f32 to vector<2x10xf32>
    %533 = arith.subf %532, %524 : vector<2x10xf32>
    %534 = arith.mulf %533, %531 : vector<2x10xf32>
    %535 = arith.mulf %524, %510 : vector<2x10xf32>
    %536 = arith.addf %534, %535 : vector<2x10xf32>
    %cst_130 = arith.constant dense<0.000000e+00> : vector<2x384xf32>
    %537 = tpu.matmul %345, %451, %cst_130 {dimension_numbers = #tpu.dot_dimension_numbers<[1], [0], [0], [1], [0, 0, 1, 1], [], []>} : vector<2x10xf32>, vector<10x384xf32>, vector<2x384xf32> -> vector<2x384xf32>
    %538 = vector.broadcast %455 : vector<1x384xf32> to vector<2x384xf32>
    %539 = arith.addf %537, %538 : vector<2x384xf32>
    %cst_131 = arith.constant dense<0.000000e+00> : vector<2x384xf32>
    %540 = tpu.matmul %536, %453, %cst_131 {dimension_numbers = #tpu.dot_dimension_numbers<[1], [0], [0], [1], [0, 0, 1, 1], [], []>} : vector<2x10xf32>, vector<10x384xf32>, vector<2x384xf32> -> vector<2x384xf32>
    %541 = vector.extract_strided_slice %539 {offsets = [0, 0], sizes = [2, 256], strides = [1, 1]} : vector<2x384xf32> to vector<2x256xf32>
    %542 = vector.extract_strided_slice %540 {offsets = [0, 0], sizes = [2, 256], strides = [1, 1]} : vector<2x384xf32> to vector<2x256xf32>
    %543 = arith.addf %541, %542 : vector<2x256xf32>
    %544 = arith.negf %543 : vector<2x256xf32>
    %545 = math.exp %544 : vector<2x256xf32>
    %cst_132 = arith.constant 1.000000e+00 : f32
    %546 = vector.broadcast %cst_132 : f32 to vector<2x256xf32>
    %547 = arith.addf %546, %545 : vector<2x256xf32>
    %548 = arith.divf %546, %547 : vector<2x256xf32>
    %549 = vector.extract_strided_slice %548 {offsets = [0, 0], sizes = [2, 10], strides = [1, 1]} : vector<2x256xf32> to vector<2x10xf32>
    %550 = vector.extract_strided_slice %548 {offsets = [0, 128], sizes = [2, 10], strides = [1, 1]} : vector<2x256xf32> to vector<2x10xf32>
    %551 = vector.extract_strided_slice %539 {offsets = [0, 256], sizes = [2, 10], strides = [1, 1]} : vector<2x384xf32> to vector<2x10xf32>
    %552 = vector.extract_strided_slice %540 {offsets = [0, 256], sizes = [2, 10], strides = [1, 1]} : vector<2x384xf32> to vector<2x10xf32>
    %553 = vector.broadcast %457 : vector<1x10xf32> to vector<2x10xf32>
    %554 = arith.addf %552, %553 : vector<2x10xf32>
    %555 = arith.mulf %549, %554 : vector<2x10xf32>
    %556 = arith.addf %551, %555 : vector<2x10xf32>
    %557 = math.tanh %556 : vector<2x10xf32>
    %cst_133 = arith.constant 1.000000e+00 : f32
    %558 = vector.broadcast %cst_133 : f32 to vector<2x10xf32>
    %559 = arith.subf %558, %550 : vector<2x10xf32>
    %560 = arith.mulf %559, %557 : vector<2x10xf32>
    %561 = arith.mulf %550, %536 : vector<2x10xf32>
    %562 = arith.addf %560, %561 : vector<2x10xf32>
    %cst_134 = arith.constant dense<0.000000e+00> : vector<2x384xf32>
    %563 = tpu.matmul %371, %451, %cst_134 {dimension_numbers = #tpu.dot_dimension_numbers<[1], [0], [0], [1], [0, 0, 1, 1], [], []>} : vector<2x10xf32>, vector<10x384xf32>, vector<2x384xf32> -> vector<2x384xf32>
    %564 = vector.broadcast %455 : vector<1x384xf32> to vector<2x384xf32>
    %565 = arith.addf %563, %564 : vector<2x384xf32>
    %cst_135 = arith.constant dense<0.000000e+00> : vector<2x384xf32>
    %566 = tpu.matmul %562, %453, %cst_135 {dimension_numbers = #tpu.dot_dimension_numbers<[1], [0], [0], [1], [0, 0, 1, 1], [], []>} : vector<2x10xf32>, vector<10x384xf32>, vector<2x384xf32> -> vector<2x384xf32>
    %567 = vector.extract_strided_slice %565 {offsets = [0, 0], sizes = [2, 256], strides = [1, 1]} : vector<2x384xf32> to vector<2x256xf32>
    %568 = vector.extract_strided_slice %566 {offsets = [0, 0], sizes = [2, 256], strides = [1, 1]} : vector<2x384xf32> to vector<2x256xf32>
    %569 = arith.addf %567, %568 : vector<2x256xf32>
    %570 = arith.negf %569 : vector<2x256xf32>
    %571 = math.exp %570 : vector<2x256xf32>
    %cst_136 = arith.constant 1.000000e+00 : f32
    %572 = vector.broadcast %cst_136 : f32 to vector<2x256xf32>
    %573 = arith.addf %572, %571 : vector<2x256xf32>
    %574 = arith.divf %572, %573 : vector<2x256xf32>
    %575 = vector.extract_strided_slice %574 {offsets = [0, 0], sizes = [2, 10], strides = [1, 1]} : vector<2x256xf32> to vector<2x10xf32>
    %576 = vector.extract_strided_slice %574 {offsets = [0, 128], sizes = [2, 10], strides = [1, 1]} : vector<2x256xf32> to vector<2x10xf32>
    %577 = vector.extract_strided_slice %565 {offsets = [0, 256], sizes = [2, 10], strides = [1, 1]} : vector<2x384xf32> to vector<2x10xf32>
    %578 = vector.extract_strided_slice %566 {offsets = [0, 256], sizes = [2, 10], strides = [1, 1]} : vector<2x384xf32> to vector<2x10xf32>
    %579 = vector.broadcast %457 : vector<1x10xf32> to vector<2x10xf32>
    %580 = arith.addf %578, %579 : vector<2x10xf32>
    %581 = arith.mulf %575, %580 : vector<2x10xf32>
    %582 = arith.addf %577, %581 : vector<2x10xf32>
    %583 = math.tanh %582 : vector<2x10xf32>
    %cst_137 = arith.constant 1.000000e+00 : f32
    %584 = vector.broadcast %cst_137 : f32 to vector<2x10xf32>
    %585 = arith.subf %584, %576 : vector<2x10xf32>
    %586 = arith.mulf %585, %583 : vector<2x10xf32>
    %587 = arith.mulf %576, %562 : vector<2x10xf32>
    %588 = arith.addf %586, %587 : vector<2x10xf32>
    %cst_138 = arith.constant dense<0.000000e+00> : vector<2x384xf32>
    %589 = tpu.matmul %397, %451, %cst_138 {dimension_numbers = #tpu.dot_dimension_numbers<[1], [0], [0], [1], [0, 0, 1, 1], [], []>} : vector<2x10xf32>, vector<10x384xf32>, vector<2x384xf32> -> vector<2x384xf32>
    %590 = vector.broadcast %455 : vector<1x384xf32> to vector<2x384xf32>
    %591 = arith.addf %589, %590 : vector<2x384xf32>
    %cst_139 = arith.constant dense<0.000000e+00> : vector<2x384xf32>
    %592 = tpu.matmul %588, %453, %cst_139 {dimension_numbers = #tpu.dot_dimension_numbers<[1], [0], [0], [1], [0, 0, 1, 1], [], []>} : vector<2x10xf32>, vector<10x384xf32>, vector<2x384xf32> -> vector<2x384xf32>
    %593 = vector.extract_strided_slice %591 {offsets = [0, 0], sizes = [2, 256], strides = [1, 1]} : vector<2x384xf32> to vector<2x256xf32>
    %594 = vector.extract_strided_slice %592 {offsets = [0, 0], sizes = [2, 256], strides = [1, 1]} : vector<2x384xf32> to vector<2x256xf32>
    %595 = arith.addf %593, %594 : vector<2x256xf32>
    %596 = arith.negf %595 : vector<2x256xf32>
    %597 = math.exp %596 : vector<2x256xf32>
    %cst_140 = arith.constant 1.000000e+00 : f32
    %598 = vector.broadcast %cst_140 : f32 to vector<2x256xf32>
    %599 = arith.addf %598, %597 : vector<2x256xf32>
    %600 = arith.divf %598, %599 : vector<2x256xf32>
    %601 = vector.extract_strided_slice %600 {offsets = [0, 0], sizes = [2, 10], strides = [1, 1]} : vector<2x256xf32> to vector<2x10xf32>
    %602 = vector.extract_strided_slice %600 {offsets = [0, 128], sizes = [2, 10], strides = [1, 1]} : vector<2x256xf32> to vector<2x10xf32>
    %603 = vector.extract_strided_slice %591 {offsets = [0, 256], sizes = [2, 10], strides = [1, 1]} : vector<2x384xf32> to vector<2x10xf32>
    %604 = vector.extract_strided_slice %592 {offsets = [0, 256], sizes = [2, 10], strides = [1, 1]} : vector<2x384xf32> to vector<2x10xf32>
    %605 = vector.broadcast %457 : vector<1x10xf32> to vector<2x10xf32>
    %606 = arith.addf %604, %605 : vector<2x10xf32>
    %607 = arith.mulf %601, %606 : vector<2x10xf32>
    %608 = arith.addf %603, %607 : vector<2x10xf32>
    %609 = math.tanh %608 : vector<2x10xf32>
    %cst_141 = arith.constant 1.000000e+00 : f32
    %610 = vector.broadcast %cst_141 : f32 to vector<2x10xf32>
    %611 = arith.subf %610, %602 : vector<2x10xf32>
    %612 = arith.mulf %611, %609 : vector<2x10xf32>
    %613 = arith.mulf %602, %588 : vector<2x10xf32>
    %614 = arith.addf %612, %613 : vector<2x10xf32>
    %cst_142 = arith.constant dense<0.000000e+00> : vector<2x384xf32>
    %615 = tpu.matmul %423, %451, %cst_142 {dimension_numbers = #tpu.dot_dimension_numbers<[1], [0], [0], [1], [0, 0, 1, 1], [], []>} : vector<2x10xf32>, vector<10x384xf32>, vector<2x384xf32> -> vector<2x384xf32>
    %616 = vector.broadcast %455 : vector<1x384xf32> to vector<2x384xf32>
    %617 = arith.addf %615, %616 : vector<2x384xf32>
    %cst_143 = arith.constant dense<0.000000e+00> : vector<2x384xf32>
    %618 = tpu.matmul %614, %453, %cst_143 {dimension_numbers = #tpu.dot_dimension_numbers<[1], [0], [0], [1], [0, 0, 1, 1], [], []>} : vector<2x10xf32>, vector<10x384xf32>, vector<2x384xf32> -> vector<2x384xf32>
    %619 = vector.extract_strided_slice %617 {offsets = [0, 0], sizes = [2, 256], strides = [1, 1]} : vector<2x384xf32> to vector<2x256xf32>
    %620 = vector.extract_strided_slice %618 {offsets = [0, 0], sizes = [2, 256], strides = [1, 1]} : vector<2x384xf32> to vector<2x256xf32>
    %621 = arith.addf %619, %620 : vector<2x256xf32>
    %622 = arith.negf %621 : vector<2x256xf32>
    %623 = math.exp %622 : vector<2x256xf32>
    %cst_144 = arith.constant 1.000000e+00 : f32
    %624 = vector.broadcast %cst_144 : f32 to vector<2x256xf32>
    %625 = arith.addf %624, %623 : vector<2x256xf32>
    %626 = arith.divf %624, %625 : vector<2x256xf32>
    %627 = vector.extract_strided_slice %626 {offsets = [0, 0], sizes = [2, 10], strides = [1, 1]} : vector<2x256xf32> to vector<2x10xf32>
    %628 = vector.extract_strided_slice %626 {offsets = [0, 128], sizes = [2, 10], strides = [1, 1]} : vector<2x256xf32> to vector<2x10xf32>
    %629 = vector.extract_strided_slice %617 {offsets = [0, 256], sizes = [2, 10], strides = [1, 1]} : vector<2x384xf32> to vector<2x10xf32>
    %630 = vector.extract_strided_slice %618 {offsets = [0, 256], sizes = [2, 10], strides = [1, 1]} : vector<2x384xf32> to vector<2x10xf32>
    %631 = vector.broadcast %457 : vector<1x10xf32> to vector<2x10xf32>
    %632 = arith.addf %630, %631 : vector<2x10xf32>
    %633 = arith.mulf %627, %632 : vector<2x10xf32>
    %634 = arith.addf %629, %633 : vector<2x10xf32>
    %635 = math.tanh %634 : vector<2x10xf32>
    %cst_145 = arith.constant 1.000000e+00 : f32
    %636 = vector.broadcast %cst_145 : f32 to vector<2x10xf32>
    %637 = arith.subf %636, %628 : vector<2x10xf32>
    %638 = arith.mulf %637, %635 : vector<2x10xf32>
    %639 = arith.mulf %628, %614 : vector<2x10xf32>
    %640 = arith.addf %638, %639 : vector<2x10xf32>
    %cst_146 = arith.constant dense<0.000000e+00> : vector<2x384xf32>
    %641 = tpu.matmul %449, %451, %cst_146 {dimension_numbers = #tpu.dot_dimension_numbers<[1], [0], [0], [1], [0, 0, 1, 1], [], []>} : vector<2x10xf32>, vector<10x384xf32>, vector<2x384xf32> -> vector<2x384xf32>
    %642 = vector.broadcast %455 : vector<1x384xf32> to vector<2x384xf32>
    %643 = arith.addf %641, %642 : vector<2x384xf32>
    %cst_147 = arith.constant dense<0.000000e+00> : vector<2x384xf32>
    %644 = tpu.matmul %640, %453, %cst_147 {dimension_numbers = #tpu.dot_dimension_numbers<[1], [0], [0], [1], [0, 0, 1, 1], [], []>} : vector<2x10xf32>, vector<10x384xf32>, vector<2x384xf32> -> vector<2x384xf32>
    %645 = vector.extract_strided_slice %643 {offsets = [0, 0], sizes = [2, 256], strides = [1, 1]} : vector<2x384xf32> to vector<2x256xf32>
    %646 = vector.extract_strided_slice %644 {offsets = [0, 0], sizes = [2, 256], strides = [1, 1]} : vector<2x384xf32> to vector<2x256xf32>
    %647 = arith.addf %645, %646 : vector<2x256xf32>
    %648 = arith.negf %647 : vector<2x256xf32>
    %649 = math.exp %648 : vector<2x256xf32>
    %cst_148 = arith.constant 1.000000e+00 : f32
    %650 = vector.broadcast %cst_148 : f32 to vector<2x256xf32>
    %651 = arith.addf %650, %649 : vector<2x256xf32>
    %652 = arith.divf %650, %651 : vector<2x256xf32>
    %653 = vector.extract_strided_slice %652 {offsets = [0, 0], sizes = [2, 10], strides = [1, 1]} : vector<2x256xf32> to vector<2x10xf32>
    %654 = vector.extract_strided_slice %652 {offsets = [0, 128], sizes = [2, 10], strides = [1, 1]} : vector<2x256xf32> to vector<2x10xf32>
    %655 = vector.extract_strided_slice %643 {offsets = [0, 256], sizes = [2, 10], strides = [1, 1]} : vector<2x384xf32> to vector<2x10xf32>
    %656 = vector.extract_strided_slice %644 {offsets = [0, 256], sizes = [2, 10], strides = [1, 1]} : vector<2x384xf32> to vector<2x10xf32>
    %657 = vector.broadcast %457 : vector<1x10xf32> to vector<2x10xf32>
    %658 = arith.addf %656, %657 : vector<2x10xf32>
    %659 = arith.mulf %653, %658 : vector<2x10xf32>
    %660 = arith.addf %655, %659 : vector<2x10xf32>
    %661 = math.tanh %660 : vector<2x10xf32>
    %cst_149 = arith.constant 1.000000e+00 : f32
    %662 = vector.broadcast %cst_149 : f32 to vector<2x10xf32>
    %663 = arith.subf %662, %654 : vector<2x10xf32>
    %664 = arith.mulf %663, %661 : vector<2x10xf32>
    %665 = arith.mulf %654, %640 : vector<2x10xf32>
    %666 = arith.addf %664, %665 : vector<2x10xf32>
    %c0_150 = arith.constant 0 : index
    %c0_151 = arith.constant 0 : index
    %667 = vector.load %arg5[%c0_150, %c0_151] : memref<2x10xf32, #tpu.memory_space<vmem>>, vector<2x10xf32>
    tpu.vector_store %arg5[%c0_150, %c0_151], %666 {strides = array<i32>} : memref<2x10xf32, #tpu.memory_space<vmem>>, vector<2x10xf32>,
    return
  }
}

</mosaic_0001>

<bundles_post_ra>
// kernel: action_model_bbox_forward.1
= control target key start
LH: loop header
LB: loop body
LE: loop exit
PB: predicated region body
PF: predicated region fallthrough
CT: control target
= control target key end

     0   :  { %vm75_vm0 = vcmask 1041408   ;;  %vm9280_vm1 = vmmov 1   ;;  %vm70_vm3 = vcmask 1041409   ;;  %v9281_v8 = vmov 0.0   ;;  %s10519_s0 = inlined_call_operand.vmem [shape: f32[2,8,10], index: 0, kind: input, shape index: {}]   ;;  %s10520_s1 = inlined_call_operand.vmem [shape: f32[3,10,384], index: 1, kind: input, shape index: {}]   ;;  %s10521_s2 = inlined_call_operand.vmem [shape: f32[3,10,384], index: 2, kind: input, shape index: {}]   ;;  %s10522_s3 = inlined_call_operand.vmem [shape: f32[3,1,384], index: 3, kind: input, shape index: {}]   ;;  %s10523_s4 = inlined_call_operand.vmem [shape: f32[3,1,10], index: 4, kind: input, shape index: {}]   ;;  %s10524_s5 = inlined_call_operand.hbm [shape: f32[2,10], index: 5, kind: output, shape index: {}]  }
   0x1   :  { %v38_v0 = vld [vmem:[%s10520_s1 + $0x8] sm:$0xff]  ;;  %v41_v1 = vld [vmem:[%s10520_s1 + $0x20] sm:$0x3]  ;;  %vm9326_vm2 = vmpackc.low %vm75_vm0, %vm9280_vm1  ;;  %149 = vmatprep.mubr.f32.mxu0 %v9281_v8  ;;  %vm72_vm4 = vcmask 80896   ;;  %v9282_v18 = vmov 0.0|0.0   ;;  %vm9283_vm5 = vmmov 0  }
   0x2   :  { %v37_v2 = vld [vmem:[%s10520_s1] sm:$0xff]  ;;  %v9324_v3 = vpack.c.bf16 %v41_v1, %v38_v0  ;;  %v40_v5 = vld [vmem:[%s10520_s1 + $0x18] sm:$0x3]  ;;  %v22_v9 = vld [vmem:[%s10519_s0 + $0x8] sm:$0x1]  ;;  %8441 = vmatprep.subr.bf16.mxu1 %v9282_v18  ;;  %8103 = vmatprep.mubr.msk.f32.mxu1 %vm9283_vm5, %v9281_v8 }
   0x3   :  { %v21_v6 = vld [vmem:[%s10519_s0] sm:$0x1]  ;;  %v9336_v7 = vpack.c.bf16 %v40_v5, %v37_v2  ;;  %v44_v10 = vld [vmem:[%s10521_s2 + $0x8] sm:$0xff]  ;;  %v69_v12 = vrot.slane %v22_v9, 7  ;;  %v46_v15 = vld [vmem:[%s10521_s2 + $0x18] sm:$0x3] }
   0x4   :  { %v47_v11 = vld [vmem:[%s10521_s2 + $0x20] sm:$0x3]  ;;  %8437 = vmatprep.subr.msk.bf16.mxu0 %vm9326_vm2, %v9324_v3  ;;  %v39_v16 = vld [vmem:[%s10520_s1 + $0x10] sm:$0xff]  ;;  %v42_v19 = vld [vmem:[%s10520_s1 + $0x28] sm:$0x3] }
   0x5   :  { %v9351_v13 = vpack.c.bf16 %v47_v11, %v44_v10  ;;  %v43_v14 = vld [vmem:[%s10521_s2] sm:$0xff]  ;;  %8440 = vmatpush1.bf16.msk.msra.mxu0 %vm9326_vm2, %v9336_v7  ;;  %v45_v20 = vld [vmem:[%s10521_s2 + $0x10] sm:$0xff]  ;;  %v48_v21 = vld [vmem:[%s10521_s2 + $0x28] sm:$0x3]  ;;  %v71_v22 = vsel %vm70_vm3, %v69_v12, %v21_v6  ;;  %v9381_v23 = vpack.c.bf16 %v42_v19, %v39_v16 }
   0x6   :  { %v9365_v17 = vpack.c.bf16 %v46_v15, %v43_v14 }
   0x7   :  { %8447 = vmatprep.subr.msk.bf16.mxu0 %vm9326_vm2, %v9351_v13 }
   0x8   :  { %10 = vsyncpa [#allocation3], 0  ;;  %7644 = vmatmul.mubr.msk.f32.vlgmr.msra.gmra.mrb[0].mxu0 %vm72_vm4, %v71_v22  ;;  %8444 = vmatpush3.bf16.msk.msra.mxu1 %vm9326_vm2, %v9381_v23  ;;  %v9389_v24 = vpack.c.bf16 %v48_v21, %v45_v20  ;;  %v23_v25 = vld [vmem:[%s10519_s0 + $0x1] sm:$0x1]  ;;  %v24_v26 = vld [vmem:[%s10519_s0 + $0x9] sm:$0x1]  ;;  %v52_v29 = vlaneseq }
   0x9   :  { %8450 = vmatpush1.bf16.msk.msra.mxu0 %vm9326_vm2, %v9365_v17  ;;  %302 = vmatprep.mubr.f32.mxu0 %v9281_v8  ;;  %v409_v27 = vrot.slane %v24_v26, 7  ;;  %v49_v32 = vld [vmem:[%s10522_s3] sm:$0x7]  ;;  %v26_v5 = vld [vmem:[%s10519_s0 + $0xa] sm:$0x1]  ;;  %vm7626_vm6 = vcmask 74752  }
   0xa   :  { %8451 = vmatprep.subr.bf16.mxu1 %v9282_v18  ;;  %8457 = vmatprep.subr.msk.bf16.mxu0 %vm9326_vm2, %v9324_v3  ;;  %v53_v30 = vshrl.u32 %v52_v29, 7  ;;  %v9463_v50 = vld [vmem:[%s10523_s4] ss:$0 sm:$0xff]  ;;  %v25_v2 = vld [vmem:[%s10519_s0 + $0x2] sm:$0x1]  ;;  %v722_v6 = vrot.slane %v26_v5, 7 }
   0xb   :  { %8104 = vmatmul.mubr.msk.f32.vlgmr.msra.gmra.mrb[0].mxu1 %vm72_vm4, %v71_v22  ;;  %v410_v28 = vsel %vm70_vm3, %v409_v27, %v23_v25 }
   0xc   :  { %8454 = vmatpush3.bf16.msk.msra.mxu1 %vm9326_vm2, %v9389_v24  ;;  %8110 = vmatprep.mubr.msk.f32.mxu1 %vm9283_vm5, %v9281_v8  ;;  %v9443_v31 = vsub.s32 0, %v53_v30  ;;  %v9448_v34 = vsub.s32 1, %v53_v30  ;;  %v9458_v48 = vsub.s32 2, %v53_v30  ;;  %v723_v9 = vsel %vm70_vm3, %v722_v6, %v25_v2 }
   0xd   :  { %8461 = vmatprep.subr.bf16.mxu1 %v9282_v18 }
   0xe   :  { %v9451_v36 = vrot.slane %v49_v32, %v9443_v31  ;;  %v9454_v39 = vrot.slane %v49_v32, %v9448_v34  ;;  %v9466_v52 = vrot.slane %v49_v32, %v9458_v48 }
   0xf   :  { %8111 = vmatmul.mubr.f32.vlgmr.msra.gmra.mrb[2].mxu1 %v9281_v8 }
  0x10   :  { %303 = vmatmul.mubr.f32.vlgmr.msra.gmra.mrb[0].mxu0 %v9281_v8  ;;  %8464 = vmatpush3.bf16.msk.msra.mxu1 %vm9326_vm2, %v9381_v23 }
  0x11   :  { %8460 = vmatpush1.bf16.msk.msra.mxu0 %vm9326_vm2, %v9336_v7  ;;  %477 = vmatprep.mubr.f32.mxu0 %v9281_v8 }
  0x12   :  { %8467 = vmatprep.subr.msk.bf16.mxu0 %vm9326_vm2, %v9351_v13  ;;  %8117 = vmatprep.mubr.msk.f32.mxu1 %vm9283_vm5, %v9281_v8 }
  0x13   :  { %8471 = vmatprep.subr.bf16.mxu1 %v9282_v18  ;;  %8118 = vmatmul.mubr.msk.f32.vlgmr.msra.gmra.mrb[4].mxu1 %vm72_vm4, %v410_v28 }
  0x14   :  { %7655 = vmatmul.mubr.msk.f32.vlgmr.msra.gmra.mrb[2].mxu0 %vm72_vm4, %v410_v28  ;;  %8474 = vmatpush3.bf16.msk.msra.mxu1 %vm9326_vm2, %v9389_v24 }
  0x15   :  { %8470 = vmatpush1.bf16.msk.msra.mxu0 %vm9326_vm2, %v9365_v17  ;;  %621 = vmatprep.mubr.f32.mxu0 %v9281_v8 }
  0x16   :  { %8124 = vmatprep.mubr.msk.f32.mxu1 %vm9283_vm5, %v9281_v8  ;;  %8477 = vmatprep.subr.msk.bf16.mxu0 %vm9326_vm2, %v9324_v3 }
  0x17   :  { %8481 = vmatprep.subr.bf16.mxu1 %v9282_v18 }
  0xde   :  { %v222_v33 = vpop.f32.mrb[0].mxu1 }
  0xdf   :  { %v8105_v35 = vpop.f32.mrb[1].mxu1  ;;  %v223_v55 = vadd.f32 %v222_v33, %v9466_v52 }
  0xe2   :  { %v375_v37 = vpop.f32.mrb[2].mxu1 }
  0xe3   :  { %v304_v38 = vpop.f32.mrb[0].mxu0  ;;  %v8112_v40 = vpop.f32.mrb[3].mxu1  ;;  %v399_v53 = vadd.f32 %v9463_v50, %v375_v37 }
  0xe4   :  { %v8915_v41 = vadd.f32 %v304_v38, %v9451_v36  ;;  %v306_v42 = vpop.f32.mrb[1].mxu0 }
  0xe5   :  { %v8916_v44 = vadd.f32 %v306_v42, %v9454_v39 }
  0xe6   :  { %v7650_v43 = vmul.f32 -1.442695, %v8915_v41  ;;  %v550_v0 = vpop.f32.mrb[4].mxu1 }
  0xe7   :  { %v7651_v45 = vmul.f32 -1.442695, %v8916_v44  ;;  %v8119_v1 = vpop.f32.mrb[5].mxu1  ;;  %v551_v29 = vadd.f32 %v550_v0, %v9466_v52  ;;  %v27_v44 = vld [vmem:[%s10519_s0 + $0x3] sm:$0x1] }
  0xe8   :  { %9016 = vpow2.f32 %v7650_v43 }
  0xe9   :  { %9018 = vpow2.f32 %v7651_v45  ;;  %v28_v45 = vld [vmem:[%s10519_s0 + $0xb] sm:$0x1] }
  0xf2   :  { %v9017_v46 = vpop.eup %9016 }
  0xf3   :  { %v387_v47 = vadd.f32 1.0, %v9017_v46  ;;  %v9019_v49 = vpop.eup %9018  ;;  %v1035_v46 = vrot.slane %v28_v45, 7 }
  0xf4   :  { %v388_v51 = vadd.f32 1.0, %v9019_v49 }
  0xf5   :  { %9020 = vrcp.f32 %v387_v47  ;;  %v1036_v47 = vsel %vm70_vm3, %v1035_v46, %v27_v44 }
  0xf6   :  { %9022 = vrcp.f32 %v388_v51 }
  0xff   :  { %v9021_v54 = vpop.eup %9020 }
 0x100   :  { %v400_v56 = vmul.f32 %v9021_v54, %v399_v53  ;;  %v9023_v58 = vpop.eup %9022 }
 0x101   :  { %v403_v59 = vsub.f32 1.0, %v9023_v58  ;;  %v405_v62 = vmul.f32 0.0, %v9023_v58 }
 0x102   :  { %v401_v57 = vadd.f32 %v400_v56, %v223_v55 }
 0x104   :  { %9024 = vtanh.f32 %v401_v57 }
 0x10e   :  { %v9025_v60 = vpop.eup %9024 }
 0x10f   :  { %v404_v61 = vmul.f32 %v9025_v60, %v403_v59 }
 0x111   :  { %v9470_v63 = vadd.f32 %v405_v62, %v404_v61 }
 0x113   :  { %7660 = vmatmul.mubr.msk.f32.vlgmr.msra.gmra.mrb[2].mxu0 %vm72_vm4, %v9470_v63  ;;  %8125 = vmatmul.mubr.msk.f32.vlgmr.msra.gmra.mrb[6].mxu1 %vm72_vm4, %v9470_v63 }
 0x114   :  { %8480 = vmatpush1.bf16.msk.msra.mxu0 %vm9326_vm2, %v9336_v7  ;;  %790 = vmatprep.mubr.f32.mxu0 %v9281_v8 }
 0x115   :  { %8487 = vmatprep.subr.msk.bf16.mxu0 %vm9326_vm2, %v9351_v13  ;;  %8484 = vmatpush3.bf16.msk.msra.mxu1 %vm9326_vm2, %v9381_v23 }
 0x116   :  { %8131 = vmatprep.mubr.msk.f32.mxu1 %vm9283_vm5, %v9281_v8  ;;  %8491 = vmatprep.subr.bf16.mxu1 %v9282_v18 }
 0x117   :  { %7667 = vmatmul.mubr.msk.f32.vlgmr.msra.gmra.mrb[4].mxu0 %vm72_vm4, %v723_v9 }
 0x118   :  { %8132 = vmatmul.mubr.msk.f32.vlgmr.msra.gmra.mrb[8].mxu1 %vm72_vm4, %v723_v9  ;;  %8490 = vmatpush1.bf16.msk.msra.mxu0 %vm9326_vm2, %v9365_v17 }
 0x119   :  { %8494 = vmatpush3.bf16.msk.msra.mxu1 %vm9326_vm2, %v9389_v24  ;;  %934 = vmatprep.mubr.f32.mxu0 %v9281_v8 }
 0x11a   :  { %8138 = vmatprep.mubr.msk.f32.mxu1 %vm9283_vm5, %v9281_v8  ;;  %8497 = vmatprep.subr.msk.bf16.mxu0 %vm9326_vm2, %v9324_v3 }
 0x11b   :  { %8501 = vmatprep.subr.bf16.mxu1 %v9282_v18 }
 0x1e6   :  { %v623_v10 = vpop.f32.mrb[2].mxu0  ;;  %v694_v11 = vpop.f32.mrb[6].mxu1 }
 0x1e7   :  { %v8917_v12 = vadd.f32 %v623_v10, %v9451_v36  ;;  %v625_v14 = vpop.f32.mrb[3].mxu0  ;;  %v8126_v15 = vpop.f32.mrb[7].mxu1  ;;  %v712_v27 = vadd.f32 %v9463_v50, %v694_v11 }
 0x1e8   :  { %v8918_v19 = vadd.f32 %v625_v14, %v9454_v39 }
 0x1e9   :  { %v7663_v16 = vmul.f32 -1.442695, %v8917_v12 }
 0x1ea   :  { %v7664_v20 = vmul.f32 -1.442695, %v8918_v19 }
 0x1eb   :  { %9026 = vpow2.f32 %v7663_v16  ;;  %v863_v42 = vpop.f32.mrb[8].mxu1 }
 0x1ec   :  { %9028 = vpow2.f32 %v7664_v20  ;;  %v8133_v43 = vpop.f32.mrb[9].mxu1  ;;  %v864_v2 = vadd.f32 %v863_v42, %v9466_v52  ;;  %v29_v20 = vld [vmem:[%s10519_s0 + $0x4] sm:$0x1] }
 0x1f5   :  { %v9027_v21 = vpop.eup %9026 }
 0x1f6   :  { %v706_v22 = vadd.f32 1.0, %v9027_v21  ;;  %v9029_v25 = vpop.eup %9028  ;;  %v30_v21 = vld [vmem:[%s10519_s0 + $0xc] sm:$0x1] }
 0x1f7   :  { %v707_v26 = vadd.f32 1.0, %v9029_v25 }
 0x1f8   :  { %9030 = vrcp.f32 %v706_v22  ;;  %v1348_v22 = vrot.slane %v30_v21, 7 }
 0x1f9   :  { %9032 = vrcp.f32 %v707_v26 }
 0x1fa   :  { %v1349_v25 = vsel %vm70_vm3, %v1348_v22, %v29_v20 }
 0x202   :  { %v9031_v28 = vpop.eup %9030 }
 0x203   :  { %v713_v30 = vmul.f32 %v9031_v28, %v712_v27  ;;  %v9033_v33 = vpop.eup %9032 }
 0x204   :  { %v716_v35 = vsub.f32 1.0, %v9033_v33  ;;  %v718_v40 = vmul.f32 %v9033_v33, %v9470_v63 }
 0x205   :  { %v714_v32 = vadd.f32 %v713_v30, %v551_v29 }
 0x207   :  { %9034 = vtanh.f32 %v714_v32 }
 0x211   :  { %v9035_v37 = vpop.eup %9034 }
 0x212   :  { %v717_v38 = vmul.f32 %v9035_v37, %v716_v35 }
 0x214   :  { %v9516_v41 = vadd.f32 %v718_v40, %v717_v38 }
 0x216   :  { %7672 = vmatmul.mubr.msk.f32.vlgmr.msra.gmra.mrb[4].mxu0 %vm72_vm4, %v9516_v41  ;;  %8139 = vmatmul.mubr.msk.f32.vlgmr.msra.gmra.mrb[10].mxu1 %vm72_vm4, %v9516_v41 }
 0x217   :  { %8500 = vmatpush1.bf16.msk.msra.mxu0 %vm9326_vm2, %v9336_v7  ;;  %1103 = vmatprep.mubr.f32.mxu0 %v9281_v8 }
 0x218   :  { %8507 = vmatprep.subr.msk.bf16.mxu0 %vm9326_vm2, %v9351_v13  ;;  %8504 = vmatpush3.bf16.msk.msra.mxu1 %vm9326_vm2, %v9381_v23 }
 0x219   :  { %8145 = vmatprep.mubr.msk.f32.mxu1 %vm9283_vm5, %v9281_v8  ;;  %8511 = vmatprep.subr.bf16.mxu1 %v9282_v18 }
 0x21a   :  { %7679 = vmatmul.mubr.msk.f32.vlgmr.msra.gmra.mrb[6].mxu0 %vm72_vm4, %v1036_v47 }
 0x21b   :  { %8146 = vmatmul.mubr.msk.f32.vlgmr.msra.gmra.mrb[12].mxu1 %vm72_vm4, %v1036_v47  ;;  %8510 = vmatpush1.bf16.msk.msra.mxu0 %vm9326_vm2, %v9365_v17 }
 0x21c   :  { %8514 = vmatpush3.bf16.msk.msra.mxu1 %vm9326_vm2, %v9389_v24  ;;  %1247 = vmatprep.mubr.f32.mxu0 %v9281_v8 }
 0x21d   :  { %8152 = vmatprep.mubr.msk.f32.mxu1 %vm9283_vm5, %v9281_v8  ;;  %8517 = vmatprep.subr.msk.bf16.mxu0 %vm9326_vm2, %v9324_v3 }
 0x21e   :  { %8521 = vmatprep.subr.bf16.mxu1 %v9282_v18 }
 0x2e9   :  { %v936_v49 = vpop.f32.mrb[4].mxu0  ;;  %v1007_v51 = vpop.f32.mrb[10].mxu1 }
 0x2ea   :  { %v8919_v53 = vadd.f32 %v936_v49, %v9451_v36  ;;  %v938_v54 = vpop.f32.mrb[5].mxu0  ;;  %v8140_v55 = vpop.f32.mrb[11].mxu1  ;;  %v1025_v0 = vadd.f32 %v9463_v50, %v1007_v51 }
 0x2eb   :  { %v8920_v57 = vadd.f32 %v938_v54, %v9454_v39 }
 0x2ec   :  { %v7675_v56 = vmul.f32 -1.442695, %v8919_v53 }
 0x2ed   :  { %v7676_v58 = vmul.f32 -1.442695, %v8920_v57 }
 0x2ee   :  { %9036 = vpow2.f32 %v7675_v56  ;;  %v1176_v16 = vpop.f32.mrb[12].mxu1 }
 0x2ef   :  { %9038 = vpow2.f32 %v7676_v58  ;;  %v8147_v19 = vpop.f32.mrb[13].mxu1  ;;  %v1177_v45 = vadd.f32 %v1176_v16, %v9466_v52 }
 0x2f8   :  { %v9037_v59 = vpop.eup %9036 }
 0x2f9   :  { %v1019_v60 = vadd.f32 1.0, %v9037_v59  ;;  %v9039_v61 = vpop.eup %9038  ;;  %v31_v59 = vld [vmem:[%s10519_s0 + $0x5] sm:$0x1] }
 0x2fa   :  { %v1020_v62 = vadd.f32 1.0, %v9039_v61 }
 0x2fb   :  { %9040 = vrcp.f32 %v1019_v60  ;;  %v32_v60 = vld [vmem:[%s10519_s0 + $0xd] sm:$0x1] }
 0x2fc   :  { %9042 = vrcp.f32 %v1020_v62  ;;  %v1661_v61 = vrot.slane %v32_v60, 7 }
 0x2fe   :  { %v1662_v62 = vsel %vm70_vm3, %v1661_v61, %v31_v59 }
 0x305   :  { %v9041_v1 = vpop.eup %9040 }
 0x306   :  { %v1026_v5 = vmul.f32 %v9041_v1, %v1025_v0  ;;  %v9043_v9 = vpop.eup %9042 }
 0x307   :  { %v1029_v10 = vsub.f32 1.0, %v9043_v9  ;;  %v1031_v14 = vmul.f32 %v9043_v9, %v9516_v41 }
 0x308   :  { %v1027_v6 = vadd.f32 %v1026_v5, %v864_v2 }
 0x30a   :  { %9044 = vtanh.f32 %v1027_v6 }
 0x314   :  { %v9045_v11 = vpop.eup %9044 }
 0x315   :  { %v1030_v12 = vmul.f32 %v9045_v11, %v1029_v10 }
 0x317   :  { %v9562_v15 = vadd.f32 %v1031_v14, %v1030_v12 }
 0x319   :  { %7684 = vmatmul.mubr.msk.f32.vlgmr.msra.gmra.mrb[6].mxu0 %vm72_vm4, %v9562_v15  ;;  %8153 = vmatmul.mubr.msk.f32.vlgmr.msra.gmra.mrb[14].mxu1 %vm72_vm4, %v9562_v15 }
 0x31a   :  { %8520 = vmatpush1.bf16.msk.msra.mxu0 %vm9326_vm2, %v9336_v7  ;;  %1416 = vmatprep.mubr.f32.mxu0 %v9281_v8 }
 0x31b   :  { %8527 = vmatprep.subr.msk.bf16.mxu0 %vm9326_vm2, %v9351_v13  ;;  %8524 = vmatpush3.bf16.msk.msra.mxu1 %vm9326_vm2, %v9381_v23 }
 0x31c   :  { %8159 = vmatprep.mubr.msk.f32.mxu1 %vm9283_vm5, %v9281_v8  ;;  %8531 = vmatprep.subr.bf16.mxu1 %v9282_v18 }
 0x31d   :  { %7691 = vmatmul.mubr.msk.f32.vlgmr.msra.gmra.mrb[8].mxu0 %vm72_vm4, %v1349_v25 }
 0x31e   :  { %8160 = vmatmul.mubr.msk.f32.vlgmr.msra.gmra.mrb[16].mxu1 %vm72_vm4, %v1349_v25  ;;  %8530 = vmatpush1.bf16.msk.msra.mxu0 %vm9326_vm2, %v9365_v17 }
 0x31f   :  { %8534 = vmatpush3.bf16.msk.msra.mxu1 %vm9326_vm2, %v9389_v24  ;;  %1560 = vmatprep.mubr.f32.mxu0 %v9281_v8 }
 0x320   :  { %8166 = vmatprep.mubr.msk.f32.mxu1 %vm9283_vm5, %v9281_v8  ;;  %8537 = vmatprep.subr.msk.bf16.mxu0 %vm9326_vm2, %v9324_v3 }
 0x321   :  { %8541 = vmatprep.subr.bf16.mxu1 %v9282_v18 }
 0x3ec   :  { %v1249_v26 = vpop.f32.mrb[6].mxu0  ;;  %v1320_v27 = vpop.f32.mrb[14].mxu1 }
 0x3ed   :  { %v8921_v28 = vadd.f32 %v1249_v26, %v9451_v36  ;;  %v1251_v29 = vpop.f32.mrb[7].mxu0  ;;  %v8154_v30 = vpop.f32.mrb[15].mxu1  ;;  %v1338_v43 = vadd.f32 %v9463_v50, %v1320_v27 }
 0x3ee   :  { %v8922_v33 = vadd.f32 %v1251_v29, %v9454_v39 }
 0x3ef   :  { %v7687_v32 = vmul.f32 -1.442695, %v8921_v28 }
 0x3f0   :  { %v7688_v35 = vmul.f32 -1.442695, %v8922_v33 }
 0x3f1   :  { %9046 = vpow2.f32 %v7687_v32  ;;  %v1489_v57 = vpop.f32.mrb[16].mxu1 }
 0x3f2   :  { %9048 = vpow2.f32 %v7688_v35  ;;  %v8161_v58 = vpop.f32.mrb[17].mxu1  ;;  %v1490_v22 = vadd.f32 %v1489_v57, %v9466_v52 }
 0x3fb   :  { %v9047_v37 = vpop.eup %9046 }
 0x3fc   :  { %v1332_v38 = vadd.f32 1.0, %v9047_v37  ;;  %v9049_v40 = vpop.eup %9048 }
 0x3fd   :  { %v1333_v42 = vadd.f32 1.0, %v9049_v40  ;;  %v34_v40 = vld [vmem:[%s10519_s0 + $0xe] sm:$0x1] }
 0x3fe   :  { %9050 = vrcp.f32 %v1332_v38  ;;  %v33_v38 = vld [vmem:[%s10519_s0 + $0x6] sm:$0x1] }
 0x3ff   :  { %9052 = vrcp.f32 %v1333_v42  ;;  %v1974_v42 = vrot.slane %v34_v40, 7 }
 0x408   :  { %v9051_v44 = vpop.eup %9050 }
 0x409   :  { %v1339_v46 = vmul.f32 %v9051_v44, %v1338_v43  ;;  %v9053_v49 = vpop.eup %9052  ;;  %v1975_v43 = vsel %vm70_vm3, %v1974_v42, %v33_v38 }
 0x40a   :  { %v1342_v51 = vsub.f32 1.0, %v9053_v49  ;;  %v1344_v55 = vmul.f32 %v9053_v49, %v9562_v15 }
 0x40b   :  { %v1340_v47 = vadd.f32 %v1339_v46, %v1177_v45 }
 0x40d   :  { %9054 = vtanh.f32 %v1340_v47 }
 0x417   :  { %v9055_v53 = vpop.eup %9054 }
 0x418   :  { %v1343_v54 = vmul.f32 %v9055_v53, %v1342_v51 }
 0x41a   :  { %v9608_v56 = vadd.f32 %v1344_v55, %v1343_v54 }
 0x41c   :  { %7696 = vmatmul.mubr.msk.f32.vlgmr.msra.gmra.mrb[8].mxu0 %vm72_vm4, %v9608_v56  ;;  %8167 = vmatmul.mubr.msk.f32.vlgmr.msra.gmra.mrb[18].mxu1 %vm72_vm4, %v9608_v56 }
 0x41d   :  { %8540 = vmatpush1.bf16.msk.msra.mxu0 %vm9326_vm2, %v9336_v7  ;;  %1729 = vmatprep.mubr.f32.mxu0 %v9281_v8 }
 0x41e   :  { %8547 = vmatprep.subr.msk.bf16.mxu0 %vm9326_vm2, %v9351_v13  ;;  %8544 = vmatpush3.bf16.msk.msra.mxu1 %vm9326_vm2, %v9381_v23 }
 0x41f   :  { %8173 = vmatprep.mubr.msk.f32.mxu1 %vm9283_vm5, %v9281_v8  ;;  %8551 = vmatprep.subr.bf16.mxu1 %v9282_v18 }
 0x420   :  { %7703 = vmatmul.mubr.msk.f32.vlgmr.msra.gmra.mrb[10].mxu0 %vm72_vm4, %v1662_v62 }
 0x421   :  { %8174 = vmatmul.mubr.msk.f32.vlgmr.msra.gmra.mrb[20].mxu1 %vm72_vm4, %v1662_v62  ;;  %8550 = vmatpush1.bf16.msk.msra.mxu0 %vm9326_vm2, %v9365_v17 }
 0x422   :  { %8554 = vmatpush3.bf16.msk.msra.mxu1 %vm9326_vm2, %v9389_v24  ;;  %1873 = vmatprep.mubr.f32.mxu0 %v9281_v8 }
 0x423   :  { %8180 = vmatprep.mubr.msk.f32.mxu1 %vm9283_vm5, %v9281_v8  ;;  %8557 = vmatprep.subr.msk.bf16.mxu0 %vm9326_vm2, %v9324_v3 }
 0x424   :  { %8561 = vmatprep.subr.bf16.mxu1 %v9282_v18 }
 0x4ef   :  { %v1562_v0 = vpop.f32.mrb[8].mxu0  ;;  %v1633_v1 = vpop.f32.mrb[18].mxu1 }
 0x4f0   :  { %v8923_v2 = vadd.f32 %v1562_v0, %v9451_v36  ;;  %v1564_v5 = vpop.f32.mrb[9].mxu0  ;;  %v8168_v6 = vpop.f32.mrb[19].mxu1  ;;  %v1651_v20 = vadd.f32 %v9463_v50, %v1633_v1 }
 0x4f1   :  { %v8924_v10 = vadd.f32 %v1564_v5, %v9454_v39 }
 0x4f2   :  { %v7699_v9 = vmul.f32 -1.442695, %v8923_v2 }
 0x4f3   :  { %v7700_v11 = vmul.f32 -1.442695, %v8924_v10 }
 0x4f4   :  { %9056 = vpow2.f32 %v7699_v9  ;;  %v1802_v35 = vpop.f32.mrb[20].mxu1 }
 0x4f5   :  { %9058 = vpow2.f32 %v7700_v11  ;;  %v8175_v37 = vpop.f32.mrb[21].mxu1  ;;  %v1803_v61 = vadd.f32 %v1802_v35, %v9466_v52 }
 0x4fe   :  { %v9057_v12 = vpop.eup %9056 }
 0x4ff   :  { %v1645_v14 = vadd.f32 1.0, %v9057_v12  ;;  %v9059_v16 = vpop.eup %9058 }
 0x500   :  { %v1646_v19 = vadd.f32 1.0, %v9059_v16 }
 0x501   :  { %9060 = vrcp.f32 %v1645_v14  ;;  %v36_v14 = vld [vmem:[%s10519_s0 + $0xf] sm:$0x1] }
 0x502   :  { %9062 = vrcp.f32 %v1646_v19  ;;  %v7741_v19 = vld [vmem:[%s10520_s1 + $0x50] sm:$0x3] }
 0x50b   :  { %v9061_v21 = vpop.eup %9060 }
 0x50c   :  { %v1652_v25 = vmul.f32 %v9061_v21, %v1651_v20  ;;  %v9063_v27 = vpop.eup %9062 }
 0x50d   :  { %v1655_v28 = vsub.f32 1.0, %v9063_v27  ;;  %v1657_v32 = vmul.f32 %v9063_v27, %v9608_v56 }
 0x50e   :  { %v1653_v26 = vadd.f32 %v1652_v25, %v1490_v22 }
 0x510   :  { %9064 = vtanh.f32 %v1653_v26 }
 0x51a   :  { %v9065_v29 = vpop.eup %9064 }
 0x51b   :  { %v1656_v30 = vmul.f32 %v9065_v29, %v1655_v28 }
 0x51d   :  { %v9654_v33 = vadd.f32 %v1657_v32, %v1656_v30 }
 0x51f   :  { %7708 = vmatmul.mubr.msk.f32.vlgmr.msra.gmra.mrb[10].mxu0 %vm72_vm4, %v9654_v33  ;;  %8181 = vmatmul.mubr.msk.f32.vlgmr.msra.gmra.mrb[22].mxu1 %vm72_vm4, %v9654_v33 }
 0x520   :  { %8560 = vmatpush1.bf16.msk.msra.mxu0 %vm9326_vm2, %v9336_v7  ;;  %2042 = vmatprep.mubr.f32.mxu0 %v9281_v8 }
 0x521   :  { %8567 = vmatprep.subr.msk.bf16.mxu0 %vm9326_vm2, %v9351_v13  ;;  %8564 = vmatpush3.bf16.msk.msra.mxu1 %vm9326_vm2, %v9381_v23 }
 0x522   :  { %8187 = vmatprep.mubr.msk.f32.mxu1 %vm9283_vm5, %v9281_v8  ;;  %8571 = vmatprep.subr.bf16.mxu1 %v9282_v18 }
 0x523   :  { %7715 = vmatmul.mubr.msk.f32.vlgmr.msra.gmra.mrb[12].mxu0 %vm72_vm4, %v1975_v43 }
 0x524   :  { %8188 = vmatmul.mubr.msk.f32.vlgmr.msra.gmra.mrb[24].mxu1 %vm72_vm4, %v1975_v43  ;;  %8570 = vmatpush1.bf16.msk.msra.mxu0 %vm9326_vm2, %v9365_v17 }
 0x525   :  { %8574 = vmatpush3.bf16.msk.msra.mxu1 %vm9326_vm2, %v9389_v24  ;;  %2186 = vmatprep.mubr.f32.mxu0 %v9281_v8 }
 0x526   :  { %8194 = vmatprep.mubr.msk.f32.mxu1 %vm9283_vm5, %v9281_v8  ;;  %8577 = vmatprep.subr.msk.bf16.mxu0 %vm9326_vm2, %v9324_v3 }
 0x527   :  { %8581 = vmatprep.subr.bf16.mxu1 %v9282_v18 }
 0x5f2   :  { %v1875_v44 = vpop.f32.mrb[10].mxu0  ;;  %v1946_v45 = vpop.f32.mrb[22].mxu1 }
 0x5f3   :  { %v8925_v46 = vadd.f32 %v1875_v44, %v9451_v36  ;;  %v1877_v47 = vpop.f32.mrb[11].mxu0  ;;  %v8182_v49 = vpop.f32.mrb[23].mxu1  ;;  %v1964_v3 = vadd.f32 %v9463_v50, %v1946_v45  ;;  %v7737_v45 = vld [vmem:[%s10520_s1 + $0x30] sm:$0xff] }
 0x5f4   :  { %v8926_v53 = vadd.f32 %v1877_v47, %v9454_v39  ;;  %v7740_v47 = vld [vmem:[%s10520_s1 + $0x48] sm:$0x3]  ;;  %v7739_v49 = vld [vmem:[%s10520_s1 + $0x40] sm:$0xff] }
 0x5f5   :  { %v7711_v51 = vmul.f32 -1.442695, %v8925_v46 }
 0x5f6   :  { %v7712_v54 = vmul.f32 -1.442695, %v8926_v53 }
 0x5f7   :  { %9066 = vpow2.f32 %v7711_v51  ;;  %v2115_v11 = vpop.f32.mrb[24].mxu1  ;;  %v7742_v51 = vld [vmem:[%s10520_s1 + $0x58] sm:$0x3] }
 0x5f8   :  { %9068 = vpow2.f32 %v7712_v54  ;;  %v8189_v12 = vpop.f32.mrb[25].mxu1  ;;  %v2116_v40 = vadd.f32 %v2115_v11, %v9466_v52 }
 0x601   :  { %v9067_v55 = vpop.eup %9066 }
 0x602   :  { %v1958_v57 = vadd.f32 1.0, %v9067_v55  ;;  %v9069_v58 = vpop.eup %9068 }
 0x603   :  { %v1959_v59 = vadd.f32 1.0, %v9069_v58  ;;  %v7747_v58 = vld [vmem:[%s10521_s2 + $0x50] sm:$0x3] }
 0x604   :  { %9070 = vrcp.f32 %v1958_v57  ;;  %v7744_v57 = vld [vmem:[%s10521_s2 + $0x38] sm:$0xff] }
 0x605   :  { %9072 = vrcp.f32 %v1959_v59  ;;  %v9772_v59 = vpack.c.bf16 %v7740_v47, %v7737_v45 }
 0x60e   :  { %v9071_v60 = vpop.eup %9070 }
 0x60f   :  { %v1965_v62 = vmul.f32 %v9071_v60, %v1964_v3  ;;  %v9073_v1 = vpop.eup %9072  ;;  %v9774_v3 = vpack.c.bf16 %v7742_v51, %v7739_v49  ;;  %v7745_v60 = vld [vmem:[%s10521_s2 + $0x40] sm:$0xff] }
 0x610   :  { %v1968_v2 = vsub.f32 1.0, %v9073_v1  ;;  %v1970_v9 = vmul.f32 %v9073_v1, %v9654_v33  ;;  %v7748_v1 = vld [vmem:[%s10521_s2 + $0x58] sm:$0x3] }
 0x611   :  { %v1966_v0 = vadd.f32 %v1965_v62, %v1803_v61  ;;  %v7743_v62 = vld [vmem:[%s10521_s2 + $0x30] sm:$0xff] }
 0x613   :  { %9074 = vtanh.f32 %v1966_v0  ;;  %v7746_v0 = vld [vmem:[%s10521_s2 + $0x48] sm:$0x3] }
 0x61d   :  { %v9075_v5 = vpop.eup %9074 }
 0x61e   :  { %v1969_v6 = vmul.f32 %v9075_v5, %v1968_v2  ;;  %v9790_v2 = vpack.c.bf16 %v7747_v58, %v7744_v57  ;;  %v9802_v5 = vpack.c.bf16 %v7746_v0, %v7743_v62 }
 0x620   :  { %v9700_v10 = vadd.f32 %v1970_v9, %v1969_v6  ;;  %v9804_v6 = vpack.c.bf16 %v7748_v1, %v7745_v60 }
 0x622   :  { %7720 = vmatmul.mubr.msk.f32.vlgmr.msra.gmra.mrb[12].mxu0 %vm72_vm4, %v9700_v10  ;;  %8195 = vmatmul.mubr.msk.f32.vlgmr.msra.gmra.mrb[26].mxu1 %vm72_vm4, %v9700_v10 }
 0x623   :  { %8580 = vmatpush1.bf16.msk.msra.mxu0 %vm9326_vm2, %v9336_v7  ;;  %2355 = vmatprep.mubr.f32.mxu0 %v9281_v8  ;;  %v35_v7 = vld [vmem:[%s10519_s0 + $0x7] sm:$0x1] }
 0x624   :  { %8587 = vmatprep.subr.msk.bf16.mxu0 %vm9326_vm2, %v9351_v13  ;;  %8584 = vmatpush3.bf16.msk.msra.mxu1 %vm9326_vm2, %v9381_v23  ;;  %v2287_v13 = vrot.slane %v36_v14, 7  ;;  %v7738_v23 = vld [vmem:[%s10520_s1 + $0x38] sm:$0xff] }
 0x625   :  { %8201 = vmatprep.mubr.msk.f32.mxu1 %vm9283_vm5, %v9281_v8  ;;  %8591 = vmatprep.subr.bf16.mxu1 %v9282_v18 }
 0x626   :  { %v2288_v16 = vsel %vm70_vm3, %v2287_v13, %v35_v7 }
 0x627   :  { %7727 = vmatmul.mubr.msk.f32.vlgmr.msra.gmra.mrb[14].mxu0 %vm72_vm4, %v2288_v16  ;;  %8202 = vmatmul.mubr.msk.f32.vlgmr.msra.gmra.mrb[28].mxu1 %vm72_vm4, %v2288_v16 }
 0x628   :  { %8590 = vmatpush1.bf16.msk.msra.mxu0 %vm9326_vm2, %v9365_v17  ;;  %8594 = vmatpush3.bf16.msk.msra.mxu1 %vm9326_vm2, %v9389_v24  ;;  %v9744_v17 = vpack.c.bf16 %v7741_v19, %v7738_v23 }
 0x629   :  { %2499 = vmatprep.mubr.f32.mxu0 %v9281_v8  ;;  %8208 = vmatprep.mubr.msk.f32.mxu1 %vm9283_vm5, %v9281_v8 }
 0x62a   :  { %8601 = vmatprep.subr.bf16.mxu1 %v9282_v18  ;;  %8597 = vmatprep.subr.msk.bf16.mxu0 %vm9326_vm2, %v9744_v17 }
 0x6f5   :  { %v2188_v24 = vpop.f32.mrb[12].mxu0  ;;  %v2259_v20 = vpop.f32.mrb[26].mxu1 }
 0x6f6   :  { %v8927_v21 = vadd.f32 %v2188_v24, %v9451_v36  ;;  %v2190_v22 = vpop.f32.mrb[13].mxu0  ;;  %v8196_v25 = vpop.f32.mrb[27].mxu1  ;;  %v2277_v37 = vadd.f32 %v9463_v50, %v2259_v20  ;;  %v7749_v20 = vld [vmem:[%s10522_s3 + $0x3] sm:$0x7] }
 0x6f7   :  { %v8928_v27 = vadd.f32 %v2190_v22, %v9454_v39  ;;  %v9868_v25 = vrot.slane %v7749_v20, %v9443_v31 }
 0x6f8   :  { %v7723_v26 = vmul.f32 -1.442695, %v8927_v21 }
 0x6f9   :  { %v7724_v28 = vmul.f32 -1.442695, %v8928_v27  ;;  %v9873_v27 = vrot.slane %v7749_v20, %v9448_v34 }
 0x6fa   :  { %9076 = vpow2.f32 %v7723_v26 }
 0x6fb   :  { %9078 = vpow2.f32 %v7724_v28 }
 0x704   :  { %v9077_v29 = vpop.eup %9076 }
 0x705   :  { %v2271_v30 = vadd.f32 1.0, %v9077_v29  ;;  %v9079_v32 = vpop.eup %9078 }
 0x706   :  { %v2272_v35 = vadd.f32 1.0, %v9079_v32 }
 0x707   :  { %9080 = vrcp.f32 %v2271_v30 }
 0x708   :  { %9082 = vrcp.f32 %v2272_v35 }
 0x711   :  { %v9081_v38 = vpop.eup %9080 }
 0x712   :  { %v2278_v42 = vmul.f32 %v9081_v38, %v2277_v37  ;;  %v9083_v44 = vpop.eup %9082 }
 0x713   :  { %v2281_v46 = vsub.f32 1.0, %v9083_v44  ;;  %v2283_v55 = vmul.f32 %v9083_v44, %v9700_v10 }
 0x714   :  { %v2279_v43 = vadd.f32 %v2278_v42, %v2116_v40 }
 0x716   :  { %9084 = vtanh.f32 %v2279_v43 }
 0x720   :  { %v9085_v53 = vpop.eup %9084 }
 0x721   :  { %v2282_v54 = vmul.f32 %v9085_v53, %v2281_v46 }
 0x723   :  { %v9779_v61 = vadd.f32 %v2283_v55, %v2282_v54  ;;  %v9882_v54 = vld [vmem:[%s10523_s4 + $0x1] ss:$0 sm:$0xff]  ;;  %v9885_v55 = vrot.slane %v7749_v20, %v9458_v48 }
 0x725   :  { %7732 = vmatmul.mubr.msk.f32.vlgmr.msra.gmra.mrb[14].mxu0 %vm72_vm4, %v9779_v61  ;;  %8209 = vmatmul.mubr.msk.f32.vlgmr.msra.gmra.mrb[30].mxu1 %vm72_vm4, %v9779_v61 }
 0x726   :  { %8600 = vmatpush1.bf16.msk.msra.mxu0 %vm9326_vm2, %v9772_v59  ;;  %8604 = vmatpush3.bf16.msk.msra.mxu1 %vm9326_vm2, %v9774_v3 }
 0x727   :  { %2705 = vmatprep.mubr.f32.mxu0 %v9281_v8  ;;  %8215 = vmatprep.mubr.msk.f32.mxu1 %vm9283_vm5, %v9281_v8 }
 0x728   :  { %8607 = vmatprep.subr.msk.bf16.mxu0 %vm9326_vm2, %v9790_v2  ;;  %8611 = vmatprep.subr.bf16.mxu1 %v9282_v18 }
 0x729   :  { %7753 = vmatmul.mubr.msk.f32.vlgmr.msra.gmra.mrb[16].mxu0 %vm72_vm4, %v9470_v63  ;;  %8216 = vmatmul.mubr.msk.f32.vlgmr.msra.gmra.mrb[32].mxu1 %vm72_vm4, %v9470_v63  ;;  %v2428_v63 = vpop.f32.mrb[28].mxu1 }
 0x72a   :  { %8610 = vmatpush1.bf16.msk.msra.mxu0 %vm9326_vm2, %v9802_v5  ;;  %8614 = vmatpush3.bf16.msk.msra.mxu1 %vm9326_vm2, %v9804_v6  ;;  %v8203_v9 = vpop.f32.mrb[29].mxu1  ;;  %v2429_v47 = vadd.f32 %v2428_v63, %v9466_v52 }
 0x72b   :  { %8222 = vmatprep.mubr.msk.f32.mxu1 %vm9283_vm5, %v9281_v8  ;;  %8621 = vmatprep.subr.bf16.mxu1 %v9282_v18 }
 0x72c   :  { %2855 = vmatprep.mubr.f32.mxu0 %v9281_v8  ;;  %8617 = vmatprep.subr.msk.bf16.mxu0 %vm9326_vm2, %v9744_v17 }
 0x72d   :  { %8223 = vmatmul.mubr.f32.vlgmr.msra.gmra.mrb[34].mxu1 %v9281_v8 }
 0x72e   :  { %8624 = vmatpush3.bf16.msk.msra.mxu1 %vm9326_vm2, %v9774_v3  ;;  %8229 = vmatprep.mubr.msk.f32.mxu1 %vm9283_vm5, %v9281_v8 }
 0x72f   :  { %8631 = vmatprep.subr.bf16.mxu1 %v9282_v18 }
 0x731   :  { %2856 = vmatmul.mubr.f32.vlgmr.msra.gmra.mrb[16].mxu0 %v9281_v8  ;;  %8230 = vmatmul.mubr.msk.f32.vlgmr.msra.gmra.mrb[36].mxu1 %vm72_vm4, %v9516_v41 }
 0x732   :  { %8620 = vmatpush1.bf16.msk.msra.mxu0 %vm9326_vm2, %v9772_v59  ;;  %3024 = vmatprep.mubr.f32.mxu0 %v9281_v8 }
 0x733   :  { %8627 = vmatprep.subr.msk.bf16.mxu0 %vm9326_vm2, %v9790_v2  ;;  %8634 = vmatpush3.bf16.msk.msra.mxu1 %vm9326_vm2, %v9804_v6 }
 0x734   :  { %8236 = vmatprep.mubr.msk.f32.mxu1 %vm9283_vm5, %v9281_v8  ;;  %8641 = vmatprep.subr.bf16.mxu1 %v9282_v18 }
 0x735   :  { %7764 = vmatmul.mubr.msk.f32.vlgmr.msra.gmra.mrb[18].mxu0 %vm72_vm4, %v9516_v41 }
 0x736   :  { %8630 = vmatpush1.bf16.msk.msra.mxu0 %vm9326_vm2, %v9802_v5  ;;  %3168 = vmatprep.mubr.f32.mxu0 %v9281_v8 }
 0x737   :  { %8637 = vmatprep.subr.msk.bf16.mxu0 %vm9326_vm2, %v9744_v17 }
 0x7f8   :  { %v2501_v11 = vpop.f32.mrb[14].mxu0  ;;  %v2572_v12 = vpop.f32.mrb[30].mxu1 }
 0x7f9   :  { %v8929_v7 = vadd.f32 %v2501_v11, %v9451_v36  ;;  %v2503_v14 = vpop.f32.mrb[15].mxu0  ;;  %v8210_v13 = vpop.f32.mrb[31].mxu1  ;;  %v2590_v44 = vadd.f32 %v9463_v50, %v2572_v12 }
 0x7fa   :  { %v8930_v41 = vadd.f32 %v2503_v14, %v9454_v39 }
 0x7fb   :  { %v7735_v16 = vmul.f32 -1.442695, %v8929_v7 }
 0x7fc   :  { %v2778_v23 = vpop.f32.mrb[32].mxu1  ;;  %v7736_v24 = vmul.f32 -1.442695, %v8930_v41 }
 0x7fd   :  { %9086 = vpow2.f32 %v7735_v16  ;;  %v8217_v19 = vpop.f32.mrb[33].mxu1  ;;  %v2779_v52 = vadd.f32 %v2778_v23, %v9885_v55 }
 0x7fe   :  { %9088 = vpow2.f32 %v7736_v24 }
 0x800   :  { %v2928_v21 = vpop.f32.mrb[34].mxu1 }
 0x801   :  { %v8224_v22 = vpop.f32.mrb[35].mxu1  ;;  %v2952_v50 = vadd.f32 %v9882_v54, %v2928_v21 }
 0x804   :  { %v2857_v36 = vpop.f32.mrb[16].mxu0  ;;  %v9870_v26 = vpop.f32.mrb[36].mxu1 }
 0x805   :  { %v8931_v39 = vadd.f32 %v2857_v36, %v9868_v25  ;;  %v2859_v28 = vpop.f32.mrb[17].mxu0  ;;  %v8231_v29 = vpop.f32.mrb[37].mxu1 }
 0x806   :  { %v8932_v37 = vadd.f32 %v2859_v28, %v9873_v27 }
 0x807   :  { %v9087_v30 = vpop.eup %9086  ;;  %v7759_v32 = vmul.f32 -1.442695, %v8931_v39 }
 0x808   :  { %v2584_v35 = vadd.f32 1.0, %v9087_v30  ;;  %v7760_v38 = vmul.f32 -1.442695, %v8932_v37  ;;  %v9089_v40 = vpop.eup %9088 }
 0x809   :  { %9090 = vpow2.f32 %v7759_v32  ;;  %v2585_v42 = vadd.f32 1.0, %v9089_v40 }
 0x80a   :  { %9092 = vrcp.f32 %v2584_v35 }
 0x80b   :  { %9094 = vpow2.f32 %v7760_v38 }
 0x80c   :  { %9096 = vrcp.f32 %v2585_v42  ;;  %v3098_v42 = vadd.f32 %v9870_v26, %v9885_v55 }
 0x813   :  { %v9091_v43 = vpop.eup %9090 }
 0x814   :  { %v9093_v45 = vpop.eup %9092  ;;  %v2940_v46 = vadd.f32 1.0, %v9091_v43 }
 0x815   :  { %v2591_v49 = vmul.f32 %v9093_v45, %v2590_v44  ;;  %v9095_v53 = vpop.eup %9094 }
 0x816   :  { %9098 = vrcp.f32 %v2940_v46  ;;  %v2941_v57 = vadd.f32 1.0, %v9095_v53  ;;  %v9097_v58 = vpop.eup %9096 }
 0x817   :  { %v2592_v51 = vadd.f32 %v2591_v49, %v2429_v47  ;;  %v2594_v0 = vsub.f32 1.0, %v9097_v58  ;;  %v2596_v11 = vmul.f32 %v9097_v58, %v9779_v61 }
 0x819   :  { %9100 = vtanh.f32 %v2592_v51 }
 0x81a   :  { %9102 = vrcp.f32 %v2941_v57 }
 0x820   :  { %v9099_v60 = vpop.eup %9098 }
 0x821   :  { %v2953_v62 = vmul.f32 %v9099_v60, %v2952_v50 }
 0x823   :  { %v9101_v1 = vpop.eup %9100  ;;  %v2954_v63 = vadd.f32 %v2953_v62, %v2779_v52 }
 0x824   :  { %v2595_v9 = vmul.f32 %v9101_v1, %v2594_v0  ;;  %v9103_v7 = vpop.eup %9102 }
 0x825   :  { %9104 = vtanh.f32 %v2954_v63  ;;  %v2956_v14 = vsub.f32 1.0, %v9103_v7  ;;  %v2958_v41 = vmul.f32 0.0, %v9103_v7 }
 0x826   :  { %v9890_v12 = vadd.f32 %v2596_v11, %v2595_v9 }
 0x82f   :  { %v9105_v13 = vpop.eup %9104 }
 0x830   :  { %v2957_v16 = vmul.f32 %v9105_v13, %v2956_v14 }
 0x832   :  { %v9892_v19 = vadd.f32 %v2958_v41, %v2957_v16 }
 0x834   :  { %7769 = vmatmul.mubr.msk.f32.vlgmr.msra.gmra.mrb[18].mxu0 %vm72_vm4, %v9892_v19  ;;  %8237 = vmatmul.mubr.msk.f32.vlgmr.msra.gmra.mrb[38].mxu1 %vm72_vm4, %v9892_v19 }
 0x835   :  { %8640 = vmatpush1.bf16.msk.msra.mxu0 %vm9326_vm2, %v9772_v59  ;;  %8644 = vmatpush3.bf16.msk.msra.mxu1 %vm9326_vm2, %v9774_v3 }
 0x836   :  { %3331 = vmatprep.mubr.f32.mxu0 %v9281_v8  ;;  %8243 = vmatprep.mubr.msk.f32.mxu1 %vm9283_vm5, %v9281_v8 }
 0x837   :  { %8647 = vmatprep.subr.msk.bf16.mxu0 %vm9326_vm2, %v9790_v2  ;;  %8651 = vmatprep.subr.bf16.mxu1 %v9282_v18 }
 0x838   :  { %7776 = vmatmul.mubr.msk.f32.vlgmr.msra.gmra.mrb[20].mxu0 %vm72_vm4, %v9562_v15  ;;  %8244 = vmatmul.mubr.msk.f32.vlgmr.msra.gmra.mrb[40].mxu1 %vm72_vm4, %v9562_v15 }
 0x839   :  { %8650 = vmatpush1.bf16.msk.msra.mxu0 %vm9326_vm2, %v9802_v5  ;;  %8654 = vmatpush3.bf16.msk.msra.mxu1 %vm9326_vm2, %v9804_v6 }
 0x83a   :  { %3475 = vmatprep.mubr.f32.mxu0 %v9281_v8  ;;  %8250 = vmatprep.mubr.msk.f32.mxu1 %vm9283_vm5, %v9281_v8 }
 0x83b   :  { %8657 = vmatprep.subr.msk.bf16.mxu0 %vm9326_vm2, %v9744_v17  ;;  %8661 = vmatprep.subr.bf16.mxu1 %v9282_v18 }
 0x907   :  { %v3170_v15 = vpop.f32.mrb[18].mxu0  ;;  %v3241_v23 = vpop.f32.mrb[38].mxu1 }
 0x908   :  { %v8933_v24 = vadd.f32 %v3170_v15, %v9868_v25  ;;  %v3172_v20 = vpop.f32.mrb[19].mxu0  ;;  %v8238_v21 = vpop.f32.mrb[39].mxu1  ;;  %v3259_v38 = vadd.f32 %v9882_v54, %v3241_v23 }
 0x909   :  { %v8934_v36 = vadd.f32 %v3172_v20, %v9873_v27 }
 0x90a   :  { %v7772_v22 = vmul.f32 -1.442695, %v8933_v24 }
 0x90b   :  { %v3404_v39 = vpop.f32.mrb[40].mxu1  ;;  %v7773_v29 = vmul.f32 -1.442695, %v8934_v36 }
 0x90c   :  { %9106 = vpow2.f32 %v7772_v22  ;;  %v8245_v28 = vpop.f32.mrb[41].mxu1  ;;  %v3405_v16 = vadd.f32 %v3404_v39, %v9885_v55 }
 0x90d   :  { %9108 = vpow2.f32 %v7773_v29 }
 0x916   :  { %v9107_v30 = vpop.eup %9106 }
 0x917   :  { %v3253_v32 = vadd.f32 1.0, %v9107_v30  ;;  %v9109_v35 = vpop.eup %9108 }
 0x918   :  { %v3254_v37 = vadd.f32 1.0, %v9109_v35 }
 0x919   :  { %9110 = vrcp.f32 %v3253_v32 }
 0x91a   :  { %9112 = vrcp.f32 %v3254_v37 }
 0x923   :  { %v9111_v40 = vpop.eup %9110 }
 0x924   :  { %v3260_v43 = vmul.f32 %v9111_v40, %v3259_v38  ;;  %v9113_v45 = vpop.eup %9112 }
 0x925   :  { %v3263_v46 = vsub.f32 1.0, %v9113_v45  ;;  %v3265_v51 = vmul.f32 %v9113_v45, %v9892_v19 }
 0x926   :  { %v3261_v44 = vadd.f32 %v3260_v43, %v3098_v42 }
 0x928   :  { %9114 = vtanh.f32 %v3261_v44 }
 0x932   :  { %v9115_v47 = vpop.eup %9114 }
 0x933   :  { %v3264_v49 = vmul.f32 %v9115_v47, %v3263_v46 }
 0x935   :  { %v9934_v53 = vadd.f32 %v3265_v51, %v3264_v49 }
 0x937   :  { %7781 = vmatmul.mubr.msk.f32.vlgmr.msra.gmra.mrb[20].mxu0 %vm72_vm4, %v9934_v53  ;;  %8251 = vmatmul.mubr.msk.f32.vlgmr.msra.gmra.mrb[42].mxu1 %vm72_vm4, %v9934_v53 }
 0x938   :  { %8660 = vmatpush1.bf16.msk.msra.mxu0 %vm9326_vm2, %v9772_v59  ;;  %8664 = vmatpush3.bf16.msk.msra.mxu1 %vm9326_vm2, %v9774_v3 }
 0x939   :  { %3638 = vmatprep.mubr.f32.mxu0 %v9281_v8  ;;  %8257 = vmatprep.mubr.msk.f32.mxu1 %vm9283_vm5, %v9281_v8 }
 0x93a   :  { %8667 = vmatprep.subr.msk.bf16.mxu0 %vm9326_vm2, %v9790_v2  ;;  %8671 = vmatprep.subr.bf16.mxu1 %v9282_v18 }
 0x93b   :  { %7788 = vmatmul.mubr.msk.f32.vlgmr.msra.gmra.mrb[22].mxu0 %vm72_vm4, %v9608_v56  ;;  %8258 = vmatmul.mubr.msk.f32.vlgmr.msra.gmra.mrb[44].mxu1 %vm72_vm4, %v9608_v56 }
 0x93c   :  { %8670 = vmatpush1.bf16.msk.msra.mxu0 %vm9326_vm2, %v9802_v5  ;;  %8674 = vmatpush3.bf16.msk.msra.mxu1 %vm9326_vm2, %v9804_v6 }
 0x93d   :  { %3782 = vmatprep.mubr.f32.mxu0 %v9281_v8  ;;  %8264 = vmatprep.mubr.msk.f32.mxu1 %vm9283_vm5, %v9281_v8 }
 0x93e   :  { %8677 = vmatprep.subr.msk.bf16.mxu0 %vm9326_vm2, %v9744_v17  ;;  %8681 = vmatprep.subr.bf16.mxu1 %v9282_v18 }
 0xa0a   :  { %v3477_v56 = vpop.f32.mrb[20].mxu0  ;;  %v3548_v26 = vpop.f32.mrb[42].mxu1 }
 0xa0b   :  { %v8935_v50 = vadd.f32 %v3477_v56, %v9868_v25  ;;  %v3479_v57 = vpop.f32.mrb[21].mxu0  ;;  %v8252_v58 = vpop.f32.mrb[43].mxu1  ;;  %v3566_v14 = vadd.f32 %v9882_v54, %v3548_v26 }
 0xa0c   :  { %v8936_v52 = vadd.f32 %v3479_v57, %v9873_v27 }
 0xa0d   :  { %v7784_v60 = vmul.f32 -1.442695, %v8935_v50 }
 0xa0e   :  { %v3711_v62 = vpop.f32.mrb[44].mxu1  ;;  %v7785_v1 = vmul.f32 -1.442695, %v8936_v52 }
 0xa0f   :  { %9116 = vpow2.f32 %v7784_v60  ;;  %v8259_v0 = vpop.f32.mrb[45].mxu1  ;;  %v3712_v49 = vadd.f32 %v3711_v62, %v9885_v55 }
 0xa10   :  { %9118 = vpow2.f32 %v7785_v1 }
 0xa19   :  { %v9117_v63 = vpop.eup %9116 }
 0xa1a   :  { %v3560_v9 = vadd.f32 1.0, %v9117_v63  ;;  %v9119_v11 = vpop.eup %9118 }
 0xa1b   :  { %v3561_v7 = vadd.f32 1.0, %v9119_v11 }
 0xa1c   :  { %9120 = vrcp.f32 %v3560_v9 }
 0xa1d   :  { %9122 = vrcp.f32 %v3561_v7 }
 0xa26   :  { %v9121_v13 = vpop.eup %9120 }
 0xa27   :  { %v3567_v41 = vmul.f32 %v9121_v13, %v3566_v14  ;;  %v9123_v23 = vpop.eup %9122 }
 0xa28   :  { %v3570_v24 = vsub.f32 1.0, %v9123_v23  ;;  %v3572_v22 = vmul.f32 %v9123_v23, %v9934_v53 }
 0xa29   :  { %v3568_v15 = vadd.f32 %v3567_v41, %v3405_v16 }
 0xa2b   :  { %9124 = vtanh.f32 %v3568_v15 }
 0xa35   :  { %v9125_v20 = vpop.eup %9124 }
 0xa36   :  { %v3571_v21 = vmul.f32 %v9125_v20, %v3570_v24 }
 0xa38   :  { %v9975_v36 = vadd.f32 %v3572_v22, %v3571_v21 }
 0xa3a   :  { %7793 = vmatmul.mubr.msk.f32.vlgmr.msra.gmra.mrb[22].mxu0 %vm72_vm4, %v9975_v36  ;;  %8265 = vmatmul.mubr.msk.f32.vlgmr.msra.gmra.mrb[46].mxu1 %vm72_vm4, %v9975_v36 }
 0xa3b   :  { %8680 = vmatpush1.bf16.msk.msra.mxu0 %vm9326_vm2, %v9772_v59  ;;  %8684 = vmatpush3.bf16.msk.msra.mxu1 %vm9326_vm2, %v9774_v3 }
 0xa3c   :  { %3945 = vmatprep.mubr.f32.mxu0 %v9281_v8  ;;  %8271 = vmatprep.mubr.msk.f32.mxu1 %vm9283_vm5, %v9281_v8 }
 0xa3d   :  { %8687 = vmatprep.subr.msk.bf16.mxu0 %vm9326_vm2, %v9790_v2  ;;  %8691 = vmatprep.subr.bf16.mxu1 %v9282_v18 }
 0xa3e   :  { %7800 = vmatmul.mubr.msk.f32.vlgmr.msra.gmra.mrb[24].mxu0 %vm72_vm4, %v9654_v33  ;;  %8272 = vmatmul.mubr.msk.f32.vlgmr.msra.gmra.mrb[48].mxu1 %vm72_vm4, %v9654_v33 }
 0xa3f   :  { %8690 = vmatpush1.bf16.msk.msra.mxu0 %vm9326_vm2, %v9802_v5  ;;  %8694 = vmatpush3.bf16.msk.msra.mxu1 %vm9326_vm2, %v9804_v6 }
 0xa40   :  { %4089 = vmatprep.mubr.f32.mxu0 %v9281_v8  ;;  %8278 = vmatprep.mubr.msk.f32.mxu1 %vm9283_vm5, %v9281_v8 }
 0xa41   :  { %8697 = vmatprep.subr.msk.bf16.mxu0 %vm9326_vm2, %v9744_v17  ;;  %8701 = vmatprep.subr.bf16.mxu1 %v9282_v18 }
 0xb0d   :  { %v3784_v33 = vpop.f32.mrb[22].mxu0  ;;  %v3855_v39 = vpop.f32.mrb[46].mxu1 }
 0xb0e   :  { %v8937_v28 = vadd.f32 %v3784_v33, %v9868_v25  ;;  %v3786_v29 = vpop.f32.mrb[23].mxu0  ;;  %v8266_v30 = vpop.f32.mrb[47].mxu1  ;;  %v3873_v46 = vadd.f32 %v9882_v54, %v3855_v39 }
 0xb0f   :  { %v8938_v35 = vadd.f32 %v3786_v29, %v9873_v27 }
 0xb10   :  { %v7796_v32 = vmul.f32 -1.442695, %v8937_v28 }
 0xb11   :  { %v4018_v37 = vpop.f32.mrb[48].mxu1  ;;  %v7797_v40 = vmul.f32 -1.442695, %v8938_v35 }
 0xb12   :  { %9126 = vpow2.f32 %v7796_v32  ;;  %v8273_v38 = vpop.f32.mrb[49].mxu1  ;;  %v4019_v21 = vadd.f32 %v4018_v37, %v9885_v55 }
 0xb13   :  { %9128 = vpow2.f32 %v7797_v40 }
 0xb1c   :  { %v9127_v42 = vpop.eup %9126 }
 0xb1d   :  { %v3867_v43 = vadd.f32 1.0, %v9127_v42  ;;  %v9129_v44 = vpop.eup %9128 }
 0xb1e   :  { %v3868_v45 = vadd.f32 1.0, %v9129_v44 }
 0xb1f   :  { %9130 = vrcp.f32 %v3867_v43 }
 0xb20   :  { %9132 = vrcp.f32 %v3868_v45 }
 0xb29   :  { %v9131_v47 = vpop.eup %9130 }
 0xb2a   :  { %v3874_v51 = vmul.f32 %v9131_v47, %v3873_v46  ;;  %v9133_v26 = vpop.eup %9132 }
 0xb2b   :  { %v3877_v50 = vsub.f32 1.0, %v9133_v26  ;;  %v3879_v60 = vmul.f32 %v9133_v26, %v9975_v36 }
 0xb2c   :  { %v3875_v56 = vadd.f32 %v3874_v51, %v3712_v49 }
 0xb2e   :  { %9134 = vtanh.f32 %v3875_v56 }
 0xb38   :  { %v9135_v57 = vpop.eup %9134 }
 0xb39   :  { %v3878_v58 = vmul.f32 %v9135_v57, %v3877_v50 }
 0xb3b   :  { %v10016_v52 = vadd.f32 %v3879_v60, %v3878_v58 }
 0xb3d   :  { %7805 = vmatmul.mubr.msk.f32.vlgmr.msra.gmra.mrb[24].mxu0 %vm72_vm4, %v10016_v52  ;;  %8279 = vmatmul.mubr.msk.f32.vlgmr.msra.gmra.mrb[50].mxu1 %vm72_vm4, %v10016_v52 }
 0xb3e   :  { %8700 = vmatpush1.bf16.msk.msra.mxu0 %vm9326_vm2, %v9772_v59  ;;  %8704 = vmatpush3.bf16.msk.msra.mxu1 %vm9326_vm2, %v9774_v3 }
 0xb3f   :  { %4252 = vmatprep.mubr.f32.mxu0 %v9281_v8  ;;  %8285 = vmatprep.mubr.msk.f32.mxu1 %vm9283_vm5, %v9281_v8 }
 0xb40   :  { %8707 = vmatprep.subr.msk.bf16.mxu0 %vm9326_vm2, %v9790_v2  ;;  %8711 = vmatprep.subr.bf16.mxu1 %v9282_v18 }
 0xb41   :  { %7812 = vmatmul.mubr.msk.f32.vlgmr.msra.gmra.mrb[26].mxu0 %vm72_vm4, %v9700_v10  ;;  %8286 = vmatmul.mubr.msk.f32.vlgmr.msra.gmra.mrb[52].mxu1 %vm72_vm4, %v9700_v10 }
 0xb42   :  { %8710 = vmatpush1.bf16.msk.msra.mxu0 %vm9326_vm2, %v9802_v5  ;;  %8714 = vmatpush3.bf16.msk.msra.mxu1 %vm9326_vm2, %v9804_v6 }
 0xb43   :  { %4396 = vmatprep.mubr.f32.mxu0 %v9281_v8  ;;  %8292 = vmatprep.mubr.msk.f32.mxu1 %vm9283_vm5, %v9281_v8 }
 0xb44   :  { %8717 = vmatprep.subr.msk.bf16.mxu0 %vm9326_vm2, %v9744_v17  ;;  %8721 = vmatprep.subr.bf16.mxu1 %v9282_v18 }
 0xc10   :  { %v4091_v10 = vpop.f32.mrb[24].mxu0  ;;  %v4162_v62 = vpop.f32.mrb[50].mxu1 }
 0xc11   :  { %v8939_v0 = vadd.f32 %v4091_v10, %v9868_v25  ;;  %v4093_v1 = vpop.f32.mrb[25].mxu0  ;;  %v8280_v63 = vpop.f32.mrb[51].mxu1  ;;  %v4180_v24 = vadd.f32 %v9882_v54, %v4162_v62 }
 0xc12   :  { %v8940_v11 = vadd.f32 %v4093_v1, %v9873_v27 }
 0xc13   :  { %v7808_v9 = vmul.f32 -1.442695, %v8939_v0 }
 0xc14   :  { %v4325_v7 = vpop.f32.mrb[52].mxu1  ;;  %v7809_v13 = vmul.f32 -1.442695, %v8940_v11 }
 0xc15   :  { %9136 = vpow2.f32 %v7808_v9  ;;  %v8287_v14 = vpop.f32.mrb[53].mxu1  ;;  %v4326_v57 = vadd.f32 %v4325_v7, %v9885_v55 }
 0xc16   :  { %9138 = vpow2.f32 %v7809_v13 }
 0xc1f   :  { %v9137_v16 = vpop.eup %9136 }
 0xc20   :  { %v4174_v41 = vadd.f32 1.0, %v9137_v16  ;;  %v9139_v15 = vpop.eup %9138 }
 0xc21   :  { %v4175_v23 = vadd.f32 1.0, %v9139_v15 }
 0xc22   :  { %9140 = vrcp.f32 %v4174_v41 }
 0xc23   :  { %9142 = vrcp.f32 %v4175_v23 }
 0xc2c   :  { %v9141_v20 = vpop.eup %9140 }
 0xc2d   :  { %v4181_v22 = vmul.f32 %v9141_v20, %v4180_v24  ;;  %v9143_v39 = vpop.eup %9142 }
 0xc2e   :  { %v4184_v28 = vsub.f32 1.0, %v9143_v39  ;;  %v4186_v32 = vmul.f32 %v9143_v39, %v10016_v52 }
 0xc2f   :  { %v4182_v33 = vadd.f32 %v4181_v22, %v4019_v21 }
 0xc31   :  { %9144 = vtanh.f32 %v4182_v33 }
 0xc3b   :  { %v9145_v29 = vpop.eup %9144 }
 0xc3c   :  { %v4185_v30 = vmul.f32 %v9145_v29, %v4184_v28 }
 0xc3e   :  { %v10057_v35 = vadd.f32 %v4186_v32, %v4185_v30  ;;  %v7846_v32 = vld [vmem:[%s10520_s1 + $0x60] sm:$0xff] }
 0xc40   :  { %7817 = vmatmul.mubr.msk.f32.vlgmr.msra.gmra.mrb[26].mxu0 %vm72_vm4, %v10057_v35  ;;  %8293 = vmatmul.mubr.msk.f32.vlgmr.msra.gmra.mrb[54].mxu1 %vm72_vm4, %v10057_v35 }
 0xc41   :  { %8720 = vmatpush1.bf16.msk.msra.mxu0 %vm9326_vm2, %v9772_v59  ;;  %8724 = vmatpush3.bf16.msk.msra.mxu1 %vm9326_vm2, %v9774_v3 }
 0xc42   :  { %4559 = vmatprep.mubr.f32.mxu0 %v9281_v8  ;;  %8299 = vmatprep.mubr.msk.f32.mxu1 %vm9283_vm5, %v9281_v8 }
 0xc43   :  { %8727 = vmatprep.subr.msk.bf16.mxu0 %vm9326_vm2, %v9790_v2  ;;  %8731 = vmatprep.subr.bf16.mxu1 %v9282_v18 }
 0xc44   :  { %7824 = vmatmul.mubr.msk.f32.vlgmr.msra.gmra.mrb[28].mxu0 %vm72_vm4, %v9779_v61  ;;  %8300 = vmatmul.mubr.msk.f32.vlgmr.msra.gmra.mrb[56].mxu1 %vm72_vm4, %v9779_v61 }
 0xc45   :  { %8730 = vmatpush1.bf16.msk.msra.mxu0 %vm9326_vm2, %v9802_v5  ;;  %8734 = vmatpush3.bf16.msk.msra.mxu1 %vm9326_vm2, %v9804_v6 }
 0xc46   :  { %4703 = vmatprep.mubr.f32.mxu0 %v9281_v8  ;;  %8306 = vmatprep.mubr.msk.f32.mxu1 %vm9283_vm5, %v9281_v8 }
 0xc47   :  { %8737 = vmatprep.subr.msk.bf16.mxu0 %vm9326_vm2, %v9744_v17  ;;  %8741 = vmatprep.subr.bf16.mxu1 %v9282_v18 }
 0xd13   :  { %v4398_v61 = vpop.f32.mrb[26].mxu0  ;;  %v4469_v37 = vpop.f32.mrb[54].mxu1 }
 0xd14   :  { %v8941_v38 = vadd.f32 %v4398_v61, %v9868_v25  ;;  %v4400_v40 = vpop.f32.mrb[27].mxu0  ;;  %v8294_v42 = vpop.f32.mrb[55].mxu1  ;;  %v4487_v26 = vadd.f32 %v9882_v54, %v4469_v37  ;;  %v7849_v37 = vld [vmem:[%s10520_s1 + $0x78] sm:$0x3] }
 0xd15   :  { %v8942_v44 = vadd.f32 %v4400_v40, %v9873_v27  ;;  %v7851_v40 = vld [vmem:[%s10520_s1 + $0x88] sm:$0x3] }
 0xd16   :  { %v7820_v43 = vmul.f32 -1.442695, %v8941_v38  ;;  %v7848_v38 = vld [vmem:[%s10520_s1 + $0x70] sm:$0xff] }
 0xd17   :  { %v4632_v45 = vpop.f32.mrb[56].mxu1  ;;  %v7821_v47 = vmul.f32 -1.442695, %v8942_v44 }
 0xd18   :  { %9146 = vpow2.f32 %v7820_v43  ;;  %v8301_v46 = vpop.f32.mrb[57].mxu1  ;;  %v4633_v39 = vadd.f32 %v4632_v45, %v9885_v55  ;;  %v7853_v45 = vld [vmem:[%s10521_s2 + $0x68] sm:$0xff] }
 0xd19   :  { %9148 = vpow2.f32 %v7821_v47  ;;  %v7856_v46 = vld [vmem:[%s10521_s2 + $0x80] sm:$0x3]  ;;  %v10167_v47 = vpack.c.bf16 %v7849_v37, %v7846_v32 }
 0xd22   :  { %v9147_v49 = vpop.eup %9146 }
 0xd23   :  { %v4481_v51 = vadd.f32 1.0, %v9147_v49  ;;  %v9149_v17 = vpop.eup %9148  ;;  %v10169_v49 = vpack.c.bf16 %v7851_v40, %v7848_v38  ;;  %v10278_v38 = vld [vmem:[%s10523_s4 + $0x2] ss:$0 sm:$0xff]  ;;  %s9284_s4 = smov [#allocation2]  }
 0xd24   :  { %v4482_v56 = vadd.f32 1.0, %v9149_v17  ;;  %s7634_s28 = sshll.u32 %s9284_s4, 4  ;;  %s7635_s28 = int_to_ptr.vmem [resolvable:$true] %s7634_s28 }
 0xd25   :  { %9150 = vrcp.f32 %v4481_v51  ;;  %v7852_v51 = vld [vmem:[%s10521_s2 + $0x60] sm:$0xff]  ;;  %s9256_s29 = scalar_lea.vmem %s7635_s28, 32  ;;  %p9261_p1 = scmp.lt.s32.totalorder %s7635_s28, %s7635_s28 }
 0xd26   :  { %9152 = vrcp.f32 %v4482_v56  ;;  %v7855_v56 = vld [vmem:[%s10521_s2 + $0x78] sm:$0x3]  ;;  %p9257_p0 = scmp.ne.s32.totalorder %s7635_s28, %s9256_s29  ;;  %p9262_p2 = scmp.lt.s32.totalorder %s9256_s29, %s9256_s29 }
 0xd28   :  { %p9263_p3 = por %p9262_p2, %p9261_p1 }
 0xd2a   :  { %p9264_p4 = pnand %p9263_p3, %p9257_p0 }
 0xd2f   :  { %v9151_v50 = vpop.eup %9150 }
 0xd30   :  { %v4488_v58 = vmul.f32 %v9151_v50, %v4487_v26  ;;  %v9153_v10 = vpop.eup %9152  ;;  %v7854_v26 = vld [vmem:[%s10521_s2 + $0x70] sm:$0xff]  ;;  %v7857_v50 = vld [vmem:[%s10521_s2 + $0x88] sm:$0x3] }
 0xd31   :  { %v4491_v62 = vsub.f32 1.0, %v9153_v10  ;;  %v4493_v63 = vmul.f32 %v9153_v10, %v10057_v35 }
 0xd32   :  { %v4489_v60 = vadd.f32 %v4488_v58, %v4326_v57  ;;  %v10185_v57 = vpack.c.bf16 %v7856_v46, %v7853_v45  ;;  %v10197_v58 = vpack.c.bf16 %v7855_v56, %v7852_v51 }
 0xd34   :  { %9154 = vtanh.f32 %v4489_v60  ;;  %v10199_v60 = vpack.c.bf16 %v7857_v50, %v7854_v26 }
 0xd3e   :  { %v9155_v0 = vpop.eup %9154 }
 0xd3f   :  { %v4492_v1 = vmul.f32 %v9155_v0, %v4491_v62 }
 0xd41   :  { %v10098_v9 = vadd.f32 %v4493_v63, %v4492_v1 }
 0xd43   :  { %7829 = vmatmul.mubr.msk.f32.vlgmr.msra.gmra.mrb[28].mxu0 %vm72_vm4, %v10098_v9  ;;  %8307 = vmatmul.mubr.msk.f32.vlgmr.msra.gmra.mrb[58].mxu1 %vm72_vm4, %v10098_v9 }
 0xd44   :  { %8740 = vmatpush1.bf16.msk.msra.mxu0 %vm9326_vm2, %v9772_v59  ;;  %8744 = vmatpush3.bf16.msk.msra.mxu1 %vm9326_vm2, %v9774_v3  ;;  %v7847_v59 = vld [vmem:[%s10520_s1 + $0x68] sm:$0xff]  ;;  %v7850_v3 = vld [vmem:[%s10520_s1 + $0x80] sm:$0x3] }
 0xd45   :  { %4869 = vmatprep.mubr.f32.mxu0 %v9281_v8  ;;  %8313 = vmatprep.mubr.msk.f32.mxu1 %vm9283_vm5, %v9281_v8 }
 0xd46   :  { %8747 = vmatprep.subr.msk.bf16.mxu0 %vm9326_vm2, %v9790_v2  ;;  %8751 = vmatprep.subr.bf16.mxu1 %v9282_v18  ;;  %v10137_v2 = vpack.c.bf16 %v7850_v3, %v7847_v59 }
 0xd47   :  { %7836 = vmatmul.mubr.msk.f32.vlgmr.msra.gmra.mrb[30].mxu0 %vm72_vm4, %v9890_v12  ;;  %8314 = vmatmul.mubr.msk.f32.vlgmr.msra.gmra.mrb[60].mxu1 %vm72_vm4, %v9890_v12 }
 0xd48   :  { %8750 = vmatpush1.bf16.msk.msra.mxu0 %vm9326_vm2, %v9802_v5  ;;  %8754 = vmatpush3.bf16.msk.msra.mxu1 %vm9326_vm2, %v9804_v6 }
 0xd49   :  { %5013 = vmatprep.mubr.f32.mxu0 %v9281_v8  ;;  %8320 = vmatprep.mubr.msk.f32.mxu1 %vm9283_vm5, %v9281_v8 }
 0xd4a   :  { %8761 = vmatprep.subr.bf16.mxu1 %v9282_v18  ;;  %8757 = vmatprep.subr.msk.bf16.mxu0 %vm9326_vm2, %v10137_v2 }
 0xe16   :  { %v4705_v5 = vpop.f32.mrb[28].mxu0  ;;  %v4776_v6 = vpop.f32.mrb[58].mxu1 }
 0xe17   :  { %v8943_v12 = vadd.f32 %v4705_v5, %v9868_v25  ;;  %v4707_v11 = vpop.f32.mrb[29].mxu0  ;;  %v8308_v7 = vpop.f32.mrb[59].mxu1  ;;  %v4794_v22 = vadd.f32 %v9882_v54, %v4776_v6  ;;  %v7858_v6 = vld [vmem:[%s10522_s3 + $0x6] sm:$0x7] }
 0xe18   :  { %v8944_v13 = vadd.f32 %v4707_v11, %v9873_v27  ;;  %v10263_v7 = vrot.slane %v7858_v6, %v9443_v31  ;;  %v10281_v40 = vrot.slane %v7858_v6, %v9458_v48 }
 0xe19   :  { %v7832_v14 = vmul.f32 -1.442695, %v8943_v12 }
 0xe1a   :  { %v10144_v16 = vpop.f32.mrb[60].mxu1  ;;  %v7833_v15 = vmul.f32 -1.442695, %v8944_v13  ;;  %v10268_v13 = vrot.slane %v7858_v6, %v9448_v34 }
 0xe1b   :  { %9156 = vpow2.f32 %v7832_v14  ;;  %v8315_v41 = vpop.f32.mrb[61].mxu1 }
 0xe1c   :  { %9158 = vpow2.f32 %v7833_v15 }
 0xe25   :  { %v9157_v23 = vpop.eup %9156 }
 0xe26   :  { %v4788_v24 = vadd.f32 1.0, %v9157_v23  ;;  %v9159_v20 = vpop.eup %9158 }
 0xe27   :  { %v4789_v21 = vadd.f32 1.0, %v9159_v20 }
 0xe28   :  { %9160 = vrcp.f32 %v4788_v24 }
 0xe29   :  { %9162 = vrcp.f32 %v4789_v21 }
 0xe32   :  { %v9161_v33 = vpop.eup %9160 }
 0xe33   :  { %v4795_v28 = vmul.f32 %v9161_v33, %v4794_v22  ;;  %v9163_v30 = vpop.eup %9162 }
 0xe34   :  { %v4798_v61 = vsub.f32 1.0, %v9163_v30  ;;  %v4800_v44 = vmul.f32 %v9163_v30, %v10098_v9  ;;  %v4943_v30 = vadd.f32 %v10144_v16, %v9885_v55 }
 0xe35   :  { %v4796_v29 = vadd.f32 %v4795_v28, %v4633_v39 }
 0xe37   :  { %9164 = vtanh.f32 %v4796_v29 }
 0xe41   :  { %v9165_v42 = vpop.eup %9164 }
 0xe42   :  { %v4799_v43 = vmul.f32 %v9165_v42, %v4798_v61 }
 0xe44   :  { %v10174_v17 = vadd.f32 %v4800_v44, %v4799_v43 }
 0xe46   :  { %7841 = vmatmul.mubr.msk.f32.vlgmr.msra.gmra.mrb[30].mxu0 %vm72_vm4, %v10174_v17  ;;  %8321 = vmatmul.mubr.msk.f32.vlgmr.msra.gmra.mrb[62].mxu1 %vm72_vm4, %v10174_v17 }
 0xe47   :  { %8760 = vmatpush1.bf16.msk.msra.mxu0 %vm9326_vm2, %v10167_v47  ;;  %8764 = vmatpush3.bf16.msk.msra.mxu1 %vm9326_vm2, %v10169_v49 }
 0xe48   :  { %5219 = vmatprep.mubr.f32.mxu0 %v9281_v8  ;;  %8327 = vmatprep.mubr.msk.f32.mxu1 %vm9283_vm5, %v9281_v8 }
 0xe49   :  { %8767 = vmatprep.subr.msk.bf16.mxu0 %vm9326_vm2, %v10185_v57  ;;  %8771 = vmatprep.subr.bf16.mxu1 %v9282_v18 }
 0xe4a   :  { %7862 = vmatmul.mubr.msk.f32.vlgmr.msra.gmra.mrb[32].mxu0 %vm72_vm4, %v9892_v19  ;;  %8328 = vmatmul.mubr.msk.f32.vlgmr.msra.gmra.mrb[64].mxu1 %vm72_vm4, %v9892_v19 }
 0xe4b   :  { %8770 = vmatpush1.bf16.msk.msra.mxu0 %vm9326_vm2, %v10197_v58  ;;  %8774 = vmatpush3.bf16.msk.msra.mxu1 %vm9326_vm2, %v10199_v60 }
 0xe4c   :  { %8334 = vmatprep.mubr.msk.f32.mxu1 %vm9283_vm5, %v9281_v8  ;;  %8781 = vmatprep.subr.bf16.mxu1 %v9282_v18 }
 0xe4d   :  { %5369 = vmatprep.mubr.f32.mxu0 %v9281_v8  ;;  %8777 = vmatprep.subr.msk.bf16.mxu0 %vm9326_vm2, %v10137_v2 }
 0xe4e   :  { %8335 = vmatmul.mubr.f32.vlgmr.msra.gmra.mrb[66].mxu1 %v9281_v8 }
 0xe4f   :  { %8784 = vmatpush3.bf16.msk.msra.mxu1 %vm9326_vm2, %v10169_v49  ;;  %8341 = vmatprep.mubr.msk.f32.mxu1 %vm9283_vm5, %v9281_v8 }
 0xe50   :  { %8791 = vmatprep.subr.bf16.mxu1 %v9282_v18 }
 0xe52   :  { %5370 = vmatmul.mubr.f32.vlgmr.msra.gmra.mrb[32].mxu0 %v9281_v8  ;;  %8342 = vmatmul.mubr.msk.f32.vlgmr.msra.gmra.mrb[68].mxu1 %vm72_vm4, %v9934_v53 }
 0xe53   :  { %8780 = vmatpush1.bf16.msk.msra.mxu0 %vm9326_vm2, %v10167_v47  ;;  %5538 = vmatprep.mubr.f32.mxu0 %v9281_v8 }
 0xe54   :  { %8787 = vmatprep.subr.msk.bf16.mxu0 %vm9326_vm2, %v10185_v57  ;;  %8794 = vmatpush3.bf16.msk.msra.mxu1 %vm9326_vm2, %v10199_v60 }
 0xe55   :  { %8348 = vmatprep.mubr.msk.f32.mxu1 %vm9283_vm5, %v9281_v8  ;;  %8801 = vmatprep.subr.bf16.mxu1 %v9282_v18 }
 0xe56   :  { %7873 = vmatmul.mubr.msk.f32.vlgmr.msra.gmra.mrb[34].mxu0 %vm72_vm4, %v9934_v53 }
 0xe57   :  { %8790 = vmatpush1.bf16.msk.msra.mxu0 %vm9326_vm2, %v10197_v58  ;;  %5682 = vmatprep.mubr.f32.mxu0 %v9281_v8 }
 0xe58   :  { %8797 = vmatprep.subr.msk.bf16.mxu0 %vm9326_vm2, %v10137_v2 }
 0xf19   :  { %v5015_v19 = vpop.f32.mrb[30].mxu0  ;;  %v5086_v10 = vpop.f32.mrb[62].mxu1 }
 0xf1a   :  { %v8945_v62 = vadd.f32 %v5015_v19, %v9868_v25  ;;  %v5017_v0 = vpop.f32.mrb[31].mxu0  ;;  %v8322_v1 = vpop.f32.mrb[63].mxu1  ;;  %v5104_v28 = vadd.f32 %v9882_v54, %v5086_v10 }
 0xf1b   :  { %v8946_v59 = vadd.f32 %v5017_v0, %v9873_v27 }
 0xf1c   :  { %v7844_v63 = vmul.f32 -1.442695, %v8945_v62 }
 0xf1d   :  { %v5292_v53 = vpop.f32.mrb[64].mxu1  ;;  %v7845_v5 = vmul.f32 -1.442695, %v8946_v59 }
 0xf1e   :  { %9166 = vpow2.f32 %v7844_v63  ;;  %v8329_v3 = vpop.f32.mrb[65].mxu1  ;;  %v5293_v55 = vadd.f32 %v5292_v53, %v10281_v40 }
 0xf1f   :  { %9168 = vpow2.f32 %v7845_v5 }
 0xf21   :  { %v5442_v12 = vpop.f32.mrb[66].mxu1 }
 0xf22   :  { %v8336_v11 = vpop.f32.mrb[67].mxu1  ;;  %v5466_v54 = vadd.f32 %v10278_v38, %v5442_v12 }
 0xf25   :  { %v5371_v25 = vpop.f32.mrb[32].mxu0  ;;  %v10265_v14 = vpop.f32.mrb[68].mxu1 }
 0xf26   :  { %v8947_v27 = vadd.f32 %v5371_v25, %v10263_v7  ;;  %v5373_v41 = vpop.f32.mrb[33].mxu0  ;;  %v8343_v15 = vpop.f32.mrb[69].mxu1 }
 0xf27   :  { %v8948_v21 = vadd.f32 %v5373_v41, %v10268_v13 }
 0xf28   :  { %v9167_v23 = vpop.eup %9166  ;;  %v7868_v24 = vmul.f32 -1.442695, %v8947_v27 }
 0xf29   :  { %v5098_v20 = vadd.f32 1.0, %v9167_v23  ;;  %v7869_v31 = vmul.f32 -1.442695, %v8948_v21  ;;  %v9169_v22 = vpop.eup %9168  ;;  %v5612_v21 = vadd.f32 %v10265_v14, %v10281_v40 }
 0xf2a   :  { %9170 = vpow2.f32 %v7868_v24  ;;  %v5099_v33 = vadd.f32 1.0, %v9169_v22 }
 0xf2b   :  { %9172 = vrcp.f32 %v5098_v20 }
 0xf2c   :  { %9174 = vpow2.f32 %v7869_v31 }
 0xf2d   :  { %9176 = vrcp.f32 %v5099_v33 }
 0xf34   :  { %v9171_v39 = vpop.eup %9170 }
 0xf35   :  { %v9173_v34 = vpop.eup %9172  ;;  %v5454_v29 = vadd.f32 1.0, %v9171_v39 }
 0xf36   :  { %v5105_v32 = vmul.f32 %v9173_v34, %v5104_v28  ;;  %v9175_v37 = vpop.eup %9174 }
 0xf37   :  { %9178 = vrcp.f32 %v5454_v29  ;;  %v5455_v42 = vadd.f32 1.0, %v9175_v37  ;;  %v9177_v43 = vpop.eup %9176 }
 0xf38   :  { %v5106_v61 = vadd.f32 %v5105_v32, %v4943_v30  ;;  %v5108_v45 = vsub.f32 1.0, %v9177_v43  ;;  %v5110_v26 = vmul.f32 %v9177_v43, %v10174_v17 }
 0xf3a   :  { %9180 = vtanh.f32 %v5106_v61 }
 0xf3b   :  { %9182 = vrcp.f32 %v5455_v42 }
 0xf41   :  { %v9179_v44 = vpop.eup %9178 }
 0xf42   :  { %v5467_v16 = vmul.f32 %v9179_v44, %v5466_v54 }
 0xf44   :  { %v9181_v46 = vpop.eup %9180  ;;  %v5468_v51 = vadd.f32 %v5467_v16, %v5293_v55 }
 0xf45   :  { %v5109_v56 = vmul.f32 %v9181_v46, %v5108_v45  ;;  %v9183_v48 = vpop.eup %9182 }
 0xf46   :  { %9184 = vtanh.f32 %v5468_v51  ;;  %v5470_v19 = vsub.f32 1.0, %v9183_v48  ;;  %v5472_v0 = vmul.f32 0.0, %v9183_v48 }
 0xf47   :  { %v10286_v50 = vadd.f32 %v5110_v26, %v5109_v56 }
 0xf50   :  { %v9185_v10 = vpop.eup %9184 }
 0xf51   :  { %v5471_v62 = vmul.f32 %v9185_v10, %v5470_v19 }
 0xf53   :  { %v5473_v1 = vadd.f32 %v5472_v0, %v5471_v62 }
 0xf55   :  { %7878 = vmatmul.mubr.msk.f32.vlgmr.msra.gmra.mrb[34].mxu0 %vm72_vm4, %v5473_v1  ;;  %8349 = vmatmul.mubr.msk.f32.vlgmr.msra.gmra.mrb[70].mxu1 %vm72_vm4, %v5473_v1 }
 0xf56   :  { %8800 = vmatpush1.bf16.msk.msra.mxu0 %vm9326_vm2, %v10167_v47  ;;  %8804 = vmatpush3.bf16.msk.msra.mxu1 %vm9326_vm2, %v10169_v49 }
 0xf57   :  { %5845 = vmatprep.mubr.f32.mxu0 %v9281_v8  ;;  %8355 = vmatprep.mubr.msk.f32.mxu1 %vm9283_vm5, %v9281_v8 }
 0xf58   :  { %8807 = vmatprep.subr.msk.bf16.mxu0 %vm9326_vm2, %v10185_v57  ;;  %8811 = vmatprep.subr.bf16.mxu1 %v9282_v18 }
 0xf59   :  { %7885 = vmatmul.mubr.msk.f32.vlgmr.msra.gmra.mrb[36].mxu0 %vm72_vm4, %v9975_v36  ;;  %8356 = vmatmul.mubr.msk.f32.vlgmr.msra.gmra.mrb[72].mxu1 %vm72_vm4, %v9975_v36 }
 0xf5a   :  { %8810 = vmatpush1.bf16.msk.msra.mxu0 %vm9326_vm2, %v10197_v58  ;;  %8814 = vmatpush3.bf16.msk.msra.mxu1 %vm9326_vm2, %v10199_v60 }
 0xf5b   :  { %5989 = vmatprep.mubr.f32.mxu0 %v9281_v8  ;;  %8362 = vmatprep.mubr.msk.f32.mxu1 %vm9283_vm5, %v9281_v8 }
 0xf5c   :  { %8817 = vmatprep.subr.msk.bf16.mxu0 %vm9326_vm2, %v10137_v2  ;;  %8821 = vmatprep.subr.bf16.mxu1 %v9282_v18 }
0x1028   :  { %v5684_v36 = vpop.f32.mrb[34].mxu0  ;;  %v5755_v63 = vpop.f32.mrb[70].mxu1 }
0x1029   :  { %v8949_v59 = vadd.f32 %v5684_v36, %v10263_v7  ;;  %v5686_v53 = vpop.f32.mrb[35].mxu0  ;;  %v8350_v3 = vpop.f32.mrb[71].mxu1  ;;  %v5773_v24 = vadd.f32 %v10278_v38, %v5755_v63 }
0x102a   :  { %v8950_v6 = vadd.f32 %v5686_v53, %v10268_v13 }
0x102b   :  { %v7881_v5 = vmul.f32 -1.442695, %v8949_v59 }
0x102c   :  { %v5918_v12 = vpop.f32.mrb[72].mxu1  ;;  %v7882_v25 = vmul.f32 -1.442695, %v8950_v6 }
0x102d   :  { %9186 = vpow2.f32 %v7881_v5  ;;  %v8357_v11 = vpop.f32.mrb[73].mxu1  ;;  %v5919_v48 = vadd.f32 %v5918_v12, %v10281_v40 }
0x102e   :  { %9188 = vpow2.f32 %v7882_v25 }
0x1037   :  { %v9187_v27 = vpop.eup %9186 }
0x1038   :  { %v5767_v41 = vadd.f32 1.0, %v9187_v27  ;;  %v9189_v15 = vpop.eup %9188 }
0x1039   :  { %v5768_v23 = vadd.f32 1.0, %v9189_v15 }
0x103a   :  { %9190 = vrcp.f32 %v5767_v41 }
0x103b   :  { %9192 = vrcp.f32 %v5768_v23 }
0x1044   :  { %v9191_v20 = vpop.eup %9190 }
0x1045   :  { %v5774_v31 = vmul.f32 %v9191_v20, %v5773_v24  ;;  %v9193_v33 = vpop.eup %9192 }
0x1046   :  { %v5777_v39 = vsub.f32 1.0, %v9193_v33  ;;  %v5779_v29 = vmul.f32 %v9193_v33, %v5473_v1 }
0x1047   :  { %v5775_v22 = vadd.f32 %v5774_v31, %v5612_v21 }
0x1049   :  { %9194 = vtanh.f32 %v5775_v22 }
0x1053   :  { %v9195_v28 = vpop.eup %9194 }
0x1054   :  { %v5778_v34 = vmul.f32 %v9195_v28, %v5777_v39 }
0x1056   :  { %v5780_v30 = vadd.f32 %v5779_v29, %v5778_v34 }
0x1058   :  { %7890 = vmatmul.mubr.msk.f32.vlgmr.msra.gmra.mrb[36].mxu0 %vm72_vm4, %v5780_v30  ;;  %8363 = vmatmul.mubr.msk.f32.vlgmr.msra.gmra.mrb[74].mxu1 %vm72_vm4, %v5780_v30 }
0x1059   :  { %8820 = vmatpush1.bf16.msk.msra.mxu0 %vm9326_vm2, %v10167_v47  ;;  %8824 = vmatpush3.bf16.msk.msra.mxu1 %vm9326_vm2, %v10169_v49 }
0x105a   :  { %6152 = vmatprep.mubr.f32.mxu0 %v9281_v8  ;;  %8369 = vmatprep.mubr.msk.f32.mxu1 %vm9283_vm5, %v9281_v8 }
0x105b   :  { %8827 = vmatprep.subr.msk.bf16.mxu0 %vm9326_vm2, %v10185_v57  ;;  %8831 = vmatprep.subr.bf16.mxu1 %v9282_v18 }
0x105c   :  { %7897 = vmatmul.mubr.msk.f32.vlgmr.msra.gmra.mrb[38].mxu0 %vm72_vm4, %v10016_v52  ;;  %8370 = vmatmul.mubr.msk.f32.vlgmr.msra.gmra.mrb[76].mxu1 %vm72_vm4, %v10016_v52 }
0x105d   :  { %8830 = vmatpush1.bf16.msk.msra.mxu0 %vm9326_vm2, %v10197_v58  ;;  %8834 = vmatpush3.bf16.msk.msra.mxu1 %vm9326_vm2, %v10199_v60 }
0x105e   :  { %6296 = vmatprep.mubr.f32.mxu0 %v9281_v8  ;;  %8376 = vmatprep.mubr.msk.f32.mxu1 %vm9283_vm5, %v9281_v8 }
0x105f   :  { %8837 = vmatprep.subr.msk.bf16.mxu0 %vm9326_vm2, %v10137_v2  ;;  %8841 = vmatprep.subr.bf16.mxu1 %v9282_v18 }
0x112b   :  { %v5991_v52 = vpop.f32.mrb[36].mxu0  ;;  %v6062_v14 = vpop.f32.mrb[74].mxu1 }
0x112c   :  { %v8951_v32 = vadd.f32 %v5991_v52, %v10263_v7  ;;  %v5993_v61 = vpop.f32.mrb[37].mxu0  ;;  %v8364_v37 = vpop.f32.mrb[75].mxu1  ;;  %v6080_v56 = vadd.f32 %v10278_v38, %v6062_v14 }
0x112d   :  { %v8952_v42 = vadd.f32 %v5993_v61, %v10268_v13 }
0x112e   :  { %v7893_v54 = vmul.f32 -1.442695, %v8951_v32 }
0x112f   :  { %v6225_v43 = vpop.f32.mrb[76].mxu1  ;;  %v7894_v55 = vmul.f32 -1.442695, %v8952_v42 }
0x1130   :  { %9196 = vpow2.f32 %v7893_v54  ;;  %v8371_v44 = vpop.f32.mrb[77].mxu1  ;;  %v6226_v22 = vadd.f32 %v6225_v43, %v10281_v40 }
0x1131   :  { %9198 = vpow2.f32 %v7894_v55 }
0x113a   :  { %v9197_v16 = vpop.eup %9196 }
0x113b   :  { %v6074_v45 = vadd.f32 1.0, %v9197_v16  ;;  %v9199_v46 = vpop.eup %9198 }
0x113c   :  { %v6075_v51 = vadd.f32 1.0, %v9199_v46 }
0x113d   :  { %9200 = vrcp.f32 %v6074_v45 }
0x113e   :  { %9202 = vrcp.f32 %v6075_v51 }
0x1147   :  { %v9201_v26 = vpop.eup %9200 }
0x1148   :  { %v6081_v19 = vmul.f32 %v9201_v26, %v6080_v56  ;;  %v9203_v62 = vpop.eup %9202 }
0x1149   :  { %v6084_v0 = vsub.f32 1.0, %v9203_v62  ;;  %v6086_v63 = vmul.f32 %v9203_v62, %v5780_v30 }
0x114a   :  { %v6082_v10 = vadd.f32 %v6081_v19, %v5919_v48 }
0x114c   :  { %9204 = vtanh.f32 %v6082_v10 }
0x1156   :  { %v9205_v1 = vpop.eup %9204 }
0x1157   :  { %v6085_v36 = vmul.f32 %v9205_v1, %v6084_v0 }
0x1159   :  { %v6087_v59 = vadd.f32 %v6086_v63, %v6085_v36 }
0x115b   :  { %7902 = vmatmul.mubr.msk.f32.vlgmr.msra.gmra.mrb[38].mxu0 %vm72_vm4, %v6087_v59  ;;  %8377 = vmatmul.mubr.msk.f32.vlgmr.msra.gmra.mrb[78].mxu1 %vm72_vm4, %v6087_v59 }
0x115c   :  { %8840 = vmatpush1.bf16.msk.msra.mxu0 %vm9326_vm2, %v10167_v47  ;;  %8844 = vmatpush3.bf16.msk.msra.mxu1 %vm9326_vm2, %v10169_v49 }
0x115d   :  { %6459 = vmatprep.mubr.f32.mxu0 %v9281_v8  ;;  %8383 = vmatprep.mubr.msk.f32.mxu1 %vm9283_vm5, %v9281_v8 }
0x115e   :  { %8847 = vmatprep.subr.msk.bf16.mxu0 %vm9326_vm2, %v10185_v57  ;;  %8851 = vmatprep.subr.bf16.mxu1 %v9282_v18 }
0x115f   :  { %7909 = vmatmul.mubr.msk.f32.vlgmr.msra.gmra.mrb[40].mxu0 %vm72_vm4, %v10057_v35  ;;  %8384 = vmatmul.mubr.msk.f32.vlgmr.msra.gmra.mrb[80].mxu1 %vm72_vm4, %v10057_v35 }
0x1160   :  { %8850 = vmatpush1.bf16.msk.msra.mxu0 %vm9326_vm2, %v10197_v58  ;;  %8854 = vmatpush3.bf16.msk.msra.mxu1 %vm9326_vm2, %v10199_v60 }
0x1161   :  { %6603 = vmatprep.mubr.f32.mxu0 %v9281_v8  ;;  %8390 = vmatprep.mubr.msk.f32.mxu1 %vm9283_vm5, %v9281_v8 }
0x1162   :  { %8857 = vmatprep.subr.msk.bf16.mxu0 %vm9326_vm2, %v10137_v2  ;;  %8861 = vmatprep.subr.bf16.mxu1 %v9282_v18 }
0x122e   :  { %v6298_v35 = vpop.f32.mrb[38].mxu0  ;;  %v6369_v53 = vpop.f32.mrb[78].mxu1 }
0x122f   :  { %v8953_v3 = vadd.f32 %v6298_v35, %v10263_v7  ;;  %v6300_v5 = vpop.f32.mrb[39].mxu0  ;;  %v8378_v6 = vpop.f32.mrb[79].mxu1  ;;  %v6387_v21 = vadd.f32 %v10278_v38, %v6369_v53 }
0x1230   :  { %v8954_v11 = vadd.f32 %v6300_v5, %v10268_v13 }
0x1231   :  { %v7905_v12 = vmul.f32 -1.442695, %v8953_v3 }
0x1232   :  { %v6532_v25 = vpop.f32.mrb[80].mxu1  ;;  %v7906_v41 = vmul.f32 -1.442695, %v8954_v11 }
0x1233   :  { %9206 = vpow2.f32 %v7905_v12  ;;  %v8385_v27 = vpop.f32.mrb[81].mxu1  ;;  %v6533_v19 = vadd.f32 %v6532_v25, %v10281_v40 }
0x1234   :  { %9208 = vpow2.f32 %v7906_v41 }
0x123d   :  { %v9207_v15 = vpop.eup %9206 }
0x123e   :  { %v6381_v23 = vadd.f32 1.0, %v9207_v15  ;;  %v9209_v24 = vpop.eup %9208 }
0x123f   :  { %v6382_v20 = vadd.f32 1.0, %v9209_v24 }
0x1240   :  { %9210 = vrcp.f32 %v6381_v23 }
0x1241   :  { %9212 = vrcp.f32 %v6382_v20 }
0x124a   :  { %v9211_v31 = vpop.eup %9210 }
0x124b   :  { %v6388_v33 = vmul.f32 %v9211_v31, %v6387_v21  ;;  %v9213_v28 = vpop.eup %9212 }
0x124c   :  { %v6391_v34 = vsub.f32 1.0, %v9213_v28  ;;  %v6393_v52 = vmul.f32 %v9213_v28, %v6087_v59 }
0x124d   :  { %v6389_v39 = vadd.f32 %v6388_v33, %v6226_v22 }
0x124f   :  { %9214 = vtanh.f32 %v6389_v39 }
0x1259   :  { %v9215_v29 = vpop.eup %9214 }
0x125a   :  { %v6392_v30 = vmul.f32 %v9215_v29, %v6391_v34 }
0x125c   :  { %v6394_v14 = vadd.f32 %v6393_v52, %v6392_v30 }
0x125e   :  { %7914 = vmatmul.mubr.msk.f32.vlgmr.msra.gmra.mrb[40].mxu0 %vm72_vm4, %v6394_v14  ;;  %8391 = vmatmul.mubr.msk.f32.vlgmr.msra.gmra.mrb[82].mxu1 %vm72_vm4, %v6394_v14 }
0x125f   :  { %8860 = vmatpush1.bf16.msk.msra.mxu0 %vm9326_vm2, %v10167_v47  ;;  %8864 = vmatpush3.bf16.msk.msra.mxu1 %vm9326_vm2, %v10169_v49 }
0x1260   :  { %6766 = vmatprep.mubr.f32.mxu0 %v9281_v8  ;;  %8397 = vmatprep.mubr.msk.f32.mxu1 %vm9283_vm5, %v9281_v8 }
0x1261   :  { %8867 = vmatprep.subr.msk.bf16.mxu0 %vm9326_vm2, %v10185_v57  ;;  %8871 = vmatprep.subr.bf16.mxu1 %v9282_v18 }
0x1262   :  { %7921 = vmatmul.mubr.msk.f32.vlgmr.msra.gmra.mrb[42].mxu0 %vm72_vm4, %v10098_v9  ;;  %8398 = vmatmul.mubr.msk.f32.vlgmr.msra.gmra.mrb[84].mxu1 %vm72_vm4, %v10098_v9 }
0x1263   :  { %8870 = vmatpush1.bf16.msk.msra.mxu0 %vm9326_vm2, %v10197_v58  ;;  %8874 = vmatpush3.bf16.msk.msra.mxu1 %vm9326_vm2, %v10199_v60 }
0x1264   :  { %6910 = vmatprep.mubr.f32.mxu0 %v9281_v8  ;;  %8404 = vmatprep.mubr.msk.f32.mxu1 %vm9283_vm5, %v9281_v8 }
0x1265   :  { %8877 = vmatprep.subr.msk.bf16.mxu0 %vm9326_vm2, %v10137_v2  ;;  %8881 = vmatprep.subr.bf16.mxu1 %v9282_v18 }
0x1331   :  { %v6605_v9 = vpop.f32.mrb[40].mxu0  ;;  %v6676_v32 = vpop.f32.mrb[82].mxu1 }
0x1332   :  { %v8955_v61 = vadd.f32 %v6605_v9, %v10263_v7  ;;  %v6607_v37 = vpop.f32.mrb[41].mxu0  ;;  %v8392_v54 = vpop.f32.mrb[83].mxu1  ;;  %v6694_v26 = vadd.f32 %v10278_v38, %v6676_v32 }
0x1333   :  { %v8956_v43 = vadd.f32 %v6607_v37, %v10268_v13 }
0x1334   :  { %v7917_v42 = vmul.f32 -1.442695, %v8955_v61 }
0x1335   :  { %v6839_v44 = vpop.f32.mrb[84].mxu1  ;;  %v7918_v16 = vmul.f32 -1.442695, %v8956_v43 }
0x1336   :  { %9216 = vpow2.f32 %v7917_v42  ;;  %v8399_v55 = vpop.f32.mrb[85].mxu1  ;;  %v6840_v31 = vadd.f32 %v6839_v44, %v10281_v40 }
0x1337   :  { %9218 = vpow2.f32 %v7918_v16 }
0x1340   :  { %v9217_v45 = vpop.eup %9216 }
0x1341   :  { %v6688_v46 = vadd.f32 1.0, %v9217_v45  ;;  %v9219_v51 = vpop.eup %9218 }
0x1342   :  { %v6689_v56 = vadd.f32 1.0, %v9219_v51 }
0x1343   :  { %9220 = vrcp.f32 %v6688_v46 }
0x1344   :  { %9222 = vrcp.f32 %v6689_v56 }
0x134d   :  { %v9221_v48 = vpop.eup %9220 }
0x134e   :  { %v6695_v10 = vmul.f32 %v9221_v48, %v6694_v26  ;;  %v9223_v0 = vpop.eup %9222 }
0x134f   :  { %v6698_v1 = vsub.f32 1.0, %v9223_v0  ;;  %v6700_v59 = vmul.f32 %v9223_v0, %v6394_v14 }
0x1350   :  { %v6696_v62 = vadd.f32 %v6695_v10, %v6533_v19 }
0x1352   :  { %9224 = vtanh.f32 %v6696_v62 }
0x135c   :  { %v9225_v36 = vpop.eup %9224 }
0x135d   :  { %v6699_v63 = vmul.f32 %v9225_v36, %v6698_v1 }
0x135f   :  { %v6701_v35 = vadd.f32 %v6700_v59, %v6699_v63 }
0x1361   :  { %7926 = vmatmul.mubr.msk.f32.vlgmr.msra.gmra.mrb[42].mxu0 %vm72_vm4, %v6701_v35  ;;  %8405 = vmatmul.mubr.msk.f32.vlgmr.msra.gmra.mrb[86].mxu1 %vm72_vm4, %v6701_v35 }
0x1362   :  { %8880 = vmatpush1.bf16.msk.msra.mxu0 %vm9326_vm2, %v10167_v47  ;;  %8884 = vmatpush3.bf16.msk.msra.mxu1 %vm9326_vm2, %v10169_v49 }
0x1363   :  { %7073 = vmatprep.mubr.f32.mxu0 %v9281_v8  ;;  %8411 = vmatprep.mubr.msk.f32.mxu1 %vm9283_vm5, %v9281_v8 }
0x1364   :  { %8887 = vmatprep.subr.msk.bf16.mxu0 %vm9326_vm2, %v10185_v57  ;;  %8891 = vmatprep.subr.bf16.mxu1 %v9282_v18 }
0x1365   :  { %7933 = vmatmul.mubr.msk.f32.vlgmr.msra.gmra.mrb[44].mxu0 %vm72_vm4, %v10174_v17  ;;  %8412 = vmatmul.mubr.msk.f32.vlgmr.msra.gmra.mrb[88].mxu1 %vm72_vm4, %v10174_v17 }
0x1366   :  { %8890 = vmatpush1.bf16.msk.msra.mxu0 %vm9326_vm2, %v10197_v58  ;;  %8894 = vmatpush3.bf16.msk.msra.mxu1 %vm9326_vm2, %v10199_v60 }
0x1367   :  { %7217 = vmatprep.mubr.f32.mxu0 %v9281_v8  ;;  %8418 = vmatprep.mubr.msk.f32.mxu1 %vm9283_vm5, %v9281_v8 }
0x1368   :  { %8897 = vmatprep.subr.msk.bf16.mxu0 %vm9326_vm2, %v10137_v2  ;;  %8901 = vmatprep.subr.bf16.mxu1 %v9282_v18 }
0x1434   :  { %v6912_v17 = vpop.f32.mrb[42].mxu0  ;;  %v6983_v53 = vpop.f32.mrb[86].mxu1 }
0x1435   :  { %v8957_v3 = vadd.f32 %v6912_v17, %v10263_v7  ;;  %v6914_v5 = vpop.f32.mrb[43].mxu0  ;;  %v8406_v6 = vpop.f32.mrb[87].mxu1  ;;  %v7001_v20 = vadd.f32 %v10278_v38, %v6983_v53 }
0x1436   :  { %v8958_v11 = vadd.f32 %v6914_v5, %v10268_v13 }
0x1437   :  { %v7929_v12 = vmul.f32 -1.442695, %v8957_v3 }
0x1438   :  { %v7146_v25 = vpop.f32.mrb[88].mxu1  ;;  %v7930_v41 = vmul.f32 -1.442695, %v8958_v11 }
0x1439   :  { %9226 = vpow2.f32 %v7929_v12  ;;  %v8413_v27 = vpop.f32.mrb[89].mxu1  ;;  %v7147_v43 = vadd.f32 %v7146_v25, %v10281_v40 }
0x143a   :  { %9228 = vpow2.f32 %v7930_v41 }
0x1443   :  { %v9227_v15 = vpop.eup %9226 }
0x1444   :  { %v6995_v23 = vadd.f32 1.0, %v9227_v15  ;;  %v9229_v2 = vpop.eup %9228 }
0x1445   :  { %v6996_v24 = vadd.f32 1.0, %v9229_v2 }
0x1446   :  { %9230 = vrcp.f32 %v6995_v23 }
0x1447   :  { %9232 = vrcp.f32 %v6996_v24 }
0x1450   :  { %v9231_v21 = vpop.eup %9230 }
0x1451   :  { %v7002_v22 = vmul.f32 %v9231_v21, %v7001_v20  ;;  %v9233_v39 = vpop.eup %9232 }
0x1452   :  { %v7005_v28 = vsub.f32 1.0, %v9233_v39  ;;  %v7007_v30 = vmul.f32 %v9233_v39, %v6701_v35 }
0x1453   :  { %v7003_v33 = vadd.f32 %v7002_v22, %v6840_v31 }
0x1455   :  { %9234 = vtanh.f32 %v7003_v33 }
0x145f   :  { %v9235_v34 = vpop.eup %9234 }
0x1460   :  { %v7006_v29 = vmul.f32 %v9235_v34, %v7005_v28 }
0x1462   :  { %v7008_v52 = vadd.f32 %v7007_v30, %v7006_v29 }
0x1464   :  { %7938 = vmatmul.mubr.msk.f32.vlgmr.msra.gmra.mrb[44].mxu0 %vm72_vm4, %v7008_v52  ;;  %8419 = vmatmul.mubr.msk.f32.vlgmr.msra.gmra.mrb[90].mxu1 %vm72_vm4, %v7008_v52 }
0x1465   :  { %8900 = vmatpush1.bf16.msk.msra.mxu0 %vm9326_vm2, %v10167_v47  ;;  %8904 = vmatpush3.bf16.msk.msra.mxu1 %vm9326_vm2, %v10169_v49 }
0x1466   :  { %7383 = vmatprep.mubr.f32.mxu0 %v9281_v8  ;;  %8425 = vmatprep.mubr.msk.f32.mxu1 %vm9283_vm5, %v9281_v8 }
0x1467   :  { %8907 = vmatprep.subr.msk.bf16.mxu0 %vm9326_vm2, %v10185_v57  ;;  %8911 = vmatprep.subr.bf16.mxu1 %v9282_v18 }
0x1468   :  { %7945 = vmatmul.mubr.msk.f32.vlgmr.msra.gmra.mrb[46].mxu0 %vm72_vm4, %v10286_v50  ;;  %8426 = vmatmul.mubr.msk.f32.vlgmr.msra.gmra.mrb[92].mxu1 %vm72_vm4, %v10286_v50 }
0x1469   :  { %8910 = vmatpush1.bf16.msk.msra.mxu0 %vm9326_vm2, %v10197_v58  ;;  %8914 = vmatpush3.bf16.msk.msra.mxu1 %vm9326_vm2, %v10199_v60 }
0x146a   :  { %7527 = vmatprep.mubr.f32.mxu0 %v9281_v8  ;;  %8432 = vmatprep.mubr.msk.f32.mxu1 %vm9283_vm5, %v9281_v8 }
0x1537   :  { %v7219_v18 = vpop.f32.mrb[44].mxu0  ;;  %v7290_v47 = vpop.f32.mrb[90].mxu1 }
0x1538   :  { %v8959_v49 = vadd.f32 %v7219_v18, %v10263_v7  ;;  %v7221_v57 = vpop.f32.mrb[45].mxu0  ;;  %v8420_v14 = vpop.f32.mrb[91].mxu1  ;;  %v7308_v8 = vadd.f32 %v10278_v38, %v7290_v47 }
0x1539   :  { %v8960_v9 = vadd.f32 %v7221_v57, %v10268_v13 }
0x153a   :  { %v7941_v50 = vmul.f32 -1.442695, %v8959_v49 }
0x153b   :  { %v7456_v32 = vpop.f32.mrb[92].mxu1  ;;  %v7942_v61 = vmul.f32 -1.442695, %v8960_v9 }
0x153c   :  { %9236 = vpow2.f32 %v7941_v50  ;;  %v8427_v58 = vpop.f32.mrb[93].mxu1  ;;  %v7457_v6 = vadd.f32 %v7456_v32, %v10281_v40 }
0x153d   :  { %9238 = vpow2.f32 %v7942_v61 }
0x1546   :  { %v9237_v4 = vpop.eup %9236 }
0x1547   :  { %v7302_v60 = vadd.f32 1.0, %v9237_v4  ;;  %v9239_v37 = vpop.eup %9238 }
0x1548   :  { %v7303_v54 = vadd.f32 1.0, %v9239_v37 }
0x1549   :  { %9240 = vrcp.f32 %v7302_v60 }
0x154a   :  { %9242 = vrcp.f32 %v7303_v54 }
0x1553   :  { %v9241_v42 = vpop.eup %9240 }
0x1554   :  { %v7309_v44 = vmul.f32 %v9241_v42, %v7308_v8  ;;  %v9243_v16 = vpop.eup %9242 }
0x1555   :  { %v7312_v45 = vsub.f32 1.0, %v9243_v16  ;;  %v7314_v56 = vmul.f32 %v9243_v16, %v7008_v52 }
0x1556   :  { %v7310_v55 = vadd.f32 %v7309_v44, %v7147_v43 }
0x1558   :  { %9244 = vtanh.f32 %v7310_v55 }
0x1562   :  { %v9245_v46 = vpop.eup %9244 }
0x1563   :  { %v7313_v51 = vmul.f32 %v9245_v46, %v7312_v45 }
0x1565   :  { %v7315_v26 = vadd.f32 %v7314_v56, %v7313_v51 }
0x1567   :  { %7950 = vmatmul.mubr.msk.f32.vlgmr.msra.gmra.mrb[46].mxu0 %vm72_vm4, %v7315_v26  ;;  %8433 = vmatmul.mubr.msk.f32.vlgmr.msra.gmra.mrb[94].mxu1 %vm72_vm4, %v7315_v26 }
0x163a   :  { %v7529_v48 = vpop.f32.mrb[46].mxu0  ;;  %v7600_v19 = vpop.f32.mrb[94].mxu1 }
0x163b   :  { %v8961_v10 = vadd.f32 %v7529_v48, %v10263_v7  ;;  %v7531_v62 = vpop.f32.mrb[47].mxu0  ;;  %v8434_v0 = vpop.f32.mrb[95].mxu1  ;;  %v7618_v3 = vadd.f32 %v10278_v38, %v7600_v19 }
0x163c   :  { %v8962_v36 = vadd.f32 %v7531_v62, %v10268_v13 }
0x163d   :  { %v7953_v1 = vmul.f32 -1.442695, %v8961_v10 }
0x163e   :  { %v7954_v63 = vmul.f32 -1.442695, %v8962_v36 }
0x163f   :  { %9246 = vpow2.f32 %v7953_v1 }
0x1640   :  { %9248 = vpow2.f32 %v7954_v63 }
0x1649   :  { %v9247_v59 = vpop.eup %9246 }
0x164a   :  { %v7612_v35 = vadd.f32 1.0, %v9247_v59  ;;  %v9249_v17 = vpop.eup %9248 }
0x164b   :  { %v7613_v53 = vadd.f32 1.0, %v9249_v17 }
0x164c   :  { %9250 = vrcp.f32 %v7612_v35 }
0x164d   :  { %9252 = vrcp.f32 %v7613_v53 }
0x1656   :  { %v9251_v5 = vpop.eup %9250 }
0x1657   :  { %v7619_v12 = vmul.f32 %v9251_v5, %v7618_v3  ;;  %v9253_v11 = vpop.eup %9252 }
0x1658   :  { %v7622_v25 = vsub.f32 1.0, %v9253_v11  ;;  %v7624_v41 = vmul.f32 %v9253_v11, %v7315_v26 }
0x1659   :  { %v7620_v7 = vadd.f32 %v7619_v12, %v7457_v6 }
0x165b   :  { %9254 = vtanh.f32 %v7620_v7 }
0x1665   :  { %v9255_v13 = vpop.eup %9254 }
0x1666   :  { %v7623_v27 = vmul.f32 %v9255_v13, %v7622_v25 }
0x1668   :  { %v7625_v15 = vadd.f32 %v7624_v41, %v7623_v27 }
0x166a   :  { %7627 = vst.msk [vmem:[#allocation2] sm:$0x3] %vm7626_vm6, %v7625_v15 }
0x166b   :  { %9267 = shalt.err (!%p9264_p4)
}
0x166c   :  { %s9268_s7 = scalar_lea.hbm %s10524_s5, 32 }
0x166d   :  { %p9269_p5 = scmp.ne.s32.totalorder %s10524_s5, %s9268_s7  ;;  %p9272_p6 = scmp.lt.u32.totalorder %s9268_s7, %s10524_s5 }
0x166f   :  { %p9274_p7 = pnand %p9272_p6, %p9269_p5 }
0x1671   :  { %9277 = shalt.err (!%p9274_p7)
}
0x1672   :  { %7637 = dma.vmem_to_hbm [thread:$0]  %s7635_s28, 32, %s10524_s5, [#allocation3]  }
0x1673   :  { %9278 = dma.done.wait [#allocation3], 32  }
0x1674   :  { %9279 = vsyncadd [#allocation3], 4294967264 }
0x1675   :  { %7641 = vsyncpa [#allocation3], 1 }

</bundles_post_ra>
